<compile_context>
chip_gen: v7x
topology: tpu7x:2x2x1
jax: 0.10.0
libtpu: 0.0.40
codegen_flags: <defaults>
</compile_context>

<pallas_src>
import functools
import itertools

import numpy as np

import jax
import jax.numpy as jnp
from jax.experimental import pallas as pl
from jax.experimental.pallas import tpu as pltpu

EPS = 1e-5


# ---------------------------------------------------------------------------
# Fused forward kernel (gridless, everything resident in VMEM)
# ---------------------------------------------------------------------------
def _fused_forward_kernel(
    x_ref,        # (N*H, W*C)        f32  input in row layout, channels zero-padded to C
    wtrunk_ref,   # (3*L, W*C, W*C)   bf16 block-banded 3x3 conv weights (L = 1 + 2*num_blocks)
    gbt_ref,      # (2*L, C)          f32  BN gamma/beta per trunk conv (rows [g0,b0,g1,b1,...])
    whead_ref,    # (W*C, 3*W)        bf16 fused policy(2ch)+value(1ch) 1x1 conv (block-diag in x)
    gbh_ref,      # (2, 3)            f32  head BN gamma/beta
    wfc_ref,      # (3*H*W, HW+VH)    bf16 fused policy-FC + value-FC1 (rows permuted/scattered)
    bfc_ref,      # (1, HW+VH)        f32  fused FC biases
    wv2_ref,      # (VH+1, 1)         f32  value FC2 weight with bias appended
    out_ref,      # (N, OUT_W)        f32  lanes [0,HW) = log-policy, lane HW = value
    f_scr,        # scratch (N, 3*H*W) f32 per-sample flattened head activations
    *, N, H, W, C, num_blocks, VH, OUT_W,
):
    NH, WC, HW, W3 = N * H, W * C, H * W, 3 * W
    cnt = float(N * H * W)
    f32, bf16 = jnp.float32, jnp.bfloat16
    log_w = W.bit_length() - 1                       # W is a power of two (asserted host-side)

    # ---- tiny constant operators built in-register (saves 6 prologue DMA descriptors) ----
    ones_rows = jnp.ones((1, NH), f32)

    ii = jax.lax.broadcasted_iota(jnp.int32, (NH, NH), 0)
    jj = jax.lax.broadcasted_iota(jnp.int32, (NH, NH), 1)
    # Per-image row-shift operators (zero rows at image boundaries => conv zero padding in y).
    s_dn = jnp.where((jj == ii - 1) & ((ii & (H - 1)) != 0), 1.0, 0.0).astype(bf16)
    s_up = jnp.where((jj == ii + 1) & ((ii & (H - 1)) != (H - 1)), 1.0, 0.0).astype(bf16)

    # Channel-sum / channel-tile operators for BatchNorm in row layout (lane = x*C + c).
    r1 = jax.lax.broadcasted_iota(jnp.int32, (WC, C), 0)
    c1 = jax.lax.broadcasted_iota(jnp.int32, (WC, C), 1)
    chan_reduce = jnp.where((r1 & (C - 1)) == c1, 1.0, 0.0)          # (WC, C)
    r2 = jax.lax.broadcasted_iota(jnp.int32, (C, WC), 0)
    c2 = jax.lax.broadcasted_iota(jnp.int32, (C, WC), 1)
    chan_tile = jnp.where((c2 & (C - 1)) == r2, 1.0, 0.0)            # (C, WC)
    # Head variants: 3 channels, lane order k*W + x (k-major so k = lane >> log2(W)).
    r3 = jax.lax.broadcasted_iota(jnp.int32, (W3, 3), 0)
    c3 = jax.lax.broadcasted_iota(jnp.int32, (W3, 3), 1)
    head_reduce = jnp.where(jnp.right_shift(r3, log_w) == c3, 1.0, 0.0)   # (3W, 3)
    r4 = jax.lax.broadcasted_iota(jnp.int32, (3, W3), 0)
    c4 = jax.lax.broadcasted_iota(jnp.int32, (3, W3), 1)
    head_tile = jnp.where(jnp.right_shift(c4, log_w) == r4, 1.0, 0.0)     # (3, 3W)

    def bn_train(z, gamma, beta, reduce_mat, tile_mat):
        # One-pass training-mode BatchNorm (biased variance); stats via MXU (ones-row matmul
        # + 0/1 channel reduction) so the XLU stays free.  All stat math kept in f32.
        lanes = z.shape[1]
        zz = jnp.concatenate([z, z * z], axis=1)                              # (NH, 2*lanes)
        sums = jnp.dot(ones_rows, zz, preferred_element_type=f32)             # (1, 2*lanes)
        s1 = jnp.dot(sums[:, :lanes], reduce_mat, preferred_element_type=f32)  # (1, Cc)
        s2 = jnp.dot(sums[:, lanes:], reduce_mat, preferred_element_type=f32)  # (1, Cc)
        mu = s1 * (1.0 / cnt)
        var = jnp.maximum(s2 * (1.0 / cnt) - mu * mu, 0.0)
        a = gamma * jax.lax.rsqrt(var + EPS)
        b = beta - mu * a
        return (z * jnp.dot(a, tile_mat, preferred_element_type=f32)
                + jnp.dot(b, tile_mat, preferred_element_type=f32))

    def conv3x3_bn(act, layer):
        # 3x3 conv (padding=1) as 3 accumulating MXU matmuls against block-banded weights
        # (dx baked into the weight, dy via the tiny shift matmuls) -- no window extraction,
        # no relayout.  Conv bias omitted: cancelled exactly by the train-mode BN mean.
        a16 = act.astype(bf16)
        dn = jnp.dot(s_dn, a16, preferred_element_type=f32).astype(bf16)    # act[(n, y-1)]
        up = jnp.dot(s_up, a16, preferred_element_type=f32).astype(bf16)    # act[(n, y+1)]
        z = (jnp.dot(dn,  wtrunk_ref[3 * layer + 0], preferred_element_type=f32)
             + jnp.dot(a16, wtrunk_ref[3 * layer + 1], preferred_element_type=f32)
             + jnp.dot(up,  wtrunk_ref[3 * layer + 2], preferred_element_type=f32))
        gamma = gbt_ref[2 * layer: 2 * layer + 1, :]
        beta = gbt_ref[2 * layer + 1: 2 * layer + 2, :]
        return bn_train(z, gamma, beta, chan_reduce, chan_tile)

    # --------------------------------- trunk ---------------------------------
    act = jnp.maximum(conv3x3_bn(x_ref[...], 0), 0.0)
    for blk in range(num_blocks):
        residual = act
        h1 = jnp.maximum(conv3x3_bn(act, 1 + 2 * blk), 0.0)
        h2 = conv3x3_bn(h1, 2 + 2 * blk)
        act = jnp.maximum(h2 + residual, 0.0)

    # ------------------------- fused policy / value heads --------------------
    # One fused 1x1 conv: channels [policy0, policy1, value0], output lanes k*W + x.
    zh = jnp.dot(act.astype(bf16), whead_ref[...], preferred_element_type=f32)   # (NH, 3W)
    ah = jnp.maximum(
        bn_train(zh, gbh_ref[0:1, :], gbh_ref[1:2, :], head_reduce, head_tile), 0.0)

    # Flatten to one row per sample (lane order y*3W + k*W + x) with tiny static VMEM stores;
    # the FC weights were permuted host-side to this order, so no transpose / per-n concat.
    for n in range(N):
        for y in range(H):
            f_scr[n:n + 1, y * W3:(y + 1) * W3] = ah[n * H + y: n * H + y + 1, :]

    flat = f_scr[...].astype(bf16)                                                # (N, 3*HW)
    hv = jnp.dot(flat, wfc_ref[...], preferred_element_type=f32) + bfc_ref[...]   # (N, HW+VH)

    # policy: log_softmax over HW logits (f32)
    logits = hv[:, :HW]
    m = jnp.max(logits, axis=1, keepdims=True)
    lse = jnp.log(jnp.sum(jnp.exp(logits - m), axis=1, keepdims=True)) + m
    logp = logits - lse

    # value: ReLU -> FC2 (+bias via appended ones column) -> tanh
    hval = jnp.concatenate(
        [jnp.maximum(hv[:, HW:], 0.0), jnp.ones((N, 1), f32)], axis=1)            # (N, VH+1)
    value = jnp.tanh(jnp.dot(hval, wv2_ref[...], preferred_element_type=f32))     # (N, 1)

    # Single lane-dense output: [log-policy | value | zero padding].
    pad = jnp.zeros((N, OUT_W - HW - 1), f32)
    out_ref[...] = jnp.concatenate([logp, value, pad], axis=1)


# ---------------------------------------------------------------------------
# Parameter construction (deterministic, synthetic) + host-side packing
# ---------------------------------------------------------------------------
def init_params(key, board_w, board_h, in_channels, hidden, num_blocks):
    counter = itertools.count()

    def nk():
        return jax.random.fold_in(key, next(counter))

    def conv3x3(cin, cout):
        # Conv bias omitted: it feeds a train-mode BatchNorm and is exactly cancelled
        # by the mean subtraction (dead work).  NOT valid for eval-mode BN.
        return {"w": 0.05 * jax.random.normal(nk(), (3, 3, cin, cout), jnp.float32),
                "gamma": jnp.ones((cout,), jnp.float32),
                "beta": jnp.zeros((cout,), jnp.float32)}

    def conv1x1(cin, cout):
        return {"w": 0.05 * jax.random.normal(nk(), (cin, cout), jnp.float32),
                "gamma": jnp.ones((cout,), jnp.float32),
                "beta": jnp.zeros((cout,), jnp.float32)}

    def linear(fin, fout):
        return {"w": 0.05 * jax.random.normal(nk(), (fin, fout), jnp.float32),
                "b": 0.01 * jax.random.normal(nk(), (fout,), jnp.float32)}

    hw = board_w * board_h
    return {
        "init": conv3x3(in_channels, hidden),
        "blocks": [{"c1": conv3x3(hidden, hidden),
                    "c2": conv3x3(hidden, hidden)} for _ in range(num_blocks)],
        "policy_conv": conv1x1(hidden, 2),
        "policy_fc": linear(2 * hw, hw),     # input index order: c*HW + y*W + x (PyTorch .view)
        "value_conv": conv1x1(hidden, 1),
        "value_fc1": linear(hw, 64),
        "value_fc2": linear(64, 1),
    }


def pack_params(params, board_w, board_h, hidden):
    """Host-side (numpy) repack into the kernel's layout-native / fused weight formats."""
    H, W, C = board_h, board_w, hidden
    HW, WC, W3 = H * W, W * C, 3 * W
    VH = int(np.asarray(params["value_fc1"]["b"]).shape[0])

    def to_np(a):
        return np.asarray(a, dtype=np.float32)

    def conv_rowblocks(w):
        # w: (3, 3, cin, C); returns (3, WC, WC) block-banded weights:
        # block[dy][xi*C+ci, xo*C+co] = w[dy, xi-xo+1, ci, co] (zero outside the band
        # => conv zero padding in x handled by the weight itself).
        w = to_np(w)
        cin = w.shape[2]
        wp = np.zeros((3, 3, C, C), np.float32)
        wp[:, :, :cin, :] = w
        blocks = np.zeros((3, WC, WC), np.float32)
        for dyi in range(3):
            for xo in range(W):
                for dxi in range(3):
                    xi = xo + dxi - 1
                    if 0 <= xi < W:
                        blocks[dyi, xi * C:(xi + 1) * C, xo * C:(xo + 1) * C] = wp[dyi, dxi]
        return blocks

    trunk = [params["init"]] + [c for b in params["blocks"] for c in (b["c1"], b["c2"])]
    wtrunk = np.concatenate([conv_rowblocks(c["w"]) for c in trunk], axis=0)      # (3L, WC, WC)
    gb_trunk = np.concatenate(
        [np.stack([to_np(c["gamma"]), to_np(c["beta"])]) for c in trunk], axis=0)  # (2L, C)

    # Fused 1x1 head conv: channels [policy0, policy1, value0], block-diagonal over x,
    # output lane order k*W + x.
    w1 = np.concatenate([to_np(params["policy_conv"]["w"]),
                         to_np(params["value_conv"]["w"])], axis=1)                # (C, 3)
    whead = np.zeros((WC, W3), np.float32)
    for x in range(W):
        for k in range(3):
            whead[x * C:(x + 1) * C, k * W + x] = w1[:, k]

    gb_head = np.stack([
        np.concatenate([to_np(params["policy_conv"]["gamma"]),
                        to_np(params["value_conv"]["gamma"])]),
        np.concatenate([to_np(params["policy_conv"]["beta"]),
                        to_np(params["value_conv"]["beta"])]),
    ])                                                                             # (2, 3)

    # Fused FC: columns [policy logits (HW) | value FC1 (VH)]; rows permuted from PyTorch's
    # NCHW .view order (c*HW + y*W + x) into the kernel flatten order (y*3W + k*W + x), with
    # the other head's rows scattered to zero.
    wp_fc = to_np(params["policy_fc"]["w"])      # (2*HW, HW)
    wv_fc1 = to_np(params["value_fc1"]["w"])     # (HW, VH)
    wfc = np.zeros((H * W3, HW + VH), np.float32)
    for y in range(H):
        for x in range(W):
            s = y * W + x
            for k in range(2):
                wfc[y * W3 + k * W + x, :HW] = wp_fc[k * HW + s, :]
            wfc[y * W3 + 2 * W + x, HW:] = wv_fc1[s, :]
    bfc = np.concatenate([to_np(params["policy_fc"]["b"]),
                          to_np(params["value_fc1"]["b"])]).reshape(1, HW + VH)

    wv2 = np.concatenate([to_np(params["value_fc2"]["w"]),
                          to_np(params["value_fc2"]["b"]).reshape(1, 1)], axis=0)  # (VH+1, 1)

    return {
        "wtrunk": jnp.asarray(wtrunk, jnp.bfloat16),
        "gb_trunk": jnp.asarray(gb_trunk, jnp.float32),
        "whead": jnp.asarray(whead, jnp.bfloat16),
        "gb_head": jnp.asarray(gb_head, jnp.float32),
        "wfc": jnp.asarray(wfc, jnp.bfloat16),
        "bfc": jnp.asarray(bfc, jnp.float32),
        "wv2": jnp.asarray(wv2, jnp.float32),
    }


# ---------------------------------------------------------------------------
# Forward wrapper (single gridless pallas_call)
# ---------------------------------------------------------------------------
@functools.partial(jax.jit, static_argnums=(2, 3, 4, 5))
def policy_value_forward(packed, x_nchw, board_w, board_h, hidden, num_blocks):
    N = x_nchw.shape[0]
    cin = x_nchw.shape[1]
    H, W, C = board_h, board_w, hidden
    HW = H * W
    VH = packed["wv2"].shape[0] - 1
    OUT_W = ((HW + 1 + 127) // 128) * 128
    assert (H & (H - 1)) == 0 and (W & (W - 1)) == 0 and (C & (C - 1)) == 0
    assert cin <= C

    # NCHW -> row layout (N*H, W*C); channels zero-padded to C (matching the zero-padded
    # init-conv weight rows).  Tiny XLA ops outside the kernel.
    x = jnp.transpose(x_nchw, (0, 2, 3, 1)).astype(jnp.float32)
    x = jnp.pad(x, ((0, 0), (0, 0), (0, 0), (0, C - cin)))
    x_row = x.reshape(N * H, W * C)

    kernel = functools.partial(_fused_forward_kernel,
                               N=N, H=H, W=W, C=C, num_blocks=num_blocks,
                               VH=VH, OUT_W=OUT_W)
    vspec = pl.BlockSpec(memory_space=pltpu.MemorySpace.VMEM)
    out = pl.pallas_call(
        kernel,
        out_shape=jax.ShapeDtypeStruct((N, OUT_W), jnp.float32),
        in_specs=[vspec] * 8,
        out_specs=vspec,
        scratch_shapes=[pltpu.VMEM((N, 3 * H * W), jnp.float32)],
    )(x_row, packed["wtrunk"], packed["gb_trunk"], packed["whead"],
      packed["gb_head"], packed["wfc"], packed["bfc"], packed["wv2"])

    return out[:, :HW], out[:, HW:HW + 1]


# ---------------------------------------------------------------------------
if __name__ == "__main__":
    board_w = board_h = 8
    in_channels = 4
    hidden_channels = 32
    num_blocks = 2
    batch = 2

    key = jax.random.PRNGKey(0)
    k_params, k_x = jax.random.split(key)
    params = init_params(k_params, board_w, board_h, in_channels,
                         hidden_channels, num_blocks)
    packed = pack_params(params, board_w, board_h, hidden_channels)
    x = jax.random.normal(k_x, (batch, in_channels, board_h, board_w), jnp.float32)

    log_p, v = policy_value_forward(packed, x, board_w, board_h,
                                    hidden_channels, num_blocks)
    jax.block_until_ready((log_p, v))

    assert log_p.shape == (batch, board_w * board_h), log_p.shape
    assert v.shape == (batch, 1), v.shape
    # log_softmax rows should sum to 1 in probability space
    assert jnp.allclose(jnp.sum(jnp.exp(log_p), axis=1), 1.0, atol=1e-4)
    assert jnp.all(jnp.abs(v) <= 1.0)

    print("KERNEL_OK")
</pallas_src>

<mosaic_0001>
module attributes {stable_mosaic.version = 11 : i64} {
  func.func @_fused_forward_kernel(%arg0: memref<16x256xf32, #tpu.memory_space<vmem>>, %arg1: memref<15x256x256xbf16, #tpu.memory_space<vmem>>, %arg2: memref<10x32xf32, #tpu.memory_space<vmem>>, %arg3: memref<256x24xbf16, #tpu.memory_space<vmem>>, %arg4: memref<2x3xf32, #tpu.memory_space<vmem>>, %arg5: memref<192x128xbf16, #tpu.memory_space<vmem>>, %arg6: memref<1x128xf32, #tpu.memory_space<vmem>>, %arg7: memref<65x1xf32, #tpu.memory_space<vmem>>, %arg8: memref<2x128xf32, #tpu.memory_space<vmem>>, %arg9: memref<2x192xf32, #tpu.memory_space<vmem>>) attributes {dimension_semantics = [], scalar_prefetch = 0 : i64, scratch_operands = 1 : i64, tpu.core_type = #tpu.core_type<tc>} {
    %cst = arith.constant 1.000000e+00 : f32
    %0 = vector.broadcast %cst : f32 to vector<1x16xf32>
    %1 = tpu.iota {dimensions = array<i32: 0>} : vector<16x16xi32>
    %2 = tpu.iota {dimensions = array<i32: 1>} : vector<16x16xi32>
    %c1_i32 = arith.constant 1 : i32
    %3 = vector.broadcast %c1_i32 : i32 to vector<16x16xi32>
    %4 = arith.subi %1, %3 : vector<16x16xi32>
    %5 = arith.cmpi eq, %2, %4 : vector<16x16xi32>
    %c7_i32 = arith.constant 7 : i32
    %6 = vector.broadcast %c7_i32 : i32 to vector<16x16xi32>
    %7 = arith.andi %1, %6 : vector<16x16xi32>
    %c0_i32 = arith.constant 0 : i32
    %8 = vector.broadcast %c0_i32 : i32 to vector<16x16xi32>
    %9 = arith.cmpi ne, %7, %8 : vector<16x16xi32>
    %10 = arith.andi %5, %9 : vector<16x16xi1>
    %cst_0 = arith.constant 1.000000e+00 : f32
    %cst_1 = arith.constant 0.000000e+00 : f32
    %11 = vector.broadcast %cst_0 : f32 to vector<16x16xf32>
    %12 = vector.broadcast %cst_1 : f32 to vector<16x16xf32>
    %13 = arith.select %10, %11, %12 : vector<16x16xi1>, vector<16x16xf32>
    %14 = arith.truncf %13 : vector<16x16xf32> to vector<16x16xbf16>
    %c1_i32_2 = arith.constant 1 : i32
    %15 = vector.broadcast %c1_i32_2 : i32 to vector<16x16xi32>
    %16 = arith.addi %1, %15 : vector<16x16xi32>
    %17 = arith.cmpi eq, %2, %16 : vector<16x16xi32>
    %c7_i32_3 = arith.constant 7 : i32
    %18 = vector.broadcast %c7_i32_3 : i32 to vector<16x16xi32>
    %19 = arith.andi %1, %18 : vector<16x16xi32>
    %c7_i32_4 = arith.constant 7 : i32
    %20 = vector.broadcast %c7_i32_4 : i32 to vector<16x16xi32>
    %21 = arith.cmpi ne, %19, %20 : vector<16x16xi32>
    %22 = arith.andi %17, %21 : vector<16x16xi1>
    %cst_5 = arith.constant 1.000000e+00 : f32
    %cst_6 = arith.constant 0.000000e+00 : f32
    %23 = vector.broadcast %cst_5 : f32 to vector<16x16xf32>
    %24 = vector.broadcast %cst_6 : f32 to vector<16x16xf32>
    %25 = arith.select %22, %23, %24 : vector<16x16xi1>, vector<16x16xf32>
    %26 = arith.truncf %25 : vector<16x16xf32> to vector<16x16xbf16>
    %27 = tpu.iota {dimensions = array<i32: 0>} : vector<256x32xi32>
    %28 = tpu.iota {dimensions = array<i32: 1>} : vector<256x32xi32>
    %c31_i32 = arith.constant 31 : i32
    %29 = vector.broadcast %c31_i32 : i32 to vector<256x32xi32>
    %30 = arith.andi %27, %29 : vector<256x32xi32>
    %31 = arith.cmpi eq, %30, %28 : vector<256x32xi32>
    %cst_7 = arith.constant 1.000000e+00 : f32
    %cst_8 = arith.constant 0.000000e+00 : f32
    %32 = vector.broadcast %cst_7 : f32 to vector<256x32xf32>
    %33 = vector.broadcast %cst_8 : f32 to vector<256x32xf32>
    %34 = arith.select %31, %32, %33 : vector<256x32xi1>, vector<256x32xf32>
    %35 = tpu.iota {dimensions = array<i32: 0>} : vector<32x256xi32>
    %36 = tpu.iota {dimensions = array<i32: 1>} : vector<32x256xi32>
    %c31_i32_9 = arith.constant 31 : i32
    %37 = vector.broadcast %c31_i32_9 : i32 to vector<32x256xi32>
    %38 = arith.andi %36, %37 : vector<32x256xi32>
    %39 = arith.cmpi eq, %38, %35 : vector<32x256xi32>
    %cst_10 = arith.constant 1.000000e+00 : f32
    %cst_11 = arith.constant 0.000000e+00 : f32
    %40 = vector.broadcast %cst_10 : f32 to vector<32x256xf32>
    %41 = vector.broadcast %cst_11 : f32 to vector<32x256xf32>
    %42 = arith.select %39, %40, %41 : vector<32x256xi1>, vector<32x256xf32>
    %43 = tpu.iota {dimensions = array<i32: 0>} : vector<24x3xi32>
    %44 = tpu.iota {dimensions = array<i32: 1>} : vector<24x3xi32>
    %c3_i32 = arith.constant 3 : i32
    %45 = vector.broadcast %c3_i32 : i32 to vector<24x3xi32>
    %46 = arith.shrsi %43, %45 : vector<24x3xi32>
    %47 = arith.cmpi eq, %46, %44 : vector<24x3xi32>
    %cst_12 = arith.constant 1.000000e+00 : f32
    %cst_13 = arith.constant 0.000000e+00 : f32
    %48 = vector.broadcast %cst_12 : f32 to vector<24x3xf32>
    %49 = vector.broadcast %cst_13 : f32 to vector<24x3xf32>
    %50 = arith.select %47, %48, %49 : vector<24x3xi1>, vector<24x3xf32>
    %51 = tpu.iota {dimensions = array<i32: 0>} : vector<3x24xi32>
    %52 = tpu.iota {dimensions = array<i32: 1>} : vector<3x24xi32>
    %c3_i32_14 = arith.constant 3 : i32
    %53 = vector.broadcast %c3_i32_14 : i32 to vector<3x24xi32>
    %54 = arith.shrsi %52, %53 : vector<3x24xi32>
    %55 = arith.cmpi eq, %54, %51 : vector<3x24xi32>
    %cst_15 = arith.constant 1.000000e+00 : f32
    %cst_16 = arith.constant 0.000000e+00 : f32
    %56 = vector.broadcast %cst_15 : f32 to vector<3x24xf32>
    %57 = vector.broadcast %cst_16 : f32 to vector<3x24xf32>
    %58 = arith.select %55, %56, %57 : vector<3x24xi1>, vector<3x24xf32>
    %c0 = arith.constant 0 : index
    %c0_17 = arith.constant 0 : index
    %59 = vector.load %arg0[%c0, %c0_17] : memref<16x256xf32, #tpu.memory_space<vmem>>, vector<16x256xf32>
    %60 = arith.truncf %59 : vector<16x256xf32> to vector<16x256xbf16>
    %cst_18 = arith.constant dense<0.000000e+00> : vector<16x256xf32>
    %61 = tpu.matmul %14, %60, %cst_18 {dimension_numbers = #tpu.dot_dimension_numbers<[1], [0], [0], [1], [0, 0, 1, 1], [], []>} : vector<16x16xbf16>, vector<16x256xbf16>, vector<16x256xf32> -> vector<16x256xf32>
    %62 = arith.truncf %61 : vector<16x256xf32> to vector<16x256xbf16>
    %cst_19 = arith.constant dense<0.000000e+00> : vector<16x256xf32>
    %63 = tpu.matmul %26, %60, %cst_19 {dimension_numbers = #tpu.dot_dimension_numbers<[1], [0], [0], [1], [0, 0, 1, 1], [], []>} : vector<16x16xbf16>, vector<16x256xbf16>, vector<16x256xf32> -> vector<16x256xf32>
    %64 = arith.truncf %63 : vector<16x256xf32> to vector<16x256xbf16>
    %c0_20 = arith.constant 0 : index
    %c0_21 = arith.constant 0 : index
    %c0_22 = arith.constant 0 : index
    %65 = vector.load %arg1[%c0_20, %c0_21, %c0_22] : memref<15x256x256xbf16, #tpu.memory_space<vmem>>, vector<1x256x256xbf16>
    %66 = vector.shape_cast %65 : vector<1x256x256xbf16> to vector<256x256xbf16>
    %cst_23 = arith.constant dense<0.000000e+00> : vector<16x256xf32>
    %67 = tpu.matmul %62, %66, %cst_23 {dimension_numbers = #tpu.dot_dimension_numbers<[1], [0], [0], [1], [0, 0, 1, 1], [], []>} : vector<16x256xbf16>, vector<256x256xbf16>, vector<16x256xf32> -> vector<16x256xf32>
    %c1 = arith.constant 1 : index
    %c0_24 = arith.constant 0 : index
    %c0_25 = arith.constant 0 : index
    %68 = vector.load %arg1[%c1, %c0_24, %c0_25] : memref<15x256x256xbf16, #tpu.memory_space<vmem>>, vector<1x256x256xbf16>
    %69 = vector.shape_cast %68 : vector<1x256x256xbf16> to vector<256x256xbf16>
    %cst_26 = arith.constant dense<0.000000e+00> : vector<16x256xf32>
    %70 = tpu.matmul %60, %69, %cst_26 {dimension_numbers = #tpu.dot_dimension_numbers<[1], [0], [0], [1], [0, 0, 1, 1], [], []>} : vector<16x256xbf16>, vector<256x256xbf16>, vector<16x256xf32> -> vector<16x256xf32>
    %71 = arith.addf %67, %70 : vector<16x256xf32>
    %c2 = arith.constant 2 : index
    %c0_27 = arith.constant 0 : index
    %c0_28 = arith.constant 0 : index
    %72 = vector.load %arg1[%c2, %c0_27, %c0_28] : memref<15x256x256xbf16, #tpu.memory_space<vmem>>, vector<1x256x256xbf16>
    %73 = vector.shape_cast %72 : vector<1x256x256xbf16> to vector<256x256xbf16>
    %cst_29 = arith.constant dense<0.000000e+00> : vector<16x256xf32>
    %74 = tpu.matmul %64, %73, %cst_29 {dimension_numbers = #tpu.dot_dimension_numbers<[1], [0], [0], [1], [0, 0, 1, 1], [], []>} : vector<16x256xbf16>, vector<256x256xbf16>, vector<16x256xf32> -> vector<16x256xf32>
    %75 = arith.addf %71, %74 : vector<16x256xf32>
    %c0_30 = arith.constant 0 : index
    %c0_31 = arith.constant 0 : index
    %76 = vector.load %arg2[%c0_30, %c0_31] : memref<10x32xf32, #tpu.memory_space<vmem>>, vector<1x32xf32>
    %c1_32 = arith.constant 1 : index
    %c0_33 = arith.constant 0 : index
    %77 = vector.load %arg2[%c1_32, %c0_33] : memref<10x32xf32, #tpu.memory_space<vmem>>, vector<1x32xf32>
    %78 = arith.mulf %75, %75 : vector<16x256xf32>
    %79 = tpu.concatenate %75, %78 in 1 : vector<16x256xf32>, vector<16x256xf32> -> vector<16x512xf32>
    %cst_34 = arith.constant dense<0.000000e+00> : vector<1x512xf32>
    %80 = tpu.matmul %0, %79, %cst_34 {dimension_numbers = #tpu.dot_dimension_numbers<[1], [0], [0], [1], [0, 0, 1, 1], [], []>} : vector<1x16xf32>, vector<16x512xf32>, vector<1x512xf32> -> vector<1x512xf32>
    %81 = vector.extract_strided_slice %80 {offsets = [0, 0], sizes = [1, 256], strides = [1, 1]} : vector<1x512xf32> to vector<1x256xf32>
    %cst_35 = arith.constant dense<0.000000e+00> : vector<1x32xf32>
    %82 = tpu.matmul %81, %34, %cst_35 {dimension_numbers = #tpu.dot_dimension_numbers<[1], [0], [0], [1], [0, 0, 1, 1], [], []>} : vector<1x256xf32>, vector<256x32xf32>, vector<1x32xf32> -> vector<1x32xf32>
    %83 = vector.extract_strided_slice %80 {offsets = [0, 256], sizes = [1, 256], strides = [1, 1]} : vector<1x512xf32> to vector<1x256xf32>
    %cst_36 = arith.constant dense<0.000000e+00> : vector<1x32xf32>
    %84 = tpu.matmul %83, %34, %cst_36 {dimension_numbers = #tpu.dot_dimension_numbers<[1], [0], [0], [1], [0, 0, 1, 1], [], []>} : vector<1x256xf32>, vector<256x32xf32>, vector<1x32xf32> -> vector<1x32xf32>
    %cst_37 = arith.constant 7.812500e-03 : f32
    %85 = vector.broadcast %cst_37 : f32 to vector<1x32xf32>
    %86 = arith.mulf %82, %85 : vector<1x32xf32>
    %cst_38 = arith.constant 7.812500e-03 : f32
    %87 = vector.broadcast %cst_38 : f32 to vector<1x32xf32>
    %88 = arith.mulf %84, %87 : vector<1x32xf32>
    %89 = arith.mulf %86, %86 : vector<1x32xf32>
    %90 = arith.subf %88, %89 : vector<1x32xf32>
    %cst_39 = arith.constant 0.000000e+00 : f32
    %91 = vector.broadcast %cst_39 : f32 to vector<1x32xf32>
    %92 = arith.maximumf %90, %91 : vector<1x32xf32>
    %cst_40 = arith.constant 9.99999974E-6 : f32
    %93 = vector.broadcast %cst_40 : f32 to vector<1x32xf32>
    %94 = arith.addf %92, %93 : vector<1x32xf32>
    %95 = math.rsqrt %94 : vector<1x32xf32>
    %96 = arith.mulf %76, %95 : vector<1x32xf32>
    %97 = arith.mulf %86, %96 : vector<1x32xf32>
    %98 = arith.subf %77, %97 : vector<1x32xf32>
    %cst_41 = arith.constant dense<0.000000e+00> : vector<1x256xf32>
    %99 = tpu.matmul %96, %42, %cst_41 {dimension_numbers = #tpu.dot_dimension_numbers<[1], [0], [0], [1], [0, 0, 1, 1], [], []>} : vector<1x32xf32>, vector<32x256xf32>, vector<1x256xf32> -> vector<1x256xf32>
    %100 = vector.broadcast %99 : vector<1x256xf32> to vector<16x256xf32>
    %101 = arith.mulf %75, %100 : vector<16x256xf32>
    %cst_42 = arith.constant dense<0.000000e+00> : vector<1x256xf32>
    %102 = tpu.matmul %98, %42, %cst_42 {dimension_numbers = #tpu.dot_dimension_numbers<[1], [0], [0], [1], [0, 0, 1, 1], [], []>} : vector<1x32xf32>, vector<32x256xf32>, vector<1x256xf32> -> vector<1x256xf32>
    %103 = vector.broadcast %102 : vector<1x256xf32> to vector<16x256xf32>
    %104 = arith.addf %101, %103 : vector<16x256xf32>
    %cst_43 = arith.constant 0.000000e+00 : f32
    %105 = vector.broadcast %cst_43 : f32 to vector<16x256xf32>
    %106 = arith.maximumf %104, %105 : vector<16x256xf32>
    %107 = arith.truncf %106 : vector<16x256xf32> to vector<16x256xbf16>
    %cst_44 = arith.constant dense<0.000000e+00> : vector<16x256xf32>
    %108 = tpu.matmul %14, %107, %cst_44 {dimension_numbers = #tpu.dot_dimension_numbers<[1], [0], [0], [1], [0, 0, 1, 1], [], []>} : vector<16x16xbf16>, vector<16x256xbf16>, vector<16x256xf32> -> vector<16x256xf32>
    %109 = arith.truncf %108 : vector<16x256xf32> to vector<16x256xbf16>
    %cst_45 = arith.constant dense<0.000000e+00> : vector<16x256xf32>
    %110 = tpu.matmul %26, %107, %cst_45 {dimension_numbers = #tpu.dot_dimension_numbers<[1], [0], [0], [1], [0, 0, 1, 1], [], []>} : vector<16x16xbf16>, vector<16x256xbf16>, vector<16x256xf32> -> vector<16x256xf32>
    %111 = arith.truncf %110 : vector<16x256xf32> to vector<16x256xbf16>
    %c3 = arith.constant 3 : index
    %c0_46 = arith.constant 0 : index
    %c0_47 = arith.constant 0 : index
    %112 = vector.load %arg1[%c3, %c0_46, %c0_47] : memref<15x256x256xbf16, #tpu.memory_space<vmem>>, vector<1x256x256xbf16>
    %113 = vector.shape_cast %112 : vector<1x256x256xbf16> to vector<256x256xbf16>
    %cst_48 = arith.constant dense<0.000000e+00> : vector<16x256xf32>
    %114 = tpu.matmul %109, %113, %cst_48 {dimension_numbers = #tpu.dot_dimension_numbers<[1], [0], [0], [1], [0, 0, 1, 1], [], []>} : vector<16x256xbf16>, vector<256x256xbf16>, vector<16x256xf32> -> vector<16x256xf32>
    %c4 = arith.constant 4 : index
    %c0_49 = arith.constant 0 : index
    %c0_50 = arith.constant 0 : index
    %115 = vector.load %arg1[%c4, %c0_49, %c0_50] : memref<15x256x256xbf16, #tpu.memory_space<vmem>>, vector<1x256x256xbf16>
    %116 = vector.shape_cast %115 : vector<1x256x256xbf16> to vector<256x256xbf16>
    %cst_51 = arith.constant dense<0.000000e+00> : vector<16x256xf32>
    %117 = tpu.matmul %107, %116, %cst_51 {dimension_numbers = #tpu.dot_dimension_numbers<[1], [0], [0], [1], [0, 0, 1, 1], [], []>} : vector<16x256xbf16>, vector<256x256xbf16>, vector<16x256xf32> -> vector<16x256xf32>
    %118 = arith.addf %114, %117 : vector<16x256xf32>
    %c5 = arith.constant 5 : index
    %c0_52 = arith.constant 0 : index
    %c0_53 = arith.constant 0 : index
    %119 = vector.load %arg1[%c5, %c0_52, %c0_53] : memref<15x256x256xbf16, #tpu.memory_space<vmem>>, vector<1x256x256xbf16>
    %120 = vector.shape_cast %119 : vector<1x256x256xbf16> to vector<256x256xbf16>
    %cst_54 = arith.constant dense<0.000000e+00> : vector<16x256xf32>
    %121 = tpu.matmul %111, %120, %cst_54 {dimension_numbers = #tpu.dot_dimension_numbers<[1], [0], [0], [1], [0, 0, 1, 1], [], []>} : vector<16x256xbf16>, vector<256x256xbf16>, vector<16x256xf32> -> vector<16x256xf32>
    %122 = arith.addf %118, %121 : vector<16x256xf32>
    %c2_55 = arith.constant 2 : index
    %c0_56 = arith.constant 0 : index
    %123 = vector.load %arg2[%c2_55, %c0_56] : memref<10x32xf32, #tpu.memory_space<vmem>>, vector<1x32xf32>
    %c3_57 = arith.constant 3 : index
    %c0_58 = arith.constant 0 : index
    %124 = vector.load %arg2[%c3_57, %c0_58] : memref<10x32xf32, #tpu.memory_space<vmem>>, vector<1x32xf32>
    %125 = arith.mulf %122, %122 : vector<16x256xf32>
    %126 = tpu.concatenate %122, %125 in 1 : vector<16x256xf32>, vector<16x256xf32> -> vector<16x512xf32>
    %cst_59 = arith.constant dense<0.000000e+00> : vector<1x512xf32>
    %127 = tpu.matmul %0, %126, %cst_59 {dimension_numbers = #tpu.dot_dimension_numbers<[1], [0], [0], [1], [0, 0, 1, 1], [], []>} : vector<1x16xf32>, vector<16x512xf32>, vector<1x512xf32> -> vector<1x512xf32>
    %128 = vector.extract_strided_slice %127 {offsets = [0, 0], sizes = [1, 256], strides = [1, 1]} : vector<1x512xf32> to vector<1x256xf32>
    %cst_60 = arith.constant dense<0.000000e+00> : vector<1x32xf32>
    %129 = tpu.matmul %128, %34, %cst_60 {dimension_numbers = #tpu.dot_dimension_numbers<[1], [0], [0], [1], [0, 0, 1, 1], [], []>} : vector<1x256xf32>, vector<256x32xf32>, vector<1x32xf32> -> vector<1x32xf32>
    %130 = vector.extract_strided_slice %127 {offsets = [0, 256], sizes = [1, 256], strides = [1, 1]} : vector<1x512xf32> to vector<1x256xf32>
    %cst_61 = arith.constant dense<0.000000e+00> : vector<1x32xf32>
    %131 = tpu.matmul %130, %34, %cst_61 {dimension_numbers = #tpu.dot_dimension_numbers<[1], [0], [0], [1], [0, 0, 1, 1], [], []>} : vector<1x256xf32>, vector<256x32xf32>, vector<1x32xf32> -> vector<1x32xf32>
    %cst_62 = arith.constant 7.812500e-03 : f32
    %132 = vector.broadcast %cst_62 : f32 to vector<1x32xf32>
    %133 = arith.mulf %129, %132 : vector<1x32xf32>
    %cst_63 = arith.constant 7.812500e-03 : f32
    %134 = vector.broadcast %cst_63 : f32 to vector<1x32xf32>
    %135 = arith.mulf %131, %134 : vector<1x32xf32>
    %136 = arith.mulf %133, %133 : vector<1x32xf32>
    %137 = arith.subf %135, %136 : vector<1x32xf32>
    %cst_64 = arith.constant 0.000000e+00 : f32
    %138 = vector.broadcast %cst_64 : f32 to vector<1x32xf32>
    %139 = arith.maximumf %137, %138 : vector<1x32xf32>
    %cst_65 = arith.constant 9.99999974E-6 : f32
    %140 = vector.broadcast %cst_65 : f32 to vector<1x32xf32>
    %141 = arith.addf %139, %140 : vector<1x32xf32>
    %142 = math.rsqrt %141 : vector<1x32xf32>
    %143 = arith.mulf %123, %142 : vector<1x32xf32>
    %144 = arith.mulf %133, %143 : vector<1x32xf32>
    %145 = arith.subf %124, %144 : vector<1x32xf32>
    %cst_66 = arith.constant dense<0.000000e+00> : vector<1x256xf32>
    %146 = tpu.matmul %143, %42, %cst_66 {dimension_numbers = #tpu.dot_dimension_numbers<[1], [0], [0], [1], [0, 0, 1, 1], [], []>} : vector<1x32xf32>, vector<32x256xf32>, vector<1x256xf32> -> vector<1x256xf32>
    %147 = vector.broadcast %146 : vector<1x256xf32> to vector<16x256xf32>
    %148 = arith.mulf %122, %147 : vector<16x256xf32>
    %cst_67 = arith.constant dense<0.000000e+00> : vector<1x256xf32>
    %149 = tpu.matmul %145, %42, %cst_67 {dimension_numbers = #tpu.dot_dimension_numbers<[1], [0], [0], [1], [0, 0, 1, 1], [], []>} : vector<1x32xf32>, vector<32x256xf32>, vector<1x256xf32> -> vector<1x256xf32>
    %150 = vector.broadcast %149 : vector<1x256xf32> to vector<16x256xf32>
    %151 = arith.addf %148, %150 : vector<16x256xf32>
    %cst_68 = arith.constant 0.000000e+00 : f32
    %152 = vector.broadcast %cst_68 : f32 to vector<16x256xf32>
    %153 = arith.maximumf %151, %152 : vector<16x256xf32>
    %154 = arith.truncf %153 : vector<16x256xf32> to vector<16x256xbf16>
    %cst_69 = arith.constant dense<0.000000e+00> : vector<16x256xf32>
    %155 = tpu.matmul %14, %154, %cst_69 {dimension_numbers = #tpu.dot_dimension_numbers<[1], [0], [0], [1], [0, 0, 1, 1], [], []>} : vector<16x16xbf16>, vector<16x256xbf16>, vector<16x256xf32> -> vector<16x256xf32>
    %156 = arith.truncf %155 : vector<16x256xf32> to vector<16x256xbf16>
    %cst_70 = arith.constant dense<0.000000e+00> : vector<16x256xf32>
    %157 = tpu.matmul %26, %154, %cst_70 {dimension_numbers = #tpu.dot_dimension_numbers<[1], [0], [0], [1], [0, 0, 1, 1], [], []>} : vector<16x16xbf16>, vector<16x256xbf16>, vector<16x256xf32> -> vector<16x256xf32>
    %158 = arith.truncf %157 : vector<16x256xf32> to vector<16x256xbf16>
    %c6 = arith.constant 6 : index
    %c0_71 = arith.constant 0 : index
    %c0_72 = arith.constant 0 : index
    %159 = vector.load %arg1[%c6, %c0_71, %c0_72] : memref<15x256x256xbf16, #tpu.memory_space<vmem>>, vector<1x256x256xbf16>
    %160 = vector.shape_cast %159 : vector<1x256x256xbf16> to vector<256x256xbf16>
    %cst_73 = arith.constant dense<0.000000e+00> : vector<16x256xf32>
    %161 = tpu.matmul %156, %160, %cst_73 {dimension_numbers = #tpu.dot_dimension_numbers<[1], [0], [0], [1], [0, 0, 1, 1], [], []>} : vector<16x256xbf16>, vector<256x256xbf16>, vector<16x256xf32> -> vector<16x256xf32>
    %c7 = arith.constant 7 : index
    %c0_74 = arith.constant 0 : index
    %c0_75 = arith.constant 0 : index
    %162 = vector.load %arg1[%c7, %c0_74, %c0_75] : memref<15x256x256xbf16, #tpu.memory_space<vmem>>, vector<1x256x256xbf16>
    %163 = vector.shape_cast %162 : vector<1x256x256xbf16> to vector<256x256xbf16>
    %cst_76 = arith.constant dense<0.000000e+00> : vector<16x256xf32>
    %164 = tpu.matmul %154, %163, %cst_76 {dimension_numbers = #tpu.dot_dimension_numbers<[1], [0], [0], [1], [0, 0, 1, 1], [], []>} : vector<16x256xbf16>, vector<256x256xbf16>, vector<16x256xf32> -> vector<16x256xf32>
    %165 = arith.addf %161, %164 : vector<16x256xf32>
    %c8 = arith.constant 8 : index
    %c0_77 = arith.constant 0 : index
    %c0_78 = arith.constant 0 : index
    %166 = vector.load %arg1[%c8, %c0_77, %c0_78] : memref<15x256x256xbf16, #tpu.memory_space<vmem>>, vector<1x256x256xbf16>
    %167 = vector.shape_cast %166 : vector<1x256x256xbf16> to vector<256x256xbf16>
    %cst_79 = arith.constant dense<0.000000e+00> : vector<16x256xf32>
    %168 = tpu.matmul %158, %167, %cst_79 {dimension_numbers = #tpu.dot_dimension_numbers<[1], [0], [0], [1], [0, 0, 1, 1], [], []>} : vector<16x256xbf16>, vector<256x256xbf16>, vector<16x256xf32> -> vector<16x256xf32>
    %169 = arith.addf %165, %168 : vector<16x256xf32>
    %c4_80 = arith.constant 4 : index
    %c0_81 = arith.constant 0 : index
    %170 = vector.load %arg2[%c4_80, %c0_81] : memref<10x32xf32, #tpu.memory_space<vmem>>, vector<1x32xf32>
    %c5_82 = arith.constant 5 : index
    %c0_83 = arith.constant 0 : index
    %171 = vector.load %arg2[%c5_82, %c0_83] : memref<10x32xf32, #tpu.memory_space<vmem>>, vector<1x32xf32>
    %172 = arith.mulf %169, %169 : vector<16x256xf32>
    %173 = tpu.concatenate %169, %172 in 1 : vector<16x256xf32>, vector<16x256xf32> -> vector<16x512xf32>
    %cst_84 = arith.constant dense<0.000000e+00> : vector<1x512xf32>
    %174 = tpu.matmul %0, %173, %cst_84 {dimension_numbers = #tpu.dot_dimension_numbers<[1], [0], [0], [1], [0, 0, 1, 1], [], []>} : vector<1x16xf32>, vector<16x512xf32>, vector<1x512xf32> -> vector<1x512xf32>
    %175 = vector.extract_strided_slice %174 {offsets = [0, 0], sizes = [1, 256], strides = [1, 1]} : vector<1x512xf32> to vector<1x256xf32>
    %cst_85 = arith.constant dense<0.000000e+00> : vector<1x32xf32>
    %176 = tpu.matmul %175, %34, %cst_85 {dimension_numbers = #tpu.dot_dimension_numbers<[1], [0], [0], [1], [0, 0, 1, 1], [], []>} : vector<1x256xf32>, vector<256x32xf32>, vector<1x32xf32> -> vector<1x32xf32>
    %177 = vector.extract_strided_slice %174 {offsets = [0, 256], sizes = [1, 256], strides = [1, 1]} : vector<1x512xf32> to vector<1x256xf32>
    %cst_86 = arith.constant dense<0.000000e+00> : vector<1x32xf32>
    %178 = tpu.matmul %177, %34, %cst_86 {dimension_numbers = #tpu.dot_dimension_numbers<[1], [0], [0], [1], [0, 0, 1, 1], [], []>} : vector<1x256xf32>, vector<256x32xf32>, vector<1x32xf32> -> vector<1x32xf32>
    %cst_87 = arith.constant 7.812500e-03 : f32
    %179 = vector.broadcast %cst_87 : f32 to vector<1x32xf32>
    %180 = arith.mulf %176, %179 : vector<1x32xf32>
    %cst_88 = arith.constant 7.812500e-03 : f32
    %181 = vector.broadcast %cst_88 : f32 to vector<1x32xf32>
    %182 = arith.mulf %178, %181 : vector<1x32xf32>
    %183 = arith.mulf %180, %180 : vector<1x32xf32>
    %184 = arith.subf %182, %183 : vector<1x32xf32>
    %cst_89 = arith.constant 0.000000e+00 : f32
    %185 = vector.broadcast %cst_89 : f32 to vector<1x32xf32>
    %186 = arith.maximumf %184, %185 : vector<1x32xf32>
    %cst_90 = arith.constant 9.99999974E-6 : f32
    %187 = vector.broadcast %cst_90 : f32 to vector<1x32xf32>
    %188 = arith.addf %186, %187 : vector<1x32xf32>
    %189 = math.rsqrt %188 : vector<1x32xf32>
    %190 = arith.mulf %170, %189 : vector<1x32xf32>
    %191 = arith.mulf %180, %190 : vector<1x32xf32>
    %192 = arith.subf %171, %191 : vector<1x32xf32>
    %cst_91 = arith.constant dense<0.000000e+00> : vector<1x256xf32>
    %193 = tpu.matmul %190, %42, %cst_91 {dimension_numbers = #tpu.dot_dimension_numbers<[1], [0], [0], [1], [0, 0, 1, 1], [], []>} : vector<1x32xf32>, vector<32x256xf32>, vector<1x256xf32> -> vector<1x256xf32>
    %194 = vector.broadcast %193 : vector<1x256xf32> to vector<16x256xf32>
    %195 = arith.mulf %169, %194 : vector<16x256xf32>
    %cst_92 = arith.constant dense<0.000000e+00> : vector<1x256xf32>
    %196 = tpu.matmul %192, %42, %cst_92 {dimension_numbers = #tpu.dot_dimension_numbers<[1], [0], [0], [1], [0, 0, 1, 1], [], []>} : vector<1x32xf32>, vector<32x256xf32>, vector<1x256xf32> -> vector<1x256xf32>
    %197 = vector.broadcast %196 : vector<1x256xf32> to vector<16x256xf32>
    %198 = arith.addf %195, %197 : vector<16x256xf32>
    %199 = arith.addf %198, %106 : vector<16x256xf32>
    %cst_93 = arith.constant 0.000000e+00 : f32
    %200 = vector.broadcast %cst_93 : f32 to vector<16x256xf32>
    %201 = arith.maximumf %199, %200 : vector<16x256xf32>
    %202 = arith.truncf %201 : vector<16x256xf32> to vector<16x256xbf16>
    %cst_94 = arith.constant dense<0.000000e+00> : vector<16x256xf32>
    %203 = tpu.matmul %14, %202, %cst_94 {dimension_numbers = #tpu.dot_dimension_numbers<[1], [0], [0], [1], [0, 0, 1, 1], [], []>} : vector<16x16xbf16>, vector<16x256xbf16>, vector<16x256xf32> -> vector<16x256xf32>
    %204 = arith.truncf %203 : vector<16x256xf32> to vector<16x256xbf16>
    %cst_95 = arith.constant dense<0.000000e+00> : vector<16x256xf32>
    %205 = tpu.matmul %26, %202, %cst_95 {dimension_numbers = #tpu.dot_dimension_numbers<[1], [0], [0], [1], [0, 0, 1, 1], [], []>} : vector<16x16xbf16>, vector<16x256xbf16>, vector<16x256xf32> -> vector<16x256xf32>
    %206 = arith.truncf %205 : vector<16x256xf32> to vector<16x256xbf16>
    %c9 = arith.constant 9 : index
    %c0_96 = arith.constant 0 : index
    %c0_97 = arith.constant 0 : index
    %207 = vector.load %arg1[%c9, %c0_96, %c0_97] : memref<15x256x256xbf16, #tpu.memory_space<vmem>>, vector<1x256x256xbf16>
    %208 = vector.shape_cast %207 : vector<1x256x256xbf16> to vector<256x256xbf16>
    %cst_98 = arith.constant dense<0.000000e+00> : vector<16x256xf32>
    %209 = tpu.matmul %204, %208, %cst_98 {dimension_numbers = #tpu.dot_dimension_numbers<[1], [0], [0], [1], [0, 0, 1, 1], [], []>} : vector<16x256xbf16>, vector<256x256xbf16>, vector<16x256xf32> -> vector<16x256xf32>
    %c10 = arith.constant 10 : index
    %c0_99 = arith.constant 0 : index
    %c0_100 = arith.constant 0 : index
    %210 = vector.load %arg1[%c10, %c0_99, %c0_100] : memref<15x256x256xbf16, #tpu.memory_space<vmem>>, vector<1x256x256xbf16>
    %211 = vector.shape_cast %210 : vector<1x256x256xbf16> to vector<256x256xbf16>
    %cst_101 = arith.constant dense<0.000000e+00> : vector<16x256xf32>
    %212 = tpu.matmul %202, %211, %cst_101 {dimension_numbers = #tpu.dot_dimension_numbers<[1], [0], [0], [1], [0, 0, 1, 1], [], []>} : vector<16x256xbf16>, vector<256x256xbf16>, vector<16x256xf32> -> vector<16x256xf32>
    %213 = arith.addf %209, %212 : vector<16x256xf32>
    %c11 = arith.constant 11 : index
    %c0_102 = arith.constant 0 : index
    %c0_103 = arith.constant 0 : index
    %214 = vector.load %arg1[%c11, %c0_102, %c0_103] : memref<15x256x256xbf16, #tpu.memory_space<vmem>>, vector<1x256x256xbf16>
    %215 = vector.shape_cast %214 : vector<1x256x256xbf16> to vector<256x256xbf16>
    %cst_104 = arith.constant dense<0.000000e+00> : vector<16x256xf32>
    %216 = tpu.matmul %206, %215, %cst_104 {dimension_numbers = #tpu.dot_dimension_numbers<[1], [0], [0], [1], [0, 0, 1, 1], [], []>} : vector<16x256xbf16>, vector<256x256xbf16>, vector<16x256xf32> -> vector<16x256xf32>
    %217 = arith.addf %213, %216 : vector<16x256xf32>
    %c6_105 = arith.constant 6 : index
    %c0_106 = arith.constant 0 : index
    %218 = vector.load %arg2[%c6_105, %c0_106] : memref<10x32xf32, #tpu.memory_space<vmem>>, vector<1x32xf32>
    %c7_107 = arith.constant 7 : index
    %c0_108 = arith.constant 0 : index
    %219 = vector.load %arg2[%c7_107, %c0_108] : memref<10x32xf32, #tpu.memory_space<vmem>>, vector<1x32xf32>
    %220 = arith.mulf %217, %217 : vector<16x256xf32>
    %221 = tpu.concatenate %217, %220 in 1 : vector<16x256xf32>, vector<16x256xf32> -> vector<16x512xf32>
    %cst_109 = arith.constant dense<0.000000e+00> : vector<1x512xf32>
    %222 = tpu.matmul %0, %221, %cst_109 {dimension_numbers = #tpu.dot_dimension_numbers<[1], [0], [0], [1], [0, 0, 1, 1], [], []>} : vector<1x16xf32>, vector<16x512xf32>, vector<1x512xf32> -> vector<1x512xf32>
    %223 = vector.extract_strided_slice %222 {offsets = [0, 0], sizes = [1, 256], strides = [1, 1]} : vector<1x512xf32> to vector<1x256xf32>
    %cst_110 = arith.constant dense<0.000000e+00> : vector<1x32xf32>
    %224 = tpu.matmul %223, %34, %cst_110 {dimension_numbers = #tpu.dot_dimension_numbers<[1], [0], [0], [1], [0, 0, 1, 1], [], []>} : vector<1x256xf32>, vector<256x32xf32>, vector<1x32xf32> -> vector<1x32xf32>
    %225 = vector.extract_strided_slice %222 {offsets = [0, 256], sizes = [1, 256], strides = [1, 1]} : vector<1x512xf32> to vector<1x256xf32>
    %cst_111 = arith.constant dense<0.000000e+00> : vector<1x32xf32>
    %226 = tpu.matmul %225, %34, %cst_111 {dimension_numbers = #tpu.dot_dimension_numbers<[1], [0], [0], [1], [0, 0, 1, 1], [], []>} : vector<1x256xf32>, vector<256x32xf32>, vector<1x32xf32> -> vector<1x32xf32>
    %cst_112 = arith.constant 7.812500e-03 : f32
    %227 = vector.broadcast %cst_112 : f32 to vector<1x32xf32>
    %228 = arith.mulf %224, %227 : vector<1x32xf32>
    %cst_113 = arith.constant 7.812500e-03 : f32
    %229 = vector.broadcast %cst_113 : f32 to vector<1x32xf32>
    %230 = arith.mulf %226, %229 : vector<1x32xf32>
    %231 = arith.mulf %228, %228 : vector<1x32xf32>
    %232 = arith.subf %230, %231 : vector<1x32xf32>
    %cst_114 = arith.constant 0.000000e+00 : f32
    %233 = vector.broadcast %cst_114 : f32 to vector<1x32xf32>
    %234 = arith.maximumf %232, %233 : vector<1x32xf32>
    %cst_115 = arith.constant 9.99999974E-6 : f32
    %235 = vector.broadcast %cst_115 : f32 to vector<1x32xf32>
    %236 = arith.addf %234, %235 : vector<1x32xf32>
    %237 = math.rsqrt %236 : vector<1x32xf32>
    %238 = arith.mulf %218, %237 : vector<1x32xf32>
    %239 = arith.mulf %228, %238 : vector<1x32xf32>
    %240 = arith.subf %219, %239 : vector<1x32xf32>
    %cst_116 = arith.constant dense<0.000000e+00> : vector<1x256xf32>
    %241 = tpu.matmul %238, %42, %cst_116 {dimension_numbers = #tpu.dot_dimension_numbers<[1], [0], [0], [1], [0, 0, 1, 1], [], []>} : vector<1x32xf32>, vector<32x256xf32>, vector<1x256xf32> -> vector<1x256xf32>
    %242 = vector.broadcast %241 : vector<1x256xf32> to vector<16x256xf32>
    %243 = arith.mulf %217, %242 : vector<16x256xf32>
    %cst_117 = arith.constant dense<0.000000e+00> : vector<1x256xf32>
    %244 = tpu.matmul %240, %42, %cst_117 {dimension_numbers = #tpu.dot_dimension_numbers<[1], [0], [0], [1], [0, 0, 1, 1], [], []>} : vector<1x32xf32>, vector<32x256xf32>, vector<1x256xf32> -> vector<1x256xf32>
    %245 = vector.broadcast %244 : vector<1x256xf32> to vector<16x256xf32>
    %246 = arith.addf %243, %245 : vector<16x256xf32>
    %cst_118 = arith.constant 0.000000e+00 : f32
    %247 = vector.broadcast %cst_118 : f32 to vector<16x256xf32>
    %248 = arith.maximumf %246, %247 : vector<16x256xf32>
    %249 = arith.truncf %248 : vector<16x256xf32> to vector<16x256xbf16>
    %cst_119 = arith.constant dense<0.000000e+00> : vector<16x256xf32>
    %250 = tpu.matmul %14, %249, %cst_119 {dimension_numbers = #tpu.dot_dimension_numbers<[1], [0], [0], [1], [0, 0, 1, 1], [], []>} : vector<16x16xbf16>, vector<16x256xbf16>, vector<16x256xf32> -> vector<16x256xf32>
    %251 = arith.truncf %250 : vector<16x256xf32> to vector<16x256xbf16>
    %cst_120 = arith.constant dense<0.000000e+00> : vector<16x256xf32>
    %252 = tpu.matmul %26, %249, %cst_120 {dimension_numbers = #tpu.dot_dimension_numbers<[1], [0], [0], [1], [0, 0, 1, 1], [], []>} : vector<16x16xbf16>, vector<16x256xbf16>, vector<16x256xf32> -> vector<16x256xf32>
    %253 = arith.truncf %252 : vector<16x256xf32> to vector<16x256xbf16>
    %c12 = arith.constant 12 : index
    %c0_121 = arith.constant 0 : index
    %c0_122 = arith.constant 0 : index
    %254 = vector.load %arg1[%c12, %c0_121, %c0_122] : memref<15x256x256xbf16, #tpu.memory_space<vmem>>, vector<1x256x256xbf16>
    %255 = vector.shape_cast %254 : vector<1x256x256xbf16> to vector<256x256xbf16>
    %cst_123 = arith.constant dense<0.000000e+00> : vector<16x256xf32>
    %256 = tpu.matmul %251, %255, %cst_123 {dimension_numbers = #tpu.dot_dimension_numbers<[1], [0], [0], [1], [0, 0, 1, 1], [], []>} : vector<16x256xbf16>, vector<256x256xbf16>, vector<16x256xf32> -> vector<16x256xf32>
    %c13 = arith.constant 13 : index
    %c0_124 = arith.constant 0 : index
    %c0_125 = arith.constant 0 : index
    %257 = vector.load %arg1[%c13, %c0_124, %c0_125] : memref<15x256x256xbf16, #tpu.memory_space<vmem>>, vector<1x256x256xbf16>
    %258 = vector.shape_cast %257 : vector<1x256x256xbf16> to vector<256x256xbf16>
    %cst_126 = arith.constant dense<0.000000e+00> : vector<16x256xf32>
    %259 = tpu.matmul %249, %258, %cst_126 {dimension_numbers = #tpu.dot_dimension_numbers<[1], [0], [0], [1], [0, 0, 1, 1], [], []>} : vector<16x256xbf16>, vector<256x256xbf16>, vector<16x256xf32> -> vector<16x256xf32>
    %260 = arith.addf %256, %259 : vector<16x256xf32>
    %c14 = arith.constant 14 : index
    %c0_127 = arith.constant 0 : index
    %c0_128 = arith.constant 0 : index
    %261 = vector.load %arg1[%c14, %c0_127, %c0_128] : memref<15x256x256xbf16, #tpu.memory_space<vmem>>, vector<1x256x256xbf16>
    %262 = vector.shape_cast %261 : vector<1x256x256xbf16> to vector<256x256xbf16>
    %cst_129 = arith.constant dense<0.000000e+00> : vector<16x256xf32>
    %263 = tpu.matmul %253, %262, %cst_129 {dimension_numbers = #tpu.dot_dimension_numbers<[1], [0], [0], [1], [0, 0, 1, 1], [], []>} : vector<16x256xbf16>, vector<256x256xbf16>, vector<16x256xf32> -> vector<16x256xf32>
    %264 = arith.addf %260, %263 : vector<16x256xf32>
    %c8_130 = arith.constant 8 : index
    %c0_131 = arith.constant 0 : index
    %265 = vector.load %arg2[%c8_130, %c0_131] : memref<10x32xf32, #tpu.memory_space<vmem>>, vector<1x32xf32>
    %c9_132 = arith.constant 9 : index
    %c0_133 = arith.constant 0 : index
    %266 = vector.load %arg2[%c9_132, %c0_133] : memref<10x32xf32, #tpu.memory_space<vmem>>, vector<1x32xf32>
    %267 = arith.mulf %264, %264 : vector<16x256xf32>
    %268 = tpu.concatenate %264, %267 in 1 : vector<16x256xf32>, vector<16x256xf32> -> vector<16x512xf32>
    %cst_134 = arith.constant dense<0.000000e+00> : vector<1x512xf32>
    %269 = tpu.matmul %0, %268, %cst_134 {dimension_numbers = #tpu.dot_dimension_numbers<[1], [0], [0], [1], [0, 0, 1, 1], [], []>} : vector<1x16xf32>, vector<16x512xf32>, vector<1x512xf32> -> vector<1x512xf32>
    %270 = vector.extract_strided_slice %269 {offsets = [0, 0], sizes = [1, 256], strides = [1, 1]} : vector<1x512xf32> to vector<1x256xf32>
    %cst_135 = arith.constant dense<0.000000e+00> : vector<1x32xf32>
    %271 = tpu.matmul %270, %34, %cst_135 {dimension_numbers = #tpu.dot_dimension_numbers<[1], [0], [0], [1], [0, 0, 1, 1], [], []>} : vector<1x256xf32>, vector<256x32xf32>, vector<1x32xf32> -> vector<1x32xf32>
    %272 = vector.extract_strided_slice %269 {offsets = [0, 256], sizes = [1, 256], strides = [1, 1]} : vector<1x512xf32> to vector<1x256xf32>
    %cst_136 = arith.constant dense<0.000000e+00> : vector<1x32xf32>
    %273 = tpu.matmul %272, %34, %cst_136 {dimension_numbers = #tpu.dot_dimension_numbers<[1], [0], [0], [1], [0, 0, 1, 1], [], []>} : vector<1x256xf32>, vector<256x32xf32>, vector<1x32xf32> -> vector<1x32xf32>
    %cst_137 = arith.constant 7.812500e-03 : f32
    %274 = vector.broadcast %cst_137 : f32 to vector<1x32xf32>
    %275 = arith.mulf %271, %274 : vector<1x32xf32>
    %cst_138 = arith.constant 7.812500e-03 : f32
    %276 = vector.broadcast %cst_138 : f32 to vector<1x32xf32>
    %277 = arith.mulf %273, %276 : vector<1x32xf32>
    %278 = arith.mulf %275, %275 : vector<1x32xf32>
    %279 = arith.subf %277, %278 : vector<1x32xf32>
    %cst_139 = arith.constant 0.000000e+00 : f32
    %280 = vector.broadcast %cst_139 : f32 to vector<1x32xf32>
    %281 = arith.maximumf %279, %280 : vector<1x32xf32>
    %cst_140 = arith.constant 9.99999974E-6 : f32
    %282 = vector.broadcast %cst_140 : f32 to vector<1x32xf32>
    %283 = arith.addf %281, %282 : vector<1x32xf32>
    %284 = math.rsqrt %283 : vector<1x32xf32>
    %285 = arith.mulf %265, %284 : vector<1x32xf32>
    %286 = arith.mulf %275, %285 : vector<1x32xf32>
    %287 = arith.subf %266, %286 : vector<1x32xf32>
    %cst_141 = arith.constant dense<0.000000e+00> : vector<1x256xf32>
    %288 = tpu.matmul %285, %42, %cst_141 {dimension_numbers = #tpu.dot_dimension_numbers<[1], [0], [0], [1], [0, 0, 1, 1], [], []>} : vector<1x32xf32>, vector<32x256xf32>, vector<1x256xf32> -> vector<1x256xf32>
    %289 = vector.broadcast %288 : vector<1x256xf32> to vector<16x256xf32>
    %290 = arith.mulf %264, %289 : vector<16x256xf32>
    %cst_142 = arith.constant dense<0.000000e+00> : vector<1x256xf32>
    %291 = tpu.matmul %287, %42, %cst_142 {dimension_numbers = #tpu.dot_dimension_numbers<[1], [0], [0], [1], [0, 0, 1, 1], [], []>} : vector<1x32xf32>, vector<32x256xf32>, vector<1x256xf32> -> vector<1x256xf32>
    %292 = vector.broadcast %291 : vector<1x256xf32> to vector<16x256xf32>
    %293 = arith.addf %290, %292 : vector<16x256xf32>
    %294 = arith.addf %293, %201 : vector<16x256xf32>
    %cst_143 = arith.constant 0.000000e+00 : f32
    %295 = vector.broadcast %cst_143 : f32 to vector<16x256xf32>
    %296 = arith.maximumf %294, %295 : vector<16x256xf32>
    %297 = arith.truncf %296 : vector<16x256xf32> to vector<16x256xbf16>
    %c0_144 = arith.constant 0 : index
    %c0_145 = arith.constant 0 : index
    %298 = vector.load %arg3[%c0_144, %c0_145] : memref<256x24xbf16, #tpu.memory_space<vmem>>, vector<256x24xbf16>
    %cst_146 = arith.constant dense<0.000000e+00> : vector<16x24xf32>
    %299 = tpu.matmul %297, %298, %cst_146 {dimension_numbers = #tpu.dot_dimension_numbers<[1], [0], [0], [1], [0, 0, 1, 1], [], []>} : vector<16x256xbf16>, vector<256x24xbf16>, vector<16x24xf32> -> vector<16x24xf32>
    %c0_147 = arith.constant 0 : index
    %c0_148 = arith.constant 0 : index
    %300 = vector.load %arg4[%c0_147, %c0_148] : memref<2x3xf32, #tpu.memory_space<vmem>>, vector<1x3xf32>
    %c1_149 = arith.constant 1 : index
    %c0_150 = arith.constant 0 : index
    %301 = vector.load %arg4[%c1_149, %c0_150] : memref<2x3xf32, #tpu.memory_space<vmem>>, vector<1x3xf32>
    %302 = arith.mulf %299, %299 : vector<16x24xf32>
    %303 = tpu.concatenate %299, %302 in 1 : vector<16x24xf32>, vector<16x24xf32> -> vector<16x48xf32>
    %cst_151 = arith.constant dense<0.000000e+00> : vector<1x48xf32>
    %304 = tpu.matmul %0, %303, %cst_151 {dimension_numbers = #tpu.dot_dimension_numbers<[1], [0], [0], [1], [0, 0, 1, 1], [], []>} : vector<1x16xf32>, vector<16x48xf32>, vector<1x48xf32> -> vector<1x48xf32>
    %305 = vector.extract_strided_slice %304 {offsets = [0, 0], sizes = [1, 24], strides = [1, 1]} : vector<1x48xf32> to vector<1x24xf32>
    %cst_152 = arith.constant dense<0.000000e+00> : vector<1x3xf32>
    %306 = tpu.matmul %305, %50, %cst_152 {dimension_numbers = #tpu.dot_dimension_numbers<[1], [0], [0], [1], [0, 0, 1, 1], [], []>} : vector<1x24xf32>, vector<24x3xf32>, vector<1x3xf32> -> vector<1x3xf32>
    %307 = vector.extract_strided_slice %304 {offsets = [0, 24], sizes = [1, 24], strides = [1, 1]} : vector<1x48xf32> to vector<1x24xf32>
    %cst_153 = arith.constant dense<0.000000e+00> : vector<1x3xf32>
    %308 = tpu.matmul %307, %50, %cst_153 {dimension_numbers = #tpu.dot_dimension_numbers<[1], [0], [0], [1], [0, 0, 1, 1], [], []>} : vector<1x24xf32>, vector<24x3xf32>, vector<1x3xf32> -> vector<1x3xf32>
    %cst_154 = arith.constant 7.812500e-03 : f32
    %309 = vector.broadcast %cst_154 : f32 to vector<1x3xf32>
    %310 = arith.mulf %306, %309 : vector<1x3xf32>
    %cst_155 = arith.constant 7.812500e-03 : f32
    %311 = vector.broadcast %cst_155 : f32 to vector<1x3xf32>
    %312 = arith.mulf %308, %311 : vector<1x3xf32>
    %313 = arith.mulf %310, %310 : vector<1x3xf32>
    %314 = arith.subf %312, %313 : vector<1x3xf32>
    %cst_156 = arith.constant 0.000000e+00 : f32
    %315 = vector.broadcast %cst_156 : f32 to vector<1x3xf32>
    %316 = arith.maximumf %314, %315 : vector<1x3xf32>
    %cst_157 = arith.constant 9.99999974E-6 : f32
    %317 = vector.broadcast %cst_157 : f32 to vector<1x3xf32>
    %318 = arith.addf %316, %317 : vector<1x3xf32>
    %319 = math.rsqrt %318 : vector<1x3xf32>
    %320 = arith.mulf %300, %319 : vector<1x3xf32>
    %321 = arith.mulf %310, %320 : vector<1x3xf32>
    %322 = arith.subf %301, %321 : vector<1x3xf32>
    %cst_158 = arith.constant dense<0.000000e+00> : vector<1x24xf32>
    %323 = tpu.matmul %320, %58, %cst_158 {dimension_numbers = #tpu.dot_dimension_numbers<[1], [0], [0], [1], [0, 0, 1, 1], [], []>} : vector<1x3xf32>, vector<3x24xf32>, vector<1x24xf32> -> vector<1x24xf32>
    %324 = vector.broadcast %323 : vector<1x24xf32> to vector<16x24xf32>
    %325 = arith.mulf %299, %324 : vector<16x24xf32>
    %cst_159 = arith.constant dense<0.000000e+00> : vector<1x24xf32>
    %326 = tpu.matmul %322, %58, %cst_159 {dimension_numbers = #tpu.dot_dimension_numbers<[1], [0], [0], [1], [0, 0, 1, 1], [], []>} : vector<1x3xf32>, vector<3x24xf32>, vector<1x24xf32> -> vector<1x24xf32>
    %327 = vector.broadcast %326 : vector<1x24xf32> to vector<16x24xf32>
    %328 = arith.addf %325, %327 : vector<16x24xf32>
    %cst_160 = arith.constant 0.000000e+00 : f32
    %329 = vector.broadcast %cst_160 : f32 to vector<16x24xf32>
    %330 = arith.maximumf %328, %329 : vector<16x24xf32>
    %331 = vector.extract_strided_slice %330 {offsets = [0, 0], sizes = [1, 24], strides = [1, 1]} : vector<16x24xf32> to vector<1x24xf32>
    %c0_161 = arith.constant 0 : index
    %c0_162 = arith.constant 0 : index
    %332 = vector.load %arg9[%c0_161, %c0_162] : memref<2x192xf32, #tpu.memory_space<vmem>>, vector<1x24xf32>
    tpu.vector_store %arg9[%c0_161, %c0_162], %331 {strides = array<i32>} : memref<2x192xf32, #tpu.memory_space<vmem>>, vector<1x24xf32>,
    %333 = vector.extract_strided_slice %330 {offsets = [1, 0], sizes = [1, 24], strides = [1, 1]} : vector<16x24xf32> to vector<1x24xf32>
    %c0_163 = arith.constant 0 : index
    %c24 = arith.constant 24 : index
    %334 = vector.load %arg9[%c0_163, %c24] : memref<2x192xf32, #tpu.memory_space<vmem>>, vector<1x24xf32>
    tpu.vector_store %arg9[%c0_163, %c24], %333 {strides = array<i32>} : memref<2x192xf32, #tpu.memory_space<vmem>>, vector<1x24xf32>,
    %335 = vector.extract_strided_slice %330 {offsets = [2, 0], sizes = [1, 24], strides = [1, 1]} : vector<16x24xf32> to vector<1x24xf32>
    %c0_164 = arith.constant 0 : index
    %c48 = arith.constant 48 : index
    %336 = vector.load %arg9[%c0_164, %c48] : memref<2x192xf32, #tpu.memory_space<vmem>>, vector<1x24xf32>
    tpu.vector_store %arg9[%c0_164, %c48], %335 {strides = array<i32>} : memref<2x192xf32, #tpu.memory_space<vmem>>, vector<1x24xf32>,
    %337 = vector.extract_strided_slice %330 {offsets = [3, 0], sizes = [1, 24], strides = [1, 1]} : vector<16x24xf32> to vector<1x24xf32>
    %c0_165 = arith.constant 0 : index
    %c72 = arith.constant 72 : index
    %338 = vector.load %arg9[%c0_165, %c72] : memref<2x192xf32, #tpu.memory_space<vmem>>, vector<1x24xf32>
    tpu.vector_store %arg9[%c0_165, %c72], %337 {strides = array<i32>} : memref<2x192xf32, #tpu.memory_space<vmem>>, vector<1x24xf32>,
    %339 = vector.extract_strided_slice %330 {offsets = [4, 0], sizes = [1, 24], strides = [1, 1]} : vector<16x24xf32> to vector<1x24xf32>
    %c0_166 = arith.constant 0 : index
    %c96 = arith.constant 96 : index
    %340 = vector.load %arg9[%c0_166, %c96] : memref<2x192xf32, #tpu.memory_space<vmem>>, vector<1x24xf32>
    tpu.vector_store %arg9[%c0_166, %c96], %339 {strides = array<i32>} : memref<2x192xf32, #tpu.memory_space<vmem>>, vector<1x24xf32>,
    %341 = vector.extract_strided_slice %330 {offsets = [5, 0], sizes = [1, 24], strides = [1, 1]} : vector<16x24xf32> to vector<1x24xf32>
    %c0_167 = arith.constant 0 : index
    %c120 = arith.constant 120 : index
    %342 = vector.load %arg9[%c0_167, %c120] : memref<2x192xf32, #tpu.memory_space<vmem>>, vector<1x24xf32>
    tpu.vector_store %arg9[%c0_167, %c120], %341 {strides = array<i32>} : memref<2x192xf32, #tpu.memory_space<vmem>>, vector<1x24xf32>,
    %343 = vector.extract_strided_slice %330 {offsets = [6, 0], sizes = [1, 24], strides = [1, 1]} : vector<16x24xf32> to vector<1x24xf32>
    %c0_168 = arith.constant 0 : index
    %c144 = arith.constant 144 : index
    %344 = vector.load %arg9[%c0_168, %c144] : memref<2x192xf32, #tpu.memory_space<vmem>>, vector<1x24xf32>
    tpu.vector_store %arg9[%c0_168, %c144], %343 {strides = array<i32>} : memref<2x192xf32, #tpu.memory_space<vmem>>, vector<1x24xf32>,
    %345 = vector.extract_strided_slice %330 {offsets = [7, 0], sizes = [1, 24], strides = [1, 1]} : vector<16x24xf32> to vector<1x24xf32>
    %c0_169 = arith.constant 0 : index
    %c168 = arith.constant 168 : index
    %346 = vector.load %arg9[%c0_169, %c168] : memref<2x192xf32, #tpu.memory_space<vmem>>, vector<1x24xf32>
    tpu.vector_store %arg9[%c0_169, %c168], %345 {strides = array<i32>} : memref<2x192xf32, #tpu.memory_space<vmem>>, vector<1x24xf32>,
    %347 = vector.extract_strided_slice %330 {offsets = [8, 0], sizes = [1, 24], strides = [1, 1]} : vector<16x24xf32> to vector<1x24xf32>
    %c1_170 = arith.constant 1 : index
    %c0_171 = arith.constant 0 : index
    %348 = vector.load %arg9[%c1_170, %c0_171] : memref<2x192xf32, #tpu.memory_space<vmem>>, vector<1x24xf32>
    tpu.vector_store %arg9[%c1_170, %c0_171], %347 {strides = array<i32>} : memref<2x192xf32, #tpu.memory_space<vmem>>, vector<1x24xf32>,
    %349 = vector.extract_strided_slice %330 {offsets = [9, 0], sizes = [1, 24], strides = [1, 1]} : vector<16x24xf32> to vector<1x24xf32>
    %c1_172 = arith.constant 1 : index
    %c24_173 = arith.constant 24 : index
    %350 = vector.load %arg9[%c1_172, %c24_173] : memref<2x192xf32, #tpu.memory_space<vmem>>, vector<1x24xf32>
    tpu.vector_store %arg9[%c1_172, %c24_173], %349 {strides = array<i32>} : memref<2x192xf32, #tpu.memory_space<vmem>>, vector<1x24xf32>,
    %351 = vector.extract_strided_slice %330 {offsets = [10, 0], sizes = [1, 24], strides = [1, 1]} : vector<16x24xf32> to vector<1x24xf32>
    %c1_174 = arith.constant 1 : index
    %c48_175 = arith.constant 48 : index
    %352 = vector.load %arg9[%c1_174, %c48_175] : memref<2x192xf32, #tpu.memory_space<vmem>>, vector<1x24xf32>
    tpu.vector_store %arg9[%c1_174, %c48_175], %351 {strides = array<i32>} : memref<2x192xf32, #tpu.memory_space<vmem>>, vector<1x24xf32>,
    %353 = vector.extract_strided_slice %330 {offsets = [11, 0], sizes = [1, 24], strides = [1, 1]} : vector<16x24xf32> to vector<1x24xf32>
    %c1_176 = arith.constant 1 : index
    %c72_177 = arith.constant 72 : index
    %354 = vector.load %arg9[%c1_176, %c72_177] : memref<2x192xf32, #tpu.memory_space<vmem>>, vector<1x24xf32>
    tpu.vector_store %arg9[%c1_176, %c72_177], %353 {strides = array<i32>} : memref<2x192xf32, #tpu.memory_space<vmem>>, vector<1x24xf32>,
    %355 = vector.extract_strided_slice %330 {offsets = [12, 0], sizes = [1, 24], strides = [1, 1]} : vector<16x24xf32> to vector<1x24xf32>
    %c1_178 = arith.constant 1 : index
    %c96_179 = arith.constant 96 : index
    %356 = vector.load %arg9[%c1_178, %c96_179] : memref<2x192xf32, #tpu.memory_space<vmem>>, vector<1x24xf32>
    tpu.vector_store %arg9[%c1_178, %c96_179], %355 {strides = array<i32>} : memref<2x192xf32, #tpu.memory_space<vmem>>, vector<1x24xf32>,
    %357 = vector.extract_strided_slice %330 {offsets = [13, 0], sizes = [1, 24], strides = [1, 1]} : vector<16x24xf32> to vector<1x24xf32>
    %c1_180 = arith.constant 1 : index
    %c120_181 = arith.constant 120 : index
    %358 = vector.load %arg9[%c1_180, %c120_181] : memref<2x192xf32, #tpu.memory_space<vmem>>, vector<1x24xf32>
    tpu.vector_store %arg9[%c1_180, %c120_181], %357 {strides = array<i32>} : memref<2x192xf32, #tpu.memory_space<vmem>>, vector<1x24xf32>,
    %359 = vector.extract_strided_slice %330 {offsets = [14, 0], sizes = [1, 24], strides = [1, 1]} : vector<16x24xf32> to vector<1x24xf32>
    %c1_182 = arith.constant 1 : index
    %c144_183 = arith.constant 144 : index
    %360 = vector.load %arg9[%c1_182, %c144_183] : memref<2x192xf32, #tpu.memory_space<vmem>>, vector<1x24xf32>
    tpu.vector_store %arg9[%c1_182, %c144_183], %359 {strides = array<i32>} : memref<2x192xf32, #tpu.memory_space<vmem>>, vector<1x24xf32>,
    %361 = vector.extract_strided_slice %330 {offsets = [15, 0], sizes = [1, 24], strides = [1, 1]} : vector<16x24xf32> to vector<1x24xf32>
    %c1_184 = arith.constant 1 : index
    %c168_185 = arith.constant 168 : index
    %362 = vector.load %arg9[%c1_184, %c168_185] : memref<2x192xf32, #tpu.memory_space<vmem>>, vector<1x24xf32>
    tpu.vector_store %arg9[%c1_184, %c168_185], %361 {strides = array<i32>} : memref<2x192xf32, #tpu.memory_space<vmem>>, vector<1x24xf32>,
    %c0_186 = arith.constant 0 : index
    %c0_187 = arith.constant 0 : index
    %363 = vector.load %arg9[%c0_186, %c0_187] : memref<2x192xf32, #tpu.memory_space<vmem>>, vector<2x192xf32>
    %364 = arith.truncf %363 : vector<2x192xf32> to vector<2x192xbf16>
    %c0_188 = arith.constant 0 : index
    %c0_189 = arith.constant 0 : index
    %365 = vector.load %arg5[%c0_188, %c0_189] : memref<192x128xbf16, #tpu.memory_space<vmem>>, vector<192x128xbf16>
    %cst_190 = arith.constant dense<0.000000e+00> : vector<2x128xf32>
    %366 = tpu.matmul %364, %365, %cst_190 {dimension_numbers = #tpu.dot_dimension_numbers<[1], [0], [0], [1], [0, 0, 1, 1], [], []>} : vector<2x192xbf16>, vector<192x128xbf16>, vector<2x128xf32> -> vector<2x128xf32>
    %c0_191 = arith.constant 0 : index
    %c0_192 = arith.constant 0 : index
    %367 = vector.load %arg6[%c0_191, %c0_192] : memref<1x128xf32, #tpu.memory_space<vmem>>, vector<1x128xf32>
    %368 = vector.broadcast %367 : vector<1x128xf32> to vector<2x128xf32>
    %369 = arith.addf %366, %368 : vector<2x128xf32>
    %370 = vector.extract_strided_slice %369 {offsets = [0, 0], sizes = [2, 64], strides = [1, 1]} : vector<2x128xf32> to vector<2x64xf32>
    %cst_193 = arith.constant dense<0xFF800000> : vector<2xf32>
    %371 = vector.multi_reduction <maximumf>, %370, %cst_193 [1] : vector<2x64xf32> to vector<2xf32>
    %372 = vector.shape_cast %371 : vector<2xf32> to vector<2x1xf32>
    %373 = vector.broadcast %372 : vector<2x1xf32> to vector<2x64xf32>
    %374 = arith.subf %370, %373 : vector<2x64xf32>
    %375 = math.exp %374 : vector<2x64xf32>
    %cst_194 = arith.constant dense<0.000000e+00> : vector<2xf32>
    %376 = vector.multi_reduction <add>, %375, %cst_194 [1] : vector<2x64xf32> to vector<2xf32>
    %377 = vector.shape_cast %376 : vector<2xf32> to vector<2x1xf32>
    %378 = math.log %377 : vector<2x1xf32>
    %379 = arith.addf %378, %372 : vector<2x1xf32>
    %380 = vector.broadcast %379 : vector<2x1xf32> to vector<2x64xf32>
    %381 = arith.subf %370, %380 : vector<2x64xf32>
    %382 = vector.extract_strided_slice %369 {offsets = [0, 64], sizes = [2, 64], strides = [1, 1]} : vector<2x128xf32> to vector<2x64xf32>
    %cst_195 = arith.constant 0.000000e+00 : f32
    %383 = vector.broadcast %cst_195 : f32 to vector<2x64xf32>
    %384 = arith.maximumf %382, %383 : vector<2x64xf32>
    %cst_196 = arith.constant 1.000000e+00 : f32
    %385 = vector.broadcast %cst_196 : f32 to vector<2x1xf32>
    %386 = tpu.concatenate %384, %385 in 1 : vector<2x64xf32>, vector<2x1xf32> -> vector<2x65xf32>
    %c0_197 = arith.constant 0 : index
    %c0_198 = arith.constant 0 : index
    %387 = vector.load %arg7[%c0_197, %c0_198] : memref<65x1xf32, #tpu.memory_space<vmem>>, vector<65x1xf32>
    %cst_199 = arith.constant dense<0.000000e+00> : vector<2x1xf32>
    %388 = tpu.matmul %386, %387, %cst_199 {dimension_numbers = #tpu.dot_dimension_numbers<[1], [0], [0], [1], [0, 0, 1, 1], [], []>} : vector<2x65xf32>, vector<65x1xf32>, vector<2x1xf32> -> vector<2x1xf32>
    %389 = math.tanh %388 : vector<2x1xf32>
    %cst_200 = arith.constant 0.000000e+00 : f32
    %390 = vector.broadcast %cst_200 : f32 to vector<2x63xf32>
    %391 = tpu.concatenate %381, %389, %390 in 1 : vector<2x64xf32>, vector<2x1xf32>, vector<2x63xf32> -> vector<2x128xf32>
    %c0_201 = arith.constant 0 : index
    %c0_202 = arith.constant 0 : index
    %392 = vector.load %arg8[%c0_201, %c0_202] : memref<2x128xf32, #tpu.memory_space<vmem>>, vector<2x128xf32>
    tpu.vector_store %arg8[%c0_201, %c0_202], %391 {strides = array<i32>} : memref<2x128xf32, #tpu.memory_space<vmem>>, vector<2x128xf32>,
    return
  }
}

</mosaic_0001>

<bundles_post_ra>
// kernel: policy_value_forward.1
= control target key start
LH: loop header
LB: loop body
LE: loop exit
PB: predicated region body
PF: predicated region fallthrough
CT: control target
= control target key end

     0   :  { %13 = vsyncpa [#allocation4], 0  ;;  %s12003_s0 = inlined_call_operand.vmem [shape: f32[16,256], index: 0, kind: input, shape index: {}]   ;;  %s12004_s1 = inlined_call_operand.hbm [shape: bf16[15,256,256], index: 1, kind: input, shape index: {}]   ;;  %s12005_s2 = inlined_call_operand.hbm [shape: f32[10,32], index: 2, kind: input, shape index: {}]   ;;  %s12006_s3 = inlined_call_operand.vmem [shape: bf16[256,24], index: 3, kind: input, shape index: {}]   ;;  %s12007_s4 = inlined_call_operand.hbm [shape: f32[2,3], index: 4, kind: input, shape index: {}]   ;;  %s12008_s5 = inlined_call_operand.hbm [shape: bf16[192,128], index: 5, kind: input, shape index: {}]   ;;  %s12009_s6 = inlined_call_operand.hbm [shape: f32[1,128], index: 6, kind: input, shape index: {}]   ;;  %s12010_s7 = inlined_call_operand.vmem [shape: f32[65,1], index: 7, kind: input, shape index: {}]   ;;  %s12011_s8 = inlined_call_operand.vmem [shape: f32[2,128], index: 8, kind: output, shape index: {}]  }
   0x1   :  { %14 = vsyncpa [#allocation6], 0 }
   0x2   :  { %15 = vsyncpa [#allocation9], 0  ;;  %s10509_s27 = smov [#allocation5]   ;;  %s10510_s29 = smov [#allocation8]  }
   0x3   :  { %s35_s28 = sshll.u32 %s10509_s27, 4  ;;  %s59_s30 = sshll.u32 %s10510_s29, 4  ;;  %s36_s28 = int_to_ptr.vmem [resolvable:$true] %s35_s28  ;;  %s10578_s30 = int_to_ptr.vmem [resolvable:$true] %s59_s30 }
   0x4   :  { %s10393_s11 = scalar_lea.hbm %s12005_s2, 256 }
   0x5   :  { %p10394_p0 = scmp.ne.s32.totalorder %s12005_s2, %s10393_s11  ;;  %p10397_p1 = scmp.lt.u32.totalorder %s10393_s11, %s12005_s2 }
   0x7   :  { %p10399_p2 = pnand %p10397_p1, %p10394_p0 }
   0x9   :  { %10402 = shalt.err (!%p10399_p2)
}
   0xa   :  { %s10403_s16 = scalar_lea.vmem %s36_s28, 256  ;;  %p10408_p4 = scmp.lt.s32.totalorder %s36_s28, %s36_s28 }
   0xb   :  { %p10404_p3 = scmp.ne.s32.totalorder %s36_s28, %s10403_s16  ;;  %p10409_p5 = scmp.lt.s32.totalorder %s10403_s16, %s10403_s16 }
   0xd   :  { %p10410_p6 = por %p10409_p5, %p10408_p4 }
   0xf   :  { %p10411_p7 = pnand %p10410_p6, %p10404_p3 }
  0x11   :  { %10414 = shalt.err (!%p10411_p7)
}
  0x12   :  { %s10511_s17 = smov 128   ;;  %s10512_s18 = smov 8  }
  0x13   :  { %41 = dma.hbm_to_vmem [thread:$0]  %s12005_s2, 256, %s36_s28, [#allocation6], %s10511_s17, %s10511_s17, %s10512_s18  }
  0x14   :  { %s10415_s23 = scalar_lea.hbm %s12008_s5, 1536 }
  0x15   :  { %p10416_p8 = scmp.ne.s32.totalorder %s12008_s5, %s10415_s23  ;;  %p10419_p9 = scmp.lt.u32.totalorder %s10415_s23, %s12008_s5 }
  0x17   :  { %p10421_p10 = pnand %p10419_p9, %p10416_p8 }
  0x19   :  { %10424 = shalt.err (!%p10421_p10)
}
  0x1a   :  { %s10425_s29 = scalar_lea.vmem %s10578_s30, 1536  ;;  %p10430_p12 = scmp.lt.s32.totalorder %s10578_s30, %s10578_s30 }
  0x1b   :  { %p10426_p11 = scmp.ne.s32.totalorder %s10578_s30, %s10425_s29  ;;  %p10431_p13 = scmp.lt.s32.totalorder %s10425_s29, %s10425_s29 }
  0x1d   :  { %p10432_p0 = por %p10431_p13, %p10430_p12 }
  0x1f   :  { %p10433_p1 = pnand %p10432_p0, %p10426_p11 }
  0x21   :  { %10436 = shalt.err (!%p10433_p1)
}
  0x22   :  { %s10513_s2 = smov 64   ;;  %s10514_s28 = smov 4  }
  0x23   :  { %65 = dma.hbm_to_vmem [thread:$0]  %s12008_s5, 1536, %s10578_s30, [#allocation9], %s10513_s2, %s10513_s2, %s10514_s28  }
  0x24   :  { %s10515_s11 = smov [#allocation3]   ;;  %s10516_s13 = smov [#allocation7]  }
  0x25   :  { %s23_s12 = sshll.u32 %s10515_s11, 4  ;;  %s50_s14 = sshll.u32 %s10516_s13, 4  ;;  %s24_s12 = int_to_ptr.vmem [resolvable:$true] %s23_s12  ;;  %s51_s14 = int_to_ptr.vmem [resolvable:$true] %s50_s14 }
  0x26   :  { %s10437_s19 = scalar_lea.hbm %s12004_s1, 61440 }
  0x27   :  { %p10438_p2 = scmp.ne.s32.totalorder %s12004_s1, %s10437_s19  ;;  %p10441_p3 = scmp.lt.u32.totalorder %s10437_s19, %s12004_s1 }
  0x29   :  { %p10443_p4 = pnand %p10441_p3, %p10438_p2 }
  0x2b   :  { %10446 = shalt.err (!%p10443_p4)
}
  0x2c   :  { %s10447_s5 = scalar_lea.vmem %s24_s12, 61440  ;;  %p10452_p6 = scmp.lt.s32.totalorder %s24_s12, %s24_s12 }
  0x2d   :  { %p10448_p5 = scmp.ne.s32.totalorder %s24_s12, %s10447_s5  ;;  %p10453_p7 = scmp.lt.s32.totalorder %s10447_s5, %s10447_s5 }
  0x2f   :  { %p10454_p8 = por %p10453_p7, %p10452_p6 }
  0x31   :  { %p10455_p9 = pnand %p10454_p8, %p10448_p5 }
  0x33   :  { %10458 = shalt.err (!%p10455_p9)
}
  0x34   :  { %29 = dma.hbm_to_vmem [thread:$0]  %s12004_s1, 61440, %s24_s12, [#allocation4], %s10511_s17, %s10511_s17, %s10512_s18  }
  0x35   :  { %s10459_s27 = scalar_lea.hbm %s12007_s4, 32 }
  0x36   :  { %p10460_p10 = scmp.ne.s32.totalorder %s12007_s4, %s10459_s27  ;;  %p10463_p11 = scmp.lt.u32.totalorder %s10459_s27, %s12007_s4 }
  0x38   :  { %p10465_p12 = pnand %p10463_p11, %p10460_p10 }
  0x3a   :  { %10468 = shalt.err (!%p10465_p12)
}
  0x3b   :  { %s10469_s11 = scalar_lea.vmem %s51_s14, 32  ;;  %p10474_p0 = scmp.lt.s32.totalorder %s51_s14, %s51_s14 }
  0x3c   :  { %p10470_p13 = scmp.ne.s32.totalorder %s51_s14, %s10469_s11  ;;  %p10475_p1 = scmp.lt.s32.totalorder %s10469_s11, %s10469_s11 }
  0x3e   :  { %p10476_p2 = por %p10475_p1, %p10474_p0 }
  0x40   :  { %p10477_p3 = pnand %p10476_p2, %p10470_p13 }
  0x42   :  { %10480 = shalt.err (!%p10477_p3)
}
  0x43   :  { %53 = dma.hbm_to_vmem [thread:$0]  %s12007_s4, 32, %s51_s14, [#allocation6]  }
  0x44   :  { %s10517_s18 = smov [#allocation10]   ;;  %s10481_s16 = scalar_lea.hbm %s12009_s6, 16 }
  0x45   :  { %s72_s12 = sshll.u32 %s10517_s18, 4  ;;  %p10482_p4 = scmp.ne.s32.totalorder %s12009_s6, %s10481_s16  ;;  %s73_s12 = int_to_ptr.vmem [resolvable:$true] %s72_s12 }
  0x46   :  { %p10485_p5 = scmp.lt.u32.totalorder %s10481_s16, %s12009_s6 }
  0x48   :  { %p10487_p6 = pnand %p10485_p5, %p10482_p4 }
  0x4a   :  { %10490 = shalt.err (!%p10487_p6)
}
  0x4b   :  { %s10491_s23 = scalar_lea.vmem %s73_s12, 16  ;;  %s10495_s4 = scalar_lea.vmem %s73_s12, 32 }
  0x4c   :  { %p10492_p7 = scmp.ne.s32.totalorder %s73_s12, %s10491_s23  ;;  %p10496_p8 = scmp.lt.s32.totalorder %s73_s12, %s73_s12 }
  0x4d   :  { %p10497_p9 = scmp.lt.s32.totalorder %s10495_s4, %s10491_s23 }
  0x4f   :  { %p10498_p10 = por %p10497_p9, %p10496_p8 }
  0x51   :  { %p10499_p11 = pnand %p10498_p10, %p10492_p7 }
  0x53   :  { %10502 = shalt.err (!%p10499_p11)
}
  0x54   :  { %75 = dma.hbm_to_vmem [thread:$0]  %s12009_s6, 16, %s73_s12, [#allocation9]  }
  0x55   :  { %10503 = dma.done.wait [#allocation4], 61440  }
  0x56   :  { %10504 = vsyncadd [#allocation4], 4294905856 }
  0x57   :  { %10505 = dma.done.wait [#allocation6], 288  }
  0x58   :  { %10506 = vsyncadd [#allocation6], 4294967008 }
  0x59   :  { %10507 = dma.done.wait [#allocation9], 1552  }
  0x5a   :  { %10508 = vsyncadd [#allocation9], 4294965744  ;;  %v94_v0 = vlaneseq  ;;  %v10518_v1 = vmov 0   ;;  %v281_v10 = vld [vmem:[%s12003_s0 + $0x8] sm:$0xff]  ;;  %v283_v11 = vld [vmem:[%s12003_s0 + $0x18] sm:$0xff]  ;;  %v10519_v19 = vmov 0.0  }
  0x5b   :  { %322 = vmatprep.mubr.bf16.mxu0 %v10518_v1  ;;  %370 = vmatprep.mubr.bf16.mxu1 %v10518_v1  ;;  %v280_v12 = vld [vmem:[%s12003_s0] sm:$0xff]  ;;  %v285_v15 = vpack.c.bf16 %v283_v11, %v281_v10  ;;  %v282_v16 = vld [vmem:[%s12003_s0 + $0x10] sm:$0xff]  ;;  %vm12012_vm11 = vcmask 130048   ;;  %s10525_s17 = smov 104   ;;  %s10527_s18 = smov 48  }
  0x5c   :  { %v10655_v2 = vshrl.u32 %v94_v0, 7  ;;  %v10657_v3 = vand.u32 127, %v94_v0  ;;  %v10691_v18 = vpack.c.bf16 %v282_v16, %v280_v12  ;;  %v9629_v22 = vld [vmem:[#allocation3 + $0x104] ss:$8 sps:$4 sm:$0xff]   ;;  %v9627_v25 = vld [vmem:[#allocation3 + $0x100] ss:$8 sps:$4 sm:$0xff]  }
  0x5d   :  { %290 = vmatprep.subr.bf16.mxu0 %v285_v15  ;;  %338 = vmatprep.subr.bf16.mxu1 %v285_v15  ;;  %v9632_v27 = vld [vmem:[#allocation3 + $0x114] ss:$8 sps:$4 sm:$0xff]   ;;  %v9630_v29 = vld [vmem:[#allocation3 + $0x110] ss:$8 sps:$4 sm:$0xff]   ;;  %v9635_v30 = vld [vmem:[#allocation3 + $0x124] ss:$8 sps:$4 sm:$0xff]  }
  0x5e   :  { %v10660_v4 = vadd.s32 8, %v10655_v2  ;;  %v7678_v5 = vadd.s32 4294967295, %v10655_v2  ;;  %v103_v6 = vand.u32 7, %v10655_v2  ;;  %v112_v7 = vadd.s32 1, %v10655_v2  ;;  %291 = vmatpush1.bf16.msra.mxu0 %v10691_v18  ;;  %339 = vmatpush1.bf16.msra.mxu1 %v10691_v18  ;;  %v9633_v31 = vld [vmem:[#allocation3 + $0x120] ss:$8 sps:$4 sm:$0xff]  }
  0x5f   :  { %608 = vmatprep.subr.bf16.mxu0 %v9629_v22  ;;  %v9638_v32 = vld [vmem:[#allocation3 + $0x134] ss:$8 sps:$4 sm:$0xff]   ;;  %v9636_v33 = vld [vmem:[#allocation3 + $0x130] ss:$8 sps:$4 sm:$0xff]   ;;  %v9641_v34 = vld [vmem:[#allocation3 + $0x144] ss:$8 sps:$4 sm:$0xff]  }
  0x60   :  { %v7679_v8 = vadd.s32 4294967295, %v10660_v4  ;;  %vm101_vm0 = vcmp.eq.s32.totalorder %v10657_v3, %v7678_v5  ;;  %v104_v9 = vand.u32 7, %v10660_v4  ;;  %vm105_vm1 = vcmp.ne.s32.totalorder %v103_v6, 0  ;;  %v9639_v35 = vld [vmem:[#allocation3 + $0x140] ss:$8 sps:$4 sm:$0xff]   ;;  %s10528_s12 = smov 96  }
  0x61   :  { %v113_v13 = vadd.s32 1, %v10660_v4  ;;  %vm114_vm2 = vcmp.eq.s32.totalorder %v10657_v3, %v112_v7  ;;  %vm10679_vm3 = vcmp.ne.s32.totalorder %v103_v6, 7  ;;  %vm107_vm6 = vmand %vm101_vm0, %vm105_vm1  ;;  %v9644_v36 = vld [vmem:[#allocation3 + $0x154] ss:$8 sps:$4 sm:$0xff]   ;;  %v9642_v37 = vld [vmem:[#allocation3 + $0x150] ss:$8 sps:$4 sm:$0xff]  }
  0x62   :  { %vm102_vm4 = vcmp.eq.s32.totalorder %v10657_v3, %v7679_v8  ;;  %vm106_vm5 = vcmp.ne.s32.totalorder %v104_v9, 0  ;;  %vm10687_vm7 = vcmp.ne.s32.totalorder %v104_v9, 7  ;;  %v109_v20 = vsel %vm107_vm6, 1.0, %v10519_v19  ;;  %vm118_vm10 = vmand %vm114_vm2, %vm10679_vm3  ;;  %v9647_v38 = vld [vmem:[#allocation3 + $0x164] ss:$8 sps:$4 sm:$0xff]   ;;  %s10529_s13 = smov 72  }
  0x63   :  { %vm108_vm8 = vmand %vm102_vm4, %vm106_vm5  ;;  %vm115_vm9 = vcmp.eq.s32.totalorder %v10657_v3, %v113_v13  ;;  %v120_v24 = vsel %vm118_vm10, 1.0, %v10519_v19  ;;  %v9645_v39 = vld [vmem:[#allocation3 + $0x160] ss:$8 sps:$4 sm:$0xff]   ;;  %v9650_v40 = vld [vmem:[#allocation3 + $0x174] ss:$8 sps:$4 sm:$0xff]   ;;  %s10530_s15 = smov 120  }
  0x64   :  { %v110_v21 = vsel %vm108_vm8, 1.0, %v10519_v19  ;;  %vm119_vm12 = vmand %vm115_vm9, %vm10687_vm7  ;;  %v9648_v41 = vld [vmem:[#allocation3 + $0x170] ss:$8 sps:$4 sm:$0xff]   ;;  %v9653_v42 = vld [vmem:[#allocation3 + $0x184] ss:$8 sps:$4 sm:$0xff]   ;;  %s10531_s16 = smov 16  }
  0x65   :  { %v10701_v23 = vpack.c.bf16 %v110_v21, %v109_v20  ;;  %v121_v26 = vsel %vm119_vm12, 1.0, %v10519_v19  ;;  %v9651_v43 = vld [vmem:[#allocation3 + $0x180] ss:$8 sps:$4 sm:$0xff]   ;;  %v9656_v44 = vld [vmem:[#allocation3 + $0x194] ss:$8 sps:$4 sm:$0xff]   ;;  %s10532_s19 = smov 40  }
  0x66   :  { %v10708_v28 = vpack.c.bf16 %v121_v26, %v120_v24  ;;  %v9654_v45 = vld [vmem:[#allocation3 + $0x190] ss:$8 sps:$4 sm:$0xff]   ;;  %v9659_v46 = vld [vmem:[#allocation3 + $0x1a4] ss:$8 sps:$4 sm:$0xff]   ;;  %v9657_v47 = vld [vmem:[#allocation3 + $0x1a0] ss:$8 sps:$4 sm:$0xff]  }
  0x67   :  { %7680 = vmatmul.mubr.msk.bf16.vlgmr.msra.gmra.mrb[0].mxu0 %vm12012_vm11, %v10701_v23  ;;  %v9662_v48 = vld [vmem:[#allocation3 + $0x1b4] ss:$8 sps:$4 sm:$0xff]   ;;  %v9660_v49 = vld [vmem:[#allocation3 + $0x1b0] ss:$8 sps:$4 sm:$0xff]   ;;  %v9665_v50 = vld [vmem:[#allocation3 + $0x1c4] ss:$8 sps:$4 sm:$0xff]  }
  0x68   :  { %7681 = vmatmul.mubr.msk.bf16.vlgmr.msra.gmra.mrb[0].mxu1 %vm12012_vm11, %v10708_v28  ;;  %609 = vmatpush1.bf16.msra.mxu0 %v9627_v25  ;;  %v9663_v51 = vld [vmem:[#allocation3 + $0x1c0] ss:$8 sps:$4 sm:$0xff]   ;;  %v9668_v52 = vld [vmem:[#allocation3 + $0x1d4] ss:$8 sps:$4 sm:$0xff]   ;;  %v9666_v53 = vld [vmem:[#allocation3 + $0x1d0] ss:$8 sps:$4 sm:$0xff]  }
  0x69   :  { %610 = vmatprep.subr.bf16.mxu0 %v9632_v27  ;;  %640 = vmatprep.mubr.bf16.mxu0 %v285_v15  ;;  %v9671_v54 = vld [vmem:[#allocation3 + $0x1e4] ss:$8 sps:$4 sm:$0xff]   ;;  %v9669_v55 = vld [vmem:[#allocation3 + $0x1e0] ss:$8 sps:$4 sm:$0xff]   ;;  %v9674_v56 = vld [vmem:[#allocation3 + $0x1f4] ss:$8 sps:$4 sm:$0xff]  }
  0x6a   :  { %1167 = vmatprep.mubr.f32.mxu1 %v10519_v19  ;;  %v9672_v57 = vld [vmem:[#allocation3 + $0x1f0] ss:$8 sps:$4 sm:$0xff]   ;;  %v9677_v58 = vld [vmem:[#allocation3 + $0x4] ss:$8 sps:$4 sm:$0xff]   ;;  %v9675_v59 = vld [vmem:[#allocation3] ss:$8 sps:$4 sm:$0xff]  }
  0x6b   :  { %v9680_v60 = vld [vmem:[#allocation3 + $0x14] ss:$8 sps:$4 sm:$0xff]   ;;  %v9678_v61 = vld [vmem:[#allocation3 + $0x10] ss:$8 sps:$4 sm:$0xff]   ;;  %v9683_v62 = vld [vmem:[#allocation3 + $0x24] ss:$8 sps:$4 sm:$0xff]  }
  0x6c   :  { %611 = vmatpush1.bf16.msra.mxu0 %v9630_v29  ;;  %v9681_v63 = vld [vmem:[#allocation3 + $0x20] ss:$8 sps:$4 sm:$0xff]   ;;  %v9686_v0 = vld [vmem:[#allocation3 + $0x34] ss:$8 sps:$4 sm:$0xff]   ;;  %v9684_v5 = vld [vmem:[#allocation3 + $0x30] ss:$8 sps:$4 sm:$0xff]  }
  0x6d   :  { %612 = vmatprep.subr.bf16.mxu0 %v9635_v30  ;;  %v9689_v6 = vld [vmem:[#allocation3 + $0x44] ss:$8 sps:$4 sm:$0xff]   ;;  %v9687_v7 = vld [vmem:[#allocation3 + $0x40] ss:$8 sps:$4 sm:$0xff]   ;;  %v9692_v8 = vld [vmem:[#allocation3 + $0x54] ss:$8 sps:$4 sm:$0xff]  }
  0x6e   :  { %v9690_v9 = vld [vmem:[#allocation3 + $0x50] ss:$8 sps:$4 sm:$0xff]   ;;  %v9695_v10 = vld [vmem:[#allocation3 + $0x64] ss:$8 sps:$4 sm:$0xff]   ;;  %v9693_v11 = vld [vmem:[#allocation3 + $0x60] ss:$8 sps:$4 sm:$0xff]  }
  0x6f   :  { %v9698_v12 = vld [vmem:[#allocation3 + $0x74] ss:$8 sps:$4 sm:$0xff]   ;;  %v9696_v13 = vld [vmem:[#allocation3 + $0x70] ss:$8 sps:$4 sm:$0xff]   ;;  %v9701_v14 = vld [vmem:[#allocation3 + $0x84] ss:$8 sps:$4 sm:$0xff]  }
  0x70   :  { %613 = vmatpush1.bf16.msra.mxu0 %v9633_v31  ;;  %v9699_v15 = vld [vmem:[#allocation3 + $0x80] ss:$8 sps:$4 sm:$0xff]   ;;  %v9704_v16 = vld [vmem:[#allocation3 + $0x94] ss:$8 sps:$4 sm:$0xff]   ;;  %v9702_v17 = vld [vmem:[#allocation3 + $0x90] ss:$8 sps:$4 sm:$0xff]  }
  0x71   :  { %614 = vmatprep.subr.bf16.mxu0 %v9638_v32  ;;  %v9705_v20 = vld [vmem:[#allocation3 + $0xa0] ss:$8 sps:$4 sm:$0xff]   ;;  %v9710_v21 = vld [vmem:[#allocation3 + $0xb4] ss:$8 sps:$4 sm:$0xff]   ;;  %v9708_v22 = vld [vmem:[#allocation3 + $0xb0] ss:$8 sps:$4 sm:$0xff]  }
  0x72   :  { %v9713_v24 = vld [vmem:[#allocation3 + $0xc4] ss:$8 sps:$4 sm:$0xff]   ;;  %v9711_v25 = vld [vmem:[#allocation3 + $0xc0] ss:$8 sps:$4 sm:$0xff]   ;;  %v9716_v26 = vld [vmem:[#allocation3 + $0xd4] ss:$8 sps:$4 sm:$0xff]  }
  0x73   :  { %v9714_v27 = vld [vmem:[#allocation3 + $0xd0] ss:$8 sps:$4 sm:$0xff]   ;;  %v9719_v29 = vld [vmem:[#allocation3 + $0xe4] ss:$8 sps:$4 sm:$0xff]   ;;  %v9717_v30 = vld [vmem:[#allocation3 + $0xe0] ss:$8 sps:$4 sm:$0xff]  }
  0x74   :  { %615 = vmatpush1.bf16.msra.mxu0 %v9636_v33  ;;  %v9722_v31 = vld [vmem:[#allocation3 + $0xf4] ss:$8 sps:$4 sm:$0xff]   ;;  %v9720_v32 = vld [vmem:[#allocation3 + $0xf0] ss:$8 sps:$4 sm:$0xff]   ;;  %v9725_v33 = vld [vmem:[#allocation3 + $0x204] ss:$8 sps:$4 sm:$0xff]  }
  0x75   :  { %616 = vmatprep.subr.bf16.mxu0 %v9641_v34 }
  0x78   :  { %617 = vmatpush1.bf16.msra.mxu0 %v9639_v35 }
  0x79   :  { %618 = vmatprep.subr.bf16.mxu0 %v9644_v36 }
  0x7c   :  { %619 = vmatpush1.bf16.msra.mxu0 %v9642_v37 }
  0x7d   :  { %620 = vmatprep.subr.bf16.mxu0 %v9647_v38 }
  0x80   :  { %621 = vmatpush1.bf16.msra.mxu0 %v9645_v39 }
  0x81   :  { %622 = vmatprep.subr.bf16.mxu0 %v9650_v40 }
  0x84   :  { %623 = vmatpush1.bf16.msra.mxu0 %v9648_v41 }
  0x85   :  { %624 = vmatprep.subr.bf16.mxu0 %v9653_v42 }
  0x88   :  { %625 = vmatpush1.bf16.msra.mxu0 %v9651_v43  ;;  %v9723_v43 = vld [vmem:[#allocation3 + $0x200] ss:$8 sps:$4 sm:$0xff]  }
  0x89   :  { %626 = vmatprep.subr.bf16.mxu0 %v9656_v44 }
  0x8c   :  { %627 = vmatpush1.bf16.msra.mxu0 %v9654_v45 }
  0x8d   :  { %628 = vmatprep.subr.bf16.mxu0 %v9659_v46  ;;  %v9728_v46 = vld [vmem:[#allocation3 + $0x214] ss:$8 sps:$4 sm:$0xff]  }
  0x90   :  { %629 = vmatpush1.bf16.msra.mxu0 %v9657_v47 }
  0x91   :  { %630 = vmatprep.subr.bf16.mxu0 %v9662_v48  ;;  %v9726_v48 = vld [vmem:[#allocation3 + $0x210] ss:$8 sps:$4 sm:$0xff]  }
  0x94   :  { %631 = vmatpush1.bf16.msra.mxu0 %v9660_v49  ;;  %v9731_v49 = vld [vmem:[#allocation3 + $0x224] ss:$8 sps:$4 sm:$0xff]  }
  0x95   :  { %632 = vmatprep.subr.bf16.mxu0 %v9665_v50  ;;  %v9729_v50 = vld [vmem:[#allocation3 + $0x220] ss:$8 sps:$4 sm:$0xff]  }
  0x98   :  { %633 = vmatpush1.bf16.msra.mxu0 %v9663_v51  ;;  %v9734_v51 = vld [vmem:[#allocation3 + $0x234] ss:$8 sps:$4 sm:$0xff]  }
  0x99   :  { %634 = vmatprep.subr.bf16.mxu0 %v9668_v52  ;;  %v9732_v52 = vld [vmem:[#allocation3 + $0x230] ss:$8 sps:$4 sm:$0xff]  }
  0x9c   :  { %635 = vmatpush1.bf16.msra.mxu0 %v9666_v53  ;;  %v9737_v53 = vld [vmem:[#allocation3 + $0x244] ss:$8 sps:$4 sm:$0xff]  }
  0x9d   :  { %636 = vmatprep.subr.bf16.mxu0 %v9671_v54  ;;  %v9735_v54 = vld [vmem:[#allocation3 + $0x240] ss:$8 sps:$4 sm:$0xff]  }
  0xa0   :  { %637 = vmatpush1.bf16.msra.mxu0 %v9669_v55  ;;  %v9740_v55 = vld [vmem:[#allocation3 + $0x254] ss:$8 sps:$4 sm:$0xff]  }
  0xa1   :  { %638 = vmatprep.subr.bf16.mxu0 %v9674_v56  ;;  %v9738_v56 = vld [vmem:[#allocation3 + $0x250] ss:$8 sps:$4 sm:$0xff]  }
  0xa4   :  { %639 = vmatpush1.bf16.msra.mxu0 %v9672_v57  ;;  %v9743_v57 = vld [vmem:[#allocation3 + $0x264] ss:$8 sps:$4 sm:$0xff]  }
  0xa5   :  { %811 = vmatprep.subr.bf16.mxu0 %v9677_v58  ;;  %v9741_v58 = vld [vmem:[#allocation3 + $0x260] ss:$8 sps:$4 sm:$0xff]  }
  0xa7   :  { %641 = vmatmul.mubr.bf16.vlgmr.msra.gmra.mrb[4].mxu0 %v10691_v18  ;;  %v9707_v18 = vld [vmem:[#allocation3 + $0xa4] ss:$8 sps:$4 sm:$0xff]  }
  0xa8   :  { %812 = vmatpush1.bf16.msra.mxu0 %v9675_v59  ;;  %v9746_v59 = vld [vmem:[#allocation3 + $0x274] ss:$8 sps:$4 sm:$0xff]  }
  0xa9   :  { %813 = vmatprep.subr.bf16.mxu0 %v9680_v60  ;;  %v9744_v60 = vld [vmem:[#allocation3 + $0x270] ss:$8 sps:$4 sm:$0xff]  }
  0xac   :  { %814 = vmatpush1.bf16.msra.mxu0 %v9678_v61  ;;  %v9749_v61 = vld [vmem:[#allocation3 + $0x284] ss:$8 sps:$4 sm:$0xff]  }
  0xad   :  { %815 = vmatprep.subr.bf16.mxu0 %v9683_v62  ;;  %v9747_v62 = vld [vmem:[#allocation3 + $0x280] ss:$8 sps:$4 sm:$0xff]  }
  0xb0   :  { %816 = vmatpush1.bf16.msra.mxu0 %v9681_v63  ;;  %v9752_v63 = vld [vmem:[#allocation3 + $0x294] ss:$8 sps:$4 sm:$0xff]  }
  0xb1   :  { %817 = vmatprep.subr.bf16.mxu0 %v9686_v0  ;;  %v9750_v0 = vld [vmem:[#allocation3 + $0x290] ss:$8 sps:$4 sm:$0xff]  }
  0xb4   :  { %818 = vmatpush1.bf16.msra.mxu0 %v9684_v5  ;;  %v9755_v5 = vld [vmem:[#allocation3 + $0x2a4] ss:$8 sps:$4 sm:$0xff]  }
  0xb5   :  { %819 = vmatprep.subr.bf16.mxu0 %v9689_v6  ;;  %v9753_v6 = vld [vmem:[#allocation3 + $0x2a0] ss:$8 sps:$4 sm:$0xff]  }
  0xb8   :  { %820 = vmatpush1.bf16.msra.mxu0 %v9687_v7  ;;  %v9758_v7 = vld [vmem:[#allocation3 + $0x2b4] ss:$8 sps:$4 sm:$0xff]  }
  0xb9   :  { %821 = vmatprep.subr.bf16.mxu0 %v9692_v8  ;;  %v9756_v8 = vld [vmem:[#allocation3 + $0x2b0] ss:$8 sps:$4 sm:$0xff]  }
  0xbc   :  { %822 = vmatpush1.bf16.msra.mxu0 %v9690_v9  ;;  %v9761_v9 = vld [vmem:[#allocation3 + $0x2c4] ss:$8 sps:$4 sm:$0xff]  }
  0xbd   :  { %823 = vmatprep.subr.bf16.mxu0 %v9695_v10  ;;  %v9759_v10 = vld [vmem:[#allocation3 + $0x2c0] ss:$8 sps:$4 sm:$0xff]  }
  0xc0   :  { %824 = vmatpush1.bf16.msra.mxu0 %v9693_v11  ;;  %v9764_v11 = vld [vmem:[#allocation3 + $0x2d4] ss:$8 sps:$4 sm:$0xff]  }
  0xc1   :  { %825 = vmatprep.subr.bf16.mxu0 %v9698_v12  ;;  %v9762_v12 = vld [vmem:[#allocation3 + $0x2d0] ss:$8 sps:$4 sm:$0xff]  }
  0xc4   :  { %826 = vmatpush1.bf16.msra.mxu0 %v9696_v13  ;;  %v9767_v13 = vld [vmem:[#allocation3 + $0x2e4] ss:$8 sps:$4 sm:$0xff]  }
  0xc5   :  { %827 = vmatprep.subr.bf16.mxu0 %v9701_v14  ;;  %v9765_v14 = vld [vmem:[#allocation3 + $0x2e0] ss:$8 sps:$4 sm:$0xff]  }
  0xc8   :  { %828 = vmatpush1.bf16.msra.mxu0 %v9699_v15  ;;  %v9770_v15 = vld [vmem:[#allocation3 + $0x2f4] ss:$8 sps:$4 sm:$0xff]  }
  0xc9   :  { %829 = vmatprep.subr.bf16.mxu0 %v9704_v16  ;;  %v9768_v16 = vld [vmem:[#allocation3 + $0x2f0] ss:$8 sps:$4 sm:$0xff]  }
  0xcc   :  { %830 = vmatpush1.bf16.msra.mxu0 %v9702_v17  ;;  %v137_v17 = vadd.s32 128, %v10655_v2 }
  0xcd   :  { %831 = vmatprep.subr.bf16.mxu0 %v9707_v18  ;;  %v138_v18 = vadd.s32 136, %v10655_v2 }
  0xd0   :  { %832 = vmatpush1.bf16.msra.mxu0 %v9705_v20 }
  0xd1   :  { %833 = vmatprep.subr.bf16.mxu0 %v9710_v21 }
  0xd4   :  { %834 = vmatpush1.bf16.msra.mxu0 %v9708_v22  ;;  %v153_v22 = vand.u32 31, %v10655_v2 }
  0xd5   :  { %835 = vmatprep.subr.bf16.mxu0 %v9713_v24  ;;  %v139_v24 = vadd.s32 144, %v10655_v2 }
  0xd6   :  { %vm185_vm0 = vcmp.eq.s32.totalorder %v153_v22, %v10657_v3  ;;  %v148_v22 = vadd.s32 216, %v10655_v2 }
  0xd8   :  { %836 = vmatpush1.bf16.msra.mxu0 %v9711_v25 }
  0xd9   :  { %837 = vmatprep.subr.bf16.mxu0 %v9716_v26  ;;  %v169_v26 = vand.u32 31, %v137_v17 }
  0xdb   :  { %vm201_vm13 = vcmp.eq.s32.totalorder %v169_v26, %v10657_v3 }
  0xdc   :  { %838 = vmatpush1.bf16.msra.mxu0 %v9714_v27  ;;  %v170_v27 = vand.u32 31, %v138_v18  ;;  %v147_v18 = vadd.s32 208, %v10655_v2 }
  0xdd   :  { %839 = vmatprep.subr.bf16.mxu0 %v9719_v29  ;;  %v154_v29 = vand.u32 31, %v10660_v4 }
  0xde   :  { %vm202_vm14 = vcmp.eq.s32.totalorder %v170_v27, %v10657_v3  ;;  %v12095_v27 = vmov 0 }
  0xdf   :  { %vm10766_vm15 = vmpackc.low %vm202_vm14, %vm201_vm13  ;;  %vm186_vm1 = vcmp.eq.s32.totalorder %v154_v29, %v10657_v3 }
  0xe0   :  { %840 = vmatpush1.bf16.msra.mxu0 %v9717_v30  ;;  %v140_v30 = vadd.s32 152, %v10655_v2  ;;  %vm10782_vm4 = vmpackc.low %vm186_vm1, %vm185_vm0 }
  0xe1   :  { %841 = vmatprep.subr.bf16.mxu0 %v9722_v31 }
  0xe4   :  { %842 = vmatpush1.bf16.msra.mxu0 %v9720_v32 }
  0xe5   :  { %1047 = vmatprep.subr.bf16.mxu0 %v9725_v33 }
 0x13a   :  { %v324_v34 = vpop.f32.mrb[0].mxu0 }
 0x13b   :  { %v326_v35 = vpop.f32.mrb[1].mxu0  ;;  %v10716_v36 = vpop.f32.mrb[0].mxu1 }
 0x13c   :  { %v328_v37 = vpop.f32.mrb[2].mxu0  ;;  %v374_v38 = vpop.f32.mrb[1].mxu1 }
 0x13d   :  { %v333_v39 = vpack.c.bf16 %v328_v37, %v324_v34  ;;  %v330_v40 = vpop.f32.mrb[3].mxu0  ;;  %v10718_v41 = vpop.f32.mrb[2].mxu1 }
 0x13e   :  { %v334_v42 = vpack.c.bf16 %v330_v40, %v326_v35  ;;  %v381_v44 = vpack.c.bf16 %v10718_v41, %v10716_v36  ;;  %v378_v45 = vpop.f32.mrb[3].mxu1  ;;  %v10747_v35 = vadd.s32 16, %v10655_v2  ;;  %v171_v41 = vand.u32 31, %v139_v24 }
 0x13f   :  { %v382_v47 = vpack.c.bf16 %v378_v45, %v374_v38  ;;  %v172_v45 = vand.u32 31, %v140_v30 }
 0x140   :  { %843 = vmatprep.mubr.bf16.mxu0 %v334_v42  ;;  %v141_v42 = vadd.s32 160, %v10655_v2  ;;  %vm203_vm2 = vcmp.eq.s32.totalorder %v171_v41, %v10657_v3  ;;  %v12099_v41 = vmov 0 }
 0x141   :  { %844 = vmatmul.mubr.bf16.vlgmr.msra.gmra.mrb[4].mxu0 %v333_v39  ;;  %v10756_v39 = vadd.s32 24, %v10655_v2  ;;  %vm204_vm3 = vcmp.eq.s32.totalorder %v172_v45, %v10657_v3  ;;  %v12103_v45 = vmov 0 }
 0x142   :  { %1048 = vmatpush1.bf16.msra.mxu0 %v9723_v43  ;;  %1079 = vmatprep.mubr.bf16.mxu0 %v382_v47  ;;  %v142_v43 = vadd.s32 168, %v10655_v2  ;;  %vm10796_vm7 = vmpackc.low %vm204_vm3, %vm203_vm2 }
 0x143   :  { %1049 = vmatprep.subr.bf16.mxu0 %v9728_v46  ;;  %v155_v46 = vand.u32 31, %v10747_v35  ;;  %v156_v47 = vand.u32 31, %v10756_v39 }
 0x145   :  { %vm10787_vm5 = vcmp.eq.s32.totalorder %v155_v46, %v10657_v3  ;;  %vm10792_vm6 = vcmp.eq.s32.totalorder %v156_v47, %v10657_v3  ;;  %v133_v46 = vadd.s32 96, %v10655_v2  ;;  %v134_v47 = vadd.s32 104, %v10655_v2 }
 0x146   :  { %1050 = vmatpush1.bf16.msra.mxu0 %v9726_v48  ;;  %v125_v48 = vadd.s32 32, %v10655_v2  ;;  %vm10826_vm10 = vmpackc.low %vm10792_vm6, %vm10787_vm5 }
 0x147   :  { %1051 = vmatprep.subr.bf16.mxu0 %v9731_v49  ;;  %v126_v49 = vadd.s32 40, %v10655_v2 }
 0x14a   :  { %1052 = vmatpush1.bf16.msra.mxu0 %v9729_v50 }
 0x14b   :  { %1053 = vmatprep.subr.bf16.mxu0 %v9734_v51  ;;  %v173_v51 = vand.u32 31, %v141_v42 }
 0x14d   :  { %vm10801_vm8 = vcmp.eq.s32.totalorder %v173_v51, %v10657_v3  ;;  %v151_v51 = vadd.s32 240, %v10655_v2 }
 0x14e   :  { %1054 = vmatpush1.bf16.msra.mxu0 %v9732_v52  ;;  %v174_v52 = vand.u32 31, %v142_v43 }
 0x14f   :  { %1055 = vmatprep.subr.bf16.mxu0 %v9737_v53  ;;  %v10520_v53 = vmov 1.0  }
 0x150   :  { %vm10806_vm9 = vcmp.eq.s32.totalorder %v174_v52, %v10657_v3  ;;  %v152_v52 = vadd.s32 248, %v10655_v2 }
 0x151   :  { %vm10842_vm14 = vmpackc.low %vm10806_vm9, %vm10801_vm8 }
 0x152   :  { %1056 = vmatpush1.bf16.msra.mxu0 %v9735_v54  ;;  %v143_v54 = vadd.s32 176, %v10655_v2 }
 0x153   :  { %1057 = vmatprep.subr.bf16.mxu0 %v9740_v55  ;;  %v144_v55 = vadd.s32 184, %v10655_v2 }
 0x156   :  { %1058 = vmatpush1.bf16.msra.mxu0 %v9738_v56  ;;  %v10521_v56 = vmov 1.0|1.0  }
 0x157   :  { %1059 = vmatprep.subr.bf16.mxu0 %v9743_v57 }
 0x15a   :  { %1060 = vmatpush1.bf16.msra.mxu0 %v9741_v58  ;;  %v165_v58 = vand.u32 31, %v133_v46 }
 0x15b   :  { %1061 = vmatprep.subr.bf16.mxu0 %v9746_v59  ;;  %v166_v59 = vand.u32 31, %v134_v47 }
 0x15e   :  { %1062 = vmatpush1.bf16.msra.mxu0 %v9744_v60  ;;  %v157_v60 = vand.u32 31, %v125_v48 }
 0x15f   :  { %1063 = vmatprep.subr.bf16.mxu0 %v9749_v61  ;;  %v158_v61 = vand.u32 31, %v126_v49 }
 0x160   :  { %vm10831_vm12 = vcmp.eq.s32.totalorder %v157_v60, %v10657_v3  ;;  %v135_v60 = vadd.s32 112, %v10655_v2 }
 0x161   :  { %vm190_vm13 = vcmp.eq.s32.totalorder %v158_v61, %v10657_v3  ;;  %v136_v61 = vadd.s32 120, %v10655_v2 }
 0x162   :  { %1064 = vmatpush1.bf16.msra.mxu0 %v9747_v62  ;;  %vm10858_vm2 = vmpackc.low %vm190_vm13, %vm10831_vm12 }
 0x163   :  { %1065 = vmatprep.subr.bf16.mxu0 %v9752_v63  ;;  %v12096_v27 = vsel %vm10858_vm2, 4294967295, %v12095_v27  ;;  %v183_v63 = vand.u32 31, %v151_v51 }
 0x166   :  { %1066 = vmatpush1.bf16.msra.mxu0 %v9750_v0  ;;  %v184_v0 = vand.u32 31, %v152_v52 }
 0x167   :  { %1067 = vmatprep.subr.bf16.mxu0 %v9755_v5  ;;  %v127_v5 = vadd.s32 48, %v10655_v2 }
 0x16a   :  { %1068 = vmatpush1.bf16.msra.mxu0 %v9753_v6  ;;  %v128_v6 = vadd.s32 56, %v10655_v2 }
 0x16b   :  { %1069 = vmatprep.subr.bf16.mxu0 %v9758_v7  ;;  %v175_v7 = vand.u32 31, %v143_v54  ;;  %v12105_v54 = vmov 0 }
 0x16c   :  { %v160_v17 = vand.u32 31, %v128_v6  ;;  %v12111_v6 = vmov 0 }
 0x16d   :  { %vm207_vm0 = vcmp.eq.s32.totalorder %v175_v7, %v10657_v3  ;;  %v167_v7 = vand.u32 31, %v135_v60 }
 0x16e   :  { %1070 = vmatpush1.bf16.msra.mxu0 %v9756_v8  ;;  %v176_v8 = vand.u32 31, %v144_v55  ;;  %vm192_vm6 = vcmp.eq.s32.totalorder %v160_v17, %v10657_v3  ;;  %v12107_v55 = vmov 0 }
 0x16f   :  { %1071 = vmatprep.subr.bf16.mxu0 %v9761_v9  ;;  %v145_v9 = vadd.s32 192, %v10655_v2 }
 0x170   :  { %vm208_vm1 = vcmp.eq.s32.totalorder %v176_v8, %v10657_v3  ;;  %v168_v8 = vand.u32 31, %v136_v61  ;;  %v11073_v61 = vsub.s32 0, %v10655_v2 }
 0x171   :  { %v177_v24 = vand.u32 31, %v145_v9  ;;  %vm10864_vm3 = vmpackc.low %vm208_vm1, %vm207_vm0  ;;  %v12113_v9 = vmov 0 }
 0x172   :  { %1072 = vmatpush1.bf16.msra.mxu0 %v9759_v10  ;;  %v146_v10 = vadd.s32 200, %v10655_v2 }
 0x173   :  { %1073 = vmatprep.subr.bf16.mxu0 %v9764_v11  ;;  %vm209_vm8 = vcmp.eq.s32.totalorder %v177_v24, %v10657_v3  ;;  %v250_v24 = vand.u32 31, %v10657_v3 }
 0x174   :  { %v178_v26 = vand.u32 31, %v146_v10  ;;  %v12115_v10 = vmov 0 }
 0x176   :  { %1074 = vmatpush1.bf16.msra.mxu0 %v9762_v12  ;;  %vm210_vm9 = vcmp.eq.s32.totalorder %v178_v26, %v10657_v3  ;;  %v12117_v12 = vmov 0  ;;  %v12124_v26 = vmov 0 }
 0x177   :  { %1075 = vmatprep.subr.bf16.mxu0 %v9767_v13  ;;  %v129_v13 = vadd.s32 64, %v10655_v2  ;;  %vm10890_vm1 = vmpackc.low %vm210_vm9, %vm209_vm8 }
 0x178   :  { %v12104_v45 = vsel %vm10890_vm1, 4294967295, %v12103_v45 }
 0x179   :  { %v161_v29 = vand.u32 31, %v129_v13 }
 0x17a   :  { %1076 = vmatpush1.bf16.msra.mxu0 %v9765_v14  ;;  %v130_v14 = vadd.s32 72, %v10655_v2 }
 0x17b   :  { %1077 = vmatprep.subr.bf16.mxu0 %v9770_v15  ;;  %vm10885_vm13 = vcmp.eq.s32.totalorder %v161_v29, %v10657_v3  ;;  %v12126_v29 = vmov 0 }
 0x17c   :  { %v162_v30 = vand.u32 31, %v130_v14 }
 0x17e   :  { %1078 = vmatpush1.bf16.msra.mxu0 %v9768_v16  ;;  %v159_v16 = vand.u32 31, %v127_v5  ;;  %vm194_vm0 = vcmp.eq.s32.totalorder %v162_v30, %v10657_v3  ;;  %v12109_v5 = vmov 0  ;;  %v12128_v30 = vmov 0 }
 0x180   :  { %vm191_vm5 = vcmp.eq.s32.totalorder %v159_v16, %v10657_v3 }
 0x181   :  { %1080 = vmatmul.mubr.bf16.vlgmr.msra.gmra.mrb[4].mxu0 %v381_v44  ;;  %vm10880_vm12 = vmpackc.low %vm192_vm6, %vm191_vm5 }
 0x182   :  { %2517 = vmatprep.mubr.f32.mxu0 %v10519_v19  ;;  %v12100_v41 = vsel %vm10880_vm12, 4294967295, %v12099_v41  ;;  %vm10908_vm6 = vmpackc.low %vm194_vm0, %vm10885_vm13 }
 0x183   :  { %v12106_v54 = vsel %vm10908_vm6, 4294967295, %v12105_v54 }
 0x254   :  { %v10728_v20 = vpop.f32.mrb[4].mxu0 }
 0x255   :  { %v10730_v21 = vpop.f32.mrb[5].mxu0  ;;  %v1096_v31 = vmul.f32 %v10728_v20, %v10728_v20 }
 0x256   :  { %v10734_v25 = vpop.f32.mrb[6].mxu0  ;;  %v1097_v36 = vmul.f32 %v10730_v21, %v10730_v21 }
 0x257   :  { %v1098_v32 = vmul.f32 %v10734_v25, %v10734_v25  ;;  %v9099_v33 = vpack.c.bf16 %v10734_v25, %v10728_v20  ;;  %v10744_v34 = vpop.f32.mrb[7].mxu0 }
 0x258   :  { %v1099_v37 = vmul.f32 %v10744_v34, %v10744_v34  ;;  %v9097_v38 = vpack.c.bf16 %v10744_v34, %v10730_v21 }
 0x259   :  { %v9103_v40 = vpack.c.bf16 %v1098_v32, %v1096_v31  ;;  %v131_v31 = vadd.s32 80, %v10655_v2  ;;  %v132_v32 = vadd.s32 88, %v10655_v2 }
 0x25a   :  { %9098 = vmatprep.subr.bf16.mxu1 %v9097_v38  ;;  %v9101_v44 = vpack.c.bf16 %v1099_v37, %v1097_v36  ;;  %v179_v36 = vand.u32 31, %v147_v18  ;;  %v180_v37 = vand.u32 31, %v148_v22  ;;  %v149_v38 = vadd.s32 224, %v10655_v2 }
 0x25b   :  { %9100 = vmatpush1.bf16.msra.mxu1 %v9099_v33  ;;  %v12097_v33 = vmov 0  ;;  %v163_v43 = vand.u32 31, %v131_v31  ;;  %v249_v18 = vadd.s32 128, %v10657_v3 }
 0x25c   :  { %9102 = vmatprep.subr.bf16.mxu1 %v9101_v44  ;;  %v12098_v33 = vsel %vm10864_vm3, 4294967295, %v12097_v33  ;;  %v164_v44 = vand.u32 31, %v132_v32  ;;  %vm212_vm5 = vcmp.eq.s32.totalorder %v180_v37, %v10657_v3  ;;  %v181_v48 = vand.u32 31, %v149_v38 }
 0x25d   :  { %vm195_vm8 = vcmp.eq.s32.totalorder %v163_v43, %v10657_v3  ;;  %v251_v22 = vand.u32 31, %v249_v18 }
 0x25e   :  { %7778 = vmatmul.mubr.msk.f32.vlgmr.msra.gmra.mrb[4].mxu1 %vm12012_vm11, %v10520_v53  ;;  %vm196_vm9 = vcmp.eq.s32.totalorder %v164_v44, %v10657_v3 }
 0x25f   :  { %9104 = vmatpush1.bf16.msra.mxu1 %v9103_v40  ;;  %1238 = vmatprep.mubr.f32.mxu1 %v10519_v19  ;;  %v150_v40 = vadd.s32 232, %v10655_v2 }
 0x260   :  { %9106 = vmatprep.subr.msk.bf16.mxu1 %vm10766_vm15, %v10521_v56 }
 0x261   :  { %v182_v49 = vand.u32 31, %v150_v40 }
 0x262   :  { %7779 = vmatmul.mubr.msk.f32.vlgmr.msra.gmra.mrb[6].mxu1 %vm12012_vm11, %v10520_v53  ;;  %vm211_vm11 = vcmp.eq.s32.totalorder %v179_v36, %v10657_v3 }
 0x263   :  { %9108 = vmatpush3.bf16.msk.msra.mxu1 %vm10782_vm4, %v10521_v56  ;;  %vm214_vm13 = vcmp.eq.s32.totalorder %v182_v49, %v10657_v3  ;;  %v1094_v49 = vld [vmem:[#allocation5] sm:$0x1] }
 0x264   :  { %9110 = vmatprep.subr.msk.bf16.mxu1 %vm10796_vm7, %v10521_v56 }
 0x267   :  { %9112 = vmatpush3.bf16.msk.msra.mxu1 %vm10826_vm10, %v10521_v56 }
 0x268   :  { %9114 = vmatprep.subr.msk.bf16.mxu1 %vm10842_vm14, %v10521_v56 }
 0x26b   :  { %9116 = vmatpush3.bf16.msk.msra.mxu1 %vm10858_vm2, %v10521_v56  ;;  %vm216_vm2 = vcmp.eq.s32.totalorder %v184_v0, %v10657_v3 }
 0x26c   :  { %9118 = vmatprep.subr.msk.bf16.mxu1 %vm10864_vm3, %v10521_v56  ;;  %vm10914_vm3 = vmpackc.low %vm212_vm5, %vm211_vm11  ;;  %vm197_vm5 = vcmp.eq.s32.totalorder %v165_v58, %v10657_v3 }
 0x26d   :  { %v12108_v55 = vsel %vm10914_vm3, 4294967295, %v12107_v55  ;;  %vm10928_vm11 = vmpackc.low %vm196_vm9, %vm195_vm8  ;;  %vm199_vm9 = vcmp.eq.s32.totalorder %v167_v7, %v10657_v3 }
 0x26e   :  { %v12110_v5 = vsel %vm10928_vm11, 4294967295, %v12109_v5 }
 0x26f   :  { %9120 = vmatpush3.bf16.msk.msra.mxu1 %vm10880_vm12, %v10521_v56  ;;  %vm198_vm12 = vcmp.eq.s32.totalorder %v166_v59, %v10657_v3  ;;  %v1095_v59 = vld [vmem:[#allocation5 + $0x1] sm:$0x1] }
 0x270   :  { %9122 = vmatprep.subr.msk.bf16.mxu1 %vm10890_vm1, %v10521_v56  ;;  %vm213_vm1 = vcmp.eq.s32.totalorder %v181_v48, %v10657_v3 }
 0x271   :  { %vm10932_vm0 = vmpackc.low %vm214_vm13, %vm213_vm1  ;;  %vm200_vm13 = vcmp.eq.s32.totalorder %v168_v8, %v10657_v3 }
 0x272   :  { %v12112_v6 = vsel %vm10932_vm0, 4294967295, %v12111_v6  ;;  %vm10946_vm1 = vmpackc.low %vm198_vm12, %vm197_vm5  ;;  %vm12121_vm5 = vnez %v12100_v41 }
 0x273   :  { %9124 = vmatpush3.bf16.msk.msra.mxu1 %vm10908_vm6, %v10521_v56  ;;  %vm215_vm6 = vcmp.eq.s32.totalorder %v183_v63, %v10657_v3  ;;  %v12114_v9 = vsel %vm10946_vm1, 4294967295, %v12113_v9  ;;  %vm10962_vm12 = vmpackc.low %vm200_vm13, %vm199_vm9  ;;  %vm12122_vm9 = vnez %v12104_v45  ;;  %vm12123_vm13 = vnez %v12106_v54 }
 0x274   :  { %9126 = vmatprep.subr.msk.bf16.mxu1 %vm10914_vm3, %v10521_v56  ;;  %vm10950_vm8 = vmpackc.low %vm216_vm2, %vm215_vm6  ;;  %v12118_v12 = vsel %vm10962_vm12, 4294967295, %v12117_v12  ;;  %vm12119_vm2 = vnez %v12096_v27  ;;  %vm12120_vm6 = vnez %v12098_v33 }
 0x275   :  { %v12116_v10 = vsel %vm10950_vm8, 4294967295, %v12115_v10 }
 0x277   :  { %9128 = vmatpush3.bf16.msk.msra.mxu1 %vm10928_vm11, %v10521_v56 }
 0x278   :  { %9130 = vmatprep.subr.msk.bf16.mxu1 %vm10932_vm0, %v10521_v56 }
 0x27b   :  { %9132 = vmatpush3.bf16.msk.msra.mxu1 %vm10946_vm1, %v10521_v56 }
 0x27c   :  { %9134 = vmatprep.subr.msk.bf16.mxu1 %vm10950_vm8, %v10521_v56 }
 0x27f   :  { %9136 = vmatpush3.bf16.msk.msra.mxu1 %vm10962_vm12, %v10521_v56 }
 0x280   :  { %9138 = vmatprep.subr.msk.bf16.mxu1 %vm10766_vm15, %v10521_v56 }
 0x331   :  { %v1169_v13 = vpop.f32.mrb[4].mxu1 }
 0x332   :  { %v1171_v14 = vpop.f32.mrb[5].mxu1 }
 0x333   :  { %1309 = vmatprep.mubr.f32.mxu1 %v1171_v14 }
 0x334   :  { %1310 = vmatmul.mubr.f32.vlgmr.msra.gmra.mrb[8].mxu1 %v1169_v13 }
 0x335   :  { %9140 = vmatpush3.bf16.msk.msra.mxu1 %vm10782_vm4, %v10521_v56  ;;  %v1240_v16 = vpop.f32.mrb[6].mxu1 }
 0x336   :  { %9142 = vmatprep.subr.msk.bf16.mxu1 %vm10796_vm7, %v10521_v56  ;;  %v1242_v17 = vpop.f32.mrb[7].mxu1 }
 0x337   :  { %1379 = vmatprep.mubr.f32.mxu1 %v1242_v17 }
 0x339   :  { %9144 = vmatpush3.bf16.msk.msra.mxu1 %vm10826_vm10, %v10521_v56 }
 0x33a   :  { %9146 = vmatprep.subr.msk.bf16.mxu1 %vm10842_vm14, %v10521_v56 }
 0x33d   :  { %9148 = vmatpush3.bf16.msk.msra.mxu1 %vm12119_vm2, %v10521_v56 }
 0x33e   :  { %9150 = vmatprep.subr.msk.bf16.mxu1 %vm12120_vm6, %v10521_v56 }
 0x341   :  { %9152 = vmatpush3.bf16.msk.msra.mxu1 %vm12121_vm5, %v10521_v56  ;;  %vm258_vm5 = vcmp.eq.s32.totalorder %v250_v24, %v10756_v39 }
 0x342   :  { %9154 = vmatprep.subr.msk.bf16.mxu1 %vm12122_vm9, %v10521_v56  ;;  %vm256_vm9 = vcmp.eq.s32.totalorder %v250_v24, %v10747_v35 }
 0x345   :  { %9156 = vmatpush3.bf16.msk.msra.mxu1 %vm12123_vm13, %v10521_v56  ;;  %vm259_vm13 = vcmp.eq.s32.totalorder %v251_v22, %v10756_v39  ;;  %v12130_v39 = vmov 0 }
 0x346   :  { %9158 = vmatprep.subr.msk.bf16.mxu1 %vm10914_vm3, %v10521_v56 }
 0x349   :  { %9160 = vmatpush3.bf16.msk.msra.mxu1 %vm10928_vm11, %v10521_v56  ;;  %vm252_vm11 = vcmp.eq.s32.totalorder %v250_v24, %v10655_v2 }
 0x34a   :  { %9162 = vmatprep.subr.msk.bf16.mxu1 %vm10932_vm0, %v10521_v56  ;;  %vm253_vm0 = vcmp.eq.s32.totalorder %v251_v22, %v10655_v2 }
 0x34d   :  { %9164 = vmatpush3.bf16.msk.msra.mxu1 %vm10946_vm1, %v10521_v56  ;;  %vm255_vm1 = vcmp.eq.s32.totalorder %v251_v22, %v10660_v4 }
 0x34e   :  { %9166 = vmatprep.subr.msk.bf16.mxu1 %vm10950_vm8, %v10521_v56  ;;  %vm254_vm8 = vcmp.eq.s32.totalorder %v250_v24, %v10660_v4  ;;  %vm11024_vm3 = vmpackc.low %vm255_vm1, %vm253_vm0 }
 0x34f   :  { %v12125_v26 = vsel %vm11024_vm3, 4294967295, %v12124_v26  ;;  %vm11035_vm6 = vmpackc.low %vm254_vm8, %vm252_vm11  ;;  %vm12035_vm11 = vcmask 261120   ;;  %vm12132_vm8 = vcmask 130048  }
 0x350   :  { %v12127_v29 = vsel %vm11035_vm6, 4294967295, %v12126_v29  ;;  %vm11049_vm1 = vmpackc.low %vm258_vm5, %vm256_vm9 }
 0x351   :  { %9168 = vmatpush3.bf16.msk.msra.mxu1 %vm10962_vm12, %v10521_v56  ;;  %vm257_vm12 = vcmp.eq.s32.totalorder %v251_v22, %v10747_v35  ;;  %v12131_v39 = vsel %vm11049_vm1, 4294967295, %v12130_v39  ;;  %vm12134_vm5 = vmmov %vm12132_vm8 }
 0x352   :  { %9170 = vmatprep.subr.msk.bf16.mxu1 %vm11024_vm3, %v10521_v56  ;;  %vm11042_vm0 = vmpackc.low %vm259_vm13, %vm257_vm12  ;;  %vm12136_vm13 = vnez %v12098_v33 }
 0x353   :  { %v12129_v30 = vsel %vm11042_vm0, 4294967295, %v12128_v30  ;;  %vm12133_vm12 = vmmov %vm12132_vm8 }
 0x354   :  { %1380 = vmatmul.mubr.f32.vlgmr.msra.gmra.mrb[10].mxu1 %v1240_v16  ;;  %vm12135_vm9 = vmmov %vm12134_vm5 }
 0x355   :  { %1463 = vmatprep.mubr.f32.mxu1 %v10519_v19  ;;  %9172 = vmatpush1.bf16.msk.msra.mxu1 %vm11035_vm6, %v10521_v56 }
 0x356   :  { %9174 = vmatprep.subr.msk.bf16.mxu1 %vm11042_vm0, %v10521_v56 }
 0x359   :  { %9176 = vmatpush1.bf16.msk.msra.mxu1 %vm11049_vm1, %v10521_v56 }
 0x35a   :  { %9178 = vmatprep.subr.msk.bf16.mxu1 %vm11024_vm3, %v10521_v56  ;;  %vm12145_vm3 = vnez %v12118_v12 }
 0x407   :  { %v8676_v31 = vpop.f32.mrb[8].mxu1 }
 0x408   :  { %v8677_v32 = vpop.f32.mrb[9].mxu1 }
 0x409   :  { %v8678_v36 = vadd.f32 %v8677_v32, %v8676_v31 }
 0x40b   :  { %v1385_v37 = vmul.f32 0.0078125, %v8678_v36 }
 0x40d   :  { %v1387_v43 = vmul.f32 %v1385_v37, %v1385_v37 }
 0x427   :  { %v8711_v38 = vpop.f32.mrb[10].mxu1 }
 0x428   :  { %v8712_v40 = vpop.f32.mrb[11].mxu1 }
 0x429   :  { %v8713_v42 = vadd.f32 %v8712_v40, %v8711_v38 }
 0x42b   :  { %v1386_v44 = vmul.f32 0.0078125, %v8713_v42 }
 0x42d   :  { %v1388_v46 = vsub.f32 %v1386_v44, %v1387_v43  ;;  %v9773_v43 = vld [vmem:[#allocation3 + $0x404] ss:$8 sps:$4 sm:$0xff]   ;;  %v9771_v44 = vld [vmem:[#allocation3 + $0x400] ss:$8 sps:$4 sm:$0xff]  }
 0x42f   :  { %v1389_v47 = vmax.f32 %v1388_v46, 0.0  ;;  %v9776_v46 = vld [vmem:[#allocation3 + $0x414] ss:$8 sps:$4 sm:$0xff]  }
 0x431   :  { %v1390_v48 = vadd.f32 1e-05, %v1389_v47  ;;  %v9774_v47 = vld [vmem:[#allocation3 + $0x410] ss:$8 sps:$4 sm:$0xff]  }
 0x433   :  { %10375 = vrsqrt.f32 %v1390_v48  ;;  %v9779_v48 = vld [vmem:[#allocation3 + $0x424] ss:$8 sps:$4 sm:$0xff]  }
 0x43d   :  { %v10376_v51 = vpop.eup %10375 }
 0x43e   :  { %v1392_v52 = vmul.f32 %v10376_v51, %v1094_v49  ;;  %v9777_v49 = vld [vmem:[#allocation3 + $0x420] ss:$8 sps:$4 sm:$0xff]   ;;  %v9782_v51 = vld [vmem:[#allocation3 + $0x434] ss:$8 sps:$4 sm:$0xff]  }
 0x440   :  { %7852 = vmatmul.mubr.msk.f32.vlgmr.msra.gmra.mrb[12].mxu1 %vm12035_vm11, %v1392_v52  ;;  %v1393_v58 = vmul.f32 %v1392_v52, %v1385_v37  ;;  %v9780_v52 = vld [vmem:[#allocation3 + $0x430] ss:$8 sps:$4 sm:$0xff]  }
 0x441   :  { %9180 = vmatpush1.bf16.msk.msra.mxu1 %vm11035_vm6, %v10521_v56  ;;  %1549 = vmatprep.mubr.f32.mxu1 %v10519_v19  ;;  %vm12144_vm6 = vnez %v12116_v10 }
 0x442   :  { %9182 = vmatprep.subr.msk.bf16.mxu1 %vm11042_vm0, %v10521_v56  ;;  %v1394_v60 = vsub.f32 %v1095_v59, %v1393_v58  ;;  %v9785_v58 = vld [vmem:[#allocation3 + $0x444] ss:$8 sps:$4 sm:$0xff]   ;;  %v9783_v59 = vld [vmem:[#allocation3 + $0x440] ss:$8 sps:$4 sm:$0xff]   ;;  %vm12143_vm0 = vnez %v12114_v9 }
 0x445   :  { %9184 = vmatpush1.bf16.msk.msra.mxu1 %vm11049_vm1, %v10521_v56  ;;  %vm12142_vm1 = vnez %v12112_v6 }
 0x448   :  { %7861 = vmatmul.mubr.msk.f32.vlgmr.msra.gmra.mrb[14].mxu1 %vm12035_vm11, %v1394_v60  ;;  %v9788_v60 = vld [vmem:[#allocation3 + $0x454] ss:$8 sps:$4 sm:$0xff]   ;;  %vm12141_vm11 = vnez %v12110_v5 }
 0x449   :  { %1606 = vmatprep.mubr.bf16.mxu1 %v10518_v1 }
 0x513   :  { %v1465_v63 = vpop.f32.mrb[12].mxu1 }
 0x514   :  { %v1473_v0 = vrot.slane %v1465_v63, %v11073_v61  ;;  %v1467_v7 = vpop.f32.mrb[13].mxu1  ;;  %v9786_v63 = vld [vmem:[#allocation3 + $0x450] ss:$8 sps:$4 sm:$0xff]  }
 0x515   :  { %v1477_v8 = vrot.slane %v1467_v7, %v11073_v61  ;;  %v9789_v7 = vld [vmem:[#allocation3 + $0x460] ss:$8 sps:$4 sm:$0xff]  }
 0x516   :  { %v1478_v13 = vmul.f32 %v1473_v0, %v10728_v20  ;;  %v1480_v14 = vmul.f32 %v1473_v0, %v10734_v25  ;;  %v9791_v0 = vld [vmem:[#allocation3 + $0x464] ss:$8 sps:$4 sm:$0xff]  }
 0x517   :  { %v1479_v16 = vmul.f32 %v1477_v8, %v10730_v21  ;;  %v1481_v17 = vmul.f32 %v1477_v8, %v10744_v34  ;;  %v9794_v8 = vld [vmem:[#allocation3 + $0x474] ss:$8 sps:$4 sm:$0xff]  }
 0x51b   :  { %v1551_v18 = vpop.f32.mrb[14].mxu1 }
 0x51c   :  { %v1559_v22 = vrot.slane %v1551_v18, %v11073_v61  ;;  %v1553_v24 = vpop.f32.mrb[15].mxu1  ;;  %v9798_v18 = vld [vmem:[#allocation3 + $0x490] ss:$8 sps:$4 sm:$0xff]  }
 0x51d   :  { %v1563_v31 = vrot.slane %v1553_v24, %v11073_v61  ;;  %v9801_v24 = vld [vmem:[#allocation3 + $0x4a0] ss:$8 sps:$4 sm:$0xff]  }
 0x51e   :  { %v11083_v32 = vadd.f32 %v1559_v22, %v1478_v13  ;;  %v11085_v36 = vadd.f32 %v1559_v22, %v1480_v14  ;;  %v9792_v13 = vld [vmem:[#allocation3 + $0x470] ss:$8 sps:$4 sm:$0xff]   ;;  %v9797_v14 = vld [vmem:[#allocation3 + $0x484] ss:$8 sps:$4 sm:$0xff]  }
 0x51f   :  { %v11087_v37 = vadd.f32 %v1563_v31, %v1479_v16  ;;  %v11089_v38 = vadd.f32 %v1563_v31, %v1481_v17  ;;  %v9795_v16 = vld [vmem:[#allocation3 + $0x480] ss:$8 sps:$4 sm:$0xff]   ;;  %v9800_v17 = vld [vmem:[#allocation3 + $0x494] ss:$8 sps:$4 sm:$0xff]   ;;  %v9803_v22 = vld [vmem:[#allocation3 + $0x4a4] ss:$8 sps:$4 sm:$0xff]  }
 0x520   :  { %v1568_v20 = vmax.f32 %v11083_v32, 0.0  ;;  %v1570_v21 = vmax.f32 %v11085_v36, 0.0  ;;  %v9806_v31 = vld [vmem:[#allocation3 + $0x4b4] ss:$8 sps:$4 sm:$0xff]  }
 0x521   :  { %v1569_v25 = vmax.f32 %v11087_v37, 0.0  ;;  %v1571_v34 = vmax.f32 %v11089_v38, 0.0  ;;  %v10061_v38 = vld [vmem:[#allocation3 + $0xa04] ss:$8 sps:$4 sm:$0xff]  }
 0x522   :  { %v11103_v42 = vpack.c.bf16 %v1570_v21, %v1568_v20 }
 0x523   :  { %v1573_v40 = vpack.c.bf16 %v1571_v34, %v1569_v25 }
 0x525   :  { %1574 = vmatprep.subr.bf16.mxu1 %v1573_v40 }
 0x526   :  { %1575 = vmatpush1.bf16.msra.mxu1 %v11103_v42 }
 0x527   :  { %1619 = vmatprep.subr.bf16.mxu1 %v1573_v40 }
 0x529   :  { %7862 = vmatmul.mubr.msk.bf16.vlgmr.msra.gmra.mrb[16].mxu1 %vm12132_vm8, %v10701_v23  ;;  %vm12137_vm8 = vnez %v12100_v41 }
 0x52a   :  { %1620 = vmatpush1.bf16.msra.mxu1 %v11103_v42  ;;  %1651 = vmatprep.mubr.bf16.mxu1 %v10518_v1 }
 0x52b   :  { %1890 = vmatprep.subr.bf16.mxu1 %v9773_v43  ;;  %v9809_v43 = vld [vmem:[#allocation3 + $0x4c4] ss:$8 sps:$4 sm:$0xff]  }
 0x531   :  { %7863 = vmatmul.mubr.msk.bf16.vlgmr.msra.gmra.mrb[20].mxu1 %vm12133_vm12, %v10708_v28  ;;  %vm12138_vm12 = vnez %v12104_v45 }
 0x532   :  { %1891 = vmatpush1.bf16.msra.mxu1 %v9771_v44  ;;  %1922 = vmatprep.mubr.bf16.mxu1 %v1573_v40  ;;  %v9804_v40 = vld [vmem:[#allocation3 + $0x4b0] ss:$8 sps:$4 sm:$0xff]   ;;  %v9807_v44 = vld [vmem:[#allocation3 + $0x4c0] ss:$8 sps:$4 sm:$0xff]  }
 0x533   :  { %1892 = vmatprep.subr.bf16.mxu1 %v9776_v46  ;;  %v9812_v46 = vld [vmem:[#allocation3 + $0x4d4] ss:$8 sps:$4 sm:$0xff]  }
 0x536   :  { %1893 = vmatpush1.bf16.msra.mxu1 %v9774_v47  ;;  %v9810_v47 = vld [vmem:[#allocation3 + $0x4d0] ss:$8 sps:$4 sm:$0xff]  }
 0x537   :  { %1894 = vmatprep.subr.bf16.mxu1 %v9779_v48  ;;  %v9815_v48 = vld [vmem:[#allocation3 + $0x4e4] ss:$8 sps:$4 sm:$0xff]  }
 0x53a   :  { %1895 = vmatpush1.bf16.msra.mxu1 %v9777_v49  ;;  %v9813_v49 = vld [vmem:[#allocation3 + $0x4e0] ss:$8 sps:$4 sm:$0xff]  }
 0x53b   :  { %1896 = vmatprep.subr.bf16.mxu1 %v9782_v51  ;;  %v9818_v51 = vld [vmem:[#allocation3 + $0x4f4] ss:$8 sps:$4 sm:$0xff]  }
 0x53e   :  { %1897 = vmatpush1.bf16.msra.mxu1 %v9780_v52  ;;  %v9816_v52 = vld [vmem:[#allocation3 + $0x4f0] ss:$8 sps:$4 sm:$0xff]  }
 0x53f   :  { %1898 = vmatprep.subr.bf16.mxu1 %v9785_v58  ;;  %v9821_v58 = vld [vmem:[#allocation3 + $0x304] ss:$8 sps:$4 sm:$0xff]  }
 0x542   :  { %1899 = vmatpush1.bf16.msra.mxu1 %v9783_v59  ;;  %v9819_v59 = vld [vmem:[#allocation3 + $0x300] ss:$8 sps:$4 sm:$0xff]  }
 0x543   :  { %1900 = vmatprep.subr.bf16.mxu1 %v9788_v60  ;;  %v9824_v60 = vld [vmem:[#allocation3 + $0x314] ss:$8 sps:$4 sm:$0xff]  }
 0x546   :  { %1901 = vmatpush1.bf16.msra.mxu1 %v9786_v63  ;;  %v9822_v63 = vld [vmem:[#allocation3 + $0x310] ss:$8 sps:$4 sm:$0xff]  }
 0x547   :  { %1902 = vmatprep.subr.bf16.mxu1 %v9791_v0  ;;  %v9827_v0 = vld [vmem:[#allocation3 + $0x324] ss:$8 sps:$4 sm:$0xff]  }
 0x54a   :  { %1903 = vmatpush1.bf16.msra.mxu1 %v9789_v7  ;;  %v9825_v7 = vld [vmem:[#allocation3 + $0x320] ss:$8 sps:$4 sm:$0xff]  }
 0x54b   :  { %1904 = vmatprep.subr.bf16.mxu1 %v9794_v8  ;;  %v9830_v8 = vld [vmem:[#allocation3 + $0x334] ss:$8 sps:$4 sm:$0xff]  }
 0x54e   :  { %1905 = vmatpush1.bf16.msra.mxu1 %v9792_v13  ;;  %v9828_v13 = vld [vmem:[#allocation3 + $0x330] ss:$8 sps:$4 sm:$0xff]  }
 0x54f   :  { %1906 = vmatprep.subr.bf16.mxu1 %v9797_v14  ;;  %v9833_v14 = vld [vmem:[#allocation3 + $0x344] ss:$8 sps:$4 sm:$0xff]  }
 0x552   :  { %1907 = vmatpush1.bf16.msra.mxu1 %v9795_v16  ;;  %v9831_v16 = vld [vmem:[#allocation3 + $0x340] ss:$8 sps:$4 sm:$0xff]  }
 0x553   :  { %1908 = vmatprep.subr.bf16.mxu1 %v9800_v17  ;;  %v9836_v17 = vld [vmem:[#allocation3 + $0x354] ss:$8 sps:$4 sm:$0xff]  }
 0x556   :  { %1909 = vmatpush1.bf16.msra.mxu1 %v9798_v18  ;;  %v9834_v18 = vld [vmem:[#allocation3 + $0x350] ss:$8 sps:$4 sm:$0xff]  }
 0x557   :  { %1910 = vmatprep.subr.bf16.mxu1 %v9803_v22  ;;  %v9837_v22 = vld [vmem:[#allocation3 + $0x360] ss:$8 sps:$4 sm:$0xff]  }
 0x55a   :  { %1911 = vmatpush1.bf16.msra.mxu1 %v9801_v24  ;;  %v9842_v24 = vld [vmem:[#allocation3 + $0x374] ss:$8 sps:$4 sm:$0xff]  }
 0x55b   :  { %1912 = vmatprep.subr.bf16.mxu1 %v9806_v31  ;;  %v9840_v31 = vld [vmem:[#allocation3 + $0x370] ss:$8 sps:$4 sm:$0xff]  }
 0x55e   :  { %1913 = vmatpush1.bf16.msra.mxu1 %v9804_v40  ;;  %v9845_v40 = vld [vmem:[#allocation3 + $0x384] ss:$8 sps:$4 sm:$0xff]  }
 0x55f   :  { %1914 = vmatprep.subr.bf16.mxu1 %v9809_v43  ;;  %v9843_v43 = vld [vmem:[#allocation3 + $0x380] ss:$8 sps:$4 sm:$0xff]  }
 0x562   :  { %1915 = vmatpush1.bf16.msra.mxu1 %v9807_v44  ;;  %v9848_v44 = vld [vmem:[#allocation3 + $0x394] ss:$8 sps:$4 sm:$0xff]  }
 0x563   :  { %1916 = vmatprep.subr.bf16.mxu1 %v9812_v46  ;;  %v9846_v46 = vld [vmem:[#allocation3 + $0x390] ss:$8 sps:$4 sm:$0xff]  }
 0x566   :  { %1917 = vmatpush1.bf16.msra.mxu1 %v9810_v47  ;;  %v9851_v47 = vld [vmem:[#allocation3 + $0x3a4] ss:$8 sps:$4 sm:$0xff]  }
 0x567   :  { %1918 = vmatprep.subr.bf16.mxu1 %v9815_v48  ;;  %v9849_v48 = vld [vmem:[#allocation3 + $0x3a0] ss:$8 sps:$4 sm:$0xff]  }
 0x56a   :  { %1919 = vmatpush1.bf16.msra.mxu1 %v9813_v49  ;;  %v9854_v49 = vld [vmem:[#allocation3 + $0x3b4] ss:$8 sps:$4 sm:$0xff]  }
 0x56b   :  { %1920 = vmatprep.subr.bf16.mxu1 %v9818_v51  ;;  %v9852_v51 = vld [vmem:[#allocation3 + $0x3b0] ss:$8 sps:$4 sm:$0xff]  }
 0x56e   :  { %1921 = vmatpush1.bf16.msra.mxu1 %v9816_v52  ;;  %v9857_v52 = vld [vmem:[#allocation3 + $0x3c4] ss:$8 sps:$4 sm:$0xff]  }
 0x56f   :  { %2093 = vmatprep.subr.bf16.mxu1 %v9821_v58  ;;  %v9855_v58 = vld [vmem:[#allocation3 + $0x3c0] ss:$8 sps:$4 sm:$0xff]  }
 0x571   :  { %1923 = vmatmul.mubr.bf16.vlgmr.msra.gmra.mrb[24].mxu1 %v11103_v42  ;;  %v9839_v42 = vld [vmem:[#allocation3 + $0x364] ss:$8 sps:$4 sm:$0xff]  }
 0x572   :  { %2094 = vmatpush1.bf16.msra.mxu1 %v9819_v59  ;;  %v9860_v59 = vld [vmem:[#allocation3 + $0x3d4] ss:$8 sps:$4 sm:$0xff]  }
 0x573   :  { %2095 = vmatprep.subr.bf16.mxu1 %v9824_v60  ;;  %v9858_v60 = vld [vmem:[#allocation3 + $0x3d0] ss:$8 sps:$4 sm:$0xff]  }
 0x576   :  { %2096 = vmatpush1.bf16.msra.mxu1 %v9822_v63  ;;  %v9863_v63 = vld [vmem:[#allocation3 + $0x3e4] ss:$8 sps:$4 sm:$0xff]  }
 0x577   :  { %2097 = vmatprep.subr.bf16.mxu1 %v9827_v0  ;;  %v9861_v0 = vld [vmem:[#allocation3 + $0x3e0] ss:$8 sps:$4 sm:$0xff]  }
 0x57a   :  { %2098 = vmatpush1.bf16.msra.mxu1 %v9825_v7  ;;  %v9866_v7 = vld [vmem:[#allocation3 + $0x3f4] ss:$8 sps:$4 sm:$0xff]  }
 0x57b   :  { %2099 = vmatprep.subr.bf16.mxu1 %v9830_v8  ;;  %v9864_v8 = vld [vmem:[#allocation3 + $0x3f0] ss:$8 sps:$4 sm:$0xff]  }
 0x57e   :  { %2100 = vmatpush1.bf16.msra.mxu1 %v9828_v13  ;;  %v9869_v13 = vld [vmem:[#allocation3 + $0x504] ss:$8 sps:$4 sm:$0xff]  }
 0x57f   :  { %2101 = vmatprep.subr.bf16.mxu1 %v9833_v14 }
 0x582   :  { %2102 = vmatpush1.bf16.msra.mxu1 %v9831_v16 }
 0x583   :  { %2103 = vmatprep.subr.bf16.mxu1 %v9836_v17 }
 0x586   :  { %2104 = vmatpush1.bf16.msra.mxu1 %v9834_v18 }
 0x587   :  { %2105 = vmatprep.subr.bf16.mxu1 %v9839_v42 }
 0x58a   :  { %2106 = vmatpush1.bf16.msra.mxu1 %v9837_v22 }
 0x58b   :  { %2107 = vmatprep.subr.bf16.mxu1 %v9842_v24  ;;  %v9867_v24 = vld [vmem:[#allocation3 + $0x500] ss:$8 sps:$4 sm:$0xff]  }
 0x58e   :  { %2108 = vmatpush1.bf16.msra.mxu1 %v9840_v31  ;;  %v9872_v31 = vld [vmem:[#allocation3 + $0x514] ss:$8 sps:$4 sm:$0xff]  }
 0x58f   :  { %2109 = vmatprep.subr.bf16.mxu1 %v9845_v40  ;;  %v9870_v40 = vld [vmem:[#allocation3 + $0x510] ss:$8 sps:$4 sm:$0xff]  }
 0x592   :  { %2110 = vmatpush1.bf16.msra.mxu1 %v9843_v43 }
 0x593   :  { %2111 = vmatprep.subr.bf16.mxu1 %v9848_v44  ;;  %v9875_v44 = vld [vmem:[#allocation3 + $0x524] ss:$8 sps:$4 sm:$0xff]  }
 0x596   :  { %2112 = vmatpush1.bf16.msra.mxu1 %v9846_v46 }
 0x597   :  { %2113 = vmatprep.subr.bf16.mxu1 %v9851_v47 }
 0x59a   :  { %2114 = vmatpush1.bf16.msra.mxu1 %v9849_v48 }
 0x59b   :  { %2115 = vmatprep.subr.bf16.mxu1 %v9854_v49 }
 0x59e   :  { %2116 = vmatpush1.bf16.msra.mxu1 %v9852_v51  ;;  %v9873_v51 = vld [vmem:[#allocation3 + $0x520] ss:$8 sps:$4 sm:$0xff]  }
 0x59f   :  { %2117 = vmatprep.subr.bf16.mxu1 %v9857_v52 }
 0x5a2   :  { %2118 = vmatpush1.bf16.msra.mxu1 %v9855_v58  ;;  %v9878_v58 = vld [vmem:[#allocation3 + $0x534] ss:$8 sps:$4 sm:$0xff]  }
 0x5a3   :  { %2119 = vmatprep.subr.bf16.mxu1 %v9860_v59  ;;  %v9876_v59 = vld [vmem:[#allocation3 + $0x530] ss:$8 sps:$4 sm:$0xff]  }
 0x5a6   :  { %2120 = vmatpush1.bf16.msra.mxu1 %v9858_v60  ;;  %v9881_v60 = vld [vmem:[#allocation3 + $0x544] ss:$8 sps:$4 sm:$0xff]  }
 0x5a7   :  { %2121 = vmatprep.subr.bf16.mxu1 %v9863_v63  ;;  %v9879_v63 = vld [vmem:[#allocation3 + $0x540] ss:$8 sps:$4 sm:$0xff]  }
 0x5aa   :  { %2122 = vmatpush1.bf16.msra.mxu1 %v9861_v0  ;;  %v9884_v0 = vld [vmem:[#allocation3 + $0x554] ss:$8 sps:$4 sm:$0xff]  }
 0x5ab   :  { %2123 = vmatprep.subr.bf16.mxu1 %v9866_v7  ;;  %v9882_v7 = vld [vmem:[#allocation3 + $0x550] ss:$8 sps:$4 sm:$0xff]  }
 0x5ae   :  { %2124 = vmatpush1.bf16.msra.mxu1 %v9864_v8  ;;  %v9887_v8 = vld [vmem:[#allocation3 + $0x564] ss:$8 sps:$4 sm:$0xff]  }
 0x5af   :  { %2329 = vmatprep.subr.bf16.mxu1 %v9869_v13  ;;  %v9885_v13 = vld [vmem:[#allocation3 + $0x560] ss:$8 sps:$4 sm:$0xff]  }
 0x5fc   :  { %v1608_v14 = vpop.f32.mrb[16].mxu1 }
 0x5fd   :  { %v1610_v16 = vpop.f32.mrb[17].mxu1 }
 0x5fe   :  { %v1612_v17 = vpop.f32.mrb[18].mxu1 }
 0x5ff   :  { %v1617_v18 = vpack.c.bf16 %v1612_v17, %v1608_v14  ;;  %v1614_v42 = vpop.f32.mrb[19].mxu1  ;;  %v9890_v14 = vld [vmem:[#allocation3 + $0x574] ss:$8 sps:$4 sm:$0xff]   ;;  %v9893_v17 = vld [vmem:[#allocation3 + $0x584] ss:$8 sps:$4 sm:$0xff]  }
 0x600   :  { %v1618_v22 = vpack.c.bf16 %v1614_v42, %v1610_v16  ;;  %v9888_v16 = vld [vmem:[#allocation3 + $0x570] ss:$8 sps:$4 sm:$0xff]   ;;  %v9896_v42 = vld [vmem:[#allocation3 + $0x594] ss:$8 sps:$4 sm:$0xff]  }
 0x602   :  { %2125 = vmatprep.mubr.bf16.mxu1 %v1618_v22  ;;  %v9894_v22 = vld [vmem:[#allocation3 + $0x590] ss:$8 sps:$4 sm:$0xff]  }
 0x603   :  { %2126 = vmatmul.mubr.bf16.vlgmr.msra.gmra.mrb[24].mxu1 %v1617_v18  ;;  %v9891_v18 = vld [vmem:[#allocation3 + $0x580] ss:$8 sps:$4 sm:$0xff]  }
 0x604   :  { %2330 = vmatpush1.bf16.msra.mxu1 %v9867_v24  ;;  %v11113_v43 = vpop.f32.mrb[20].mxu1  ;;  %v9899_v24 = vld [vmem:[#allocation3 + $0x5a4] ss:$8 sps:$4 sm:$0xff]  }
 0x605   :  { %2331 = vmatprep.subr.bf16.mxu1 %v9872_v31  ;;  %v1655_v46 = vpop.f32.mrb[21].mxu1  ;;  %v9897_v31 = vld [vmem:[#allocation3 + $0x5a0] ss:$8 sps:$4 sm:$0xff]  }
 0x606   :  { %v1657_v47 = vpop.f32.mrb[22].mxu1 }
 0x607   :  { %v1662_v48 = vpack.c.bf16 %v1657_v47, %v11113_v43  ;;  %v1659_v49 = vpop.f32.mrb[23].mxu1  ;;  %v9900_v43 = vld [vmem:[#allocation3 + $0x5b0] ss:$8 sps:$4 sm:$0xff]   ;;  %v9908_v47 = vld [vmem:[#allocation3 + $0x5d4] ss:$8 sps:$4 sm:$0xff]  }
 0x608   :  { %2332 = vmatpush1.bf16.msra.mxu1 %v9870_v40  ;;  %v1663_v52 = vpack.c.bf16 %v1659_v49, %v1655_v46  ;;  %v9902_v40 = vld [vmem:[#allocation3 + $0x5b4] ss:$8 sps:$4 sm:$0xff]   ;;  %v9903_v46 = vld [vmem:[#allocation3 + $0x5c0] ss:$8 sps:$4 sm:$0xff]   ;;  %v9906_v49 = vld [vmem:[#allocation3 + $0x5d0] ss:$8 sps:$4 sm:$0xff]  }
 0x609   :  { %2333 = vmatprep.subr.bf16.mxu1 %v9875_v44  ;;  %v9905_v44 = vld [vmem:[#allocation3 + $0x5c4] ss:$8 sps:$4 sm:$0xff]  }
 0x60a   :  { %2361 = vmatprep.mubr.bf16.mxu1 %v1663_v52  ;;  %v9909_v52 = vld [vmem:[#allocation3 + $0x5e0] ss:$8 sps:$4 sm:$0xff]  }
 0x60c   :  { %2334 = vmatpush1.bf16.msra.mxu1 %v9873_v51  ;;  %v9911_v51 = vld [vmem:[#allocation3 + $0x5e4] ss:$8 sps:$4 sm:$0xff]  }
 0x60d   :  { %2335 = vmatprep.subr.bf16.mxu1 %v9878_v58  ;;  %v9914_v58 = vld [vmem:[#allocation3 + $0x5f4] ss:$8 sps:$4 sm:$0xff]  }
 0x610   :  { %2336 = vmatpush1.bf16.msra.mxu1 %v9876_v59  ;;  %v9912_v59 = vld [vmem:[#allocation3 + $0x5f0] ss:$8 sps:$4 sm:$0xff]  }
 0x611   :  { %2337 = vmatprep.subr.bf16.mxu1 %v9881_v60 }
 0x614   :  { %2338 = vmatpush1.bf16.msra.mxu1 %v9879_v63 }
 0x615   :  { %2339 = vmatprep.subr.bf16.mxu1 %v9884_v0 }
 0x618   :  { %2340 = vmatpush1.bf16.msra.mxu1 %v9882_v7 }
 0x619   :  { %2341 = vmatprep.subr.bf16.mxu1 %v9887_v8 }
 0x61c   :  { %2342 = vmatpush1.bf16.msra.mxu1 %v9885_v13 }
 0x61d   :  { %2343 = vmatprep.subr.bf16.mxu1 %v9890_v14 }
 0x620   :  { %2344 = vmatpush1.bf16.msra.mxu1 %v9888_v16 }
 0x621   :  { %2345 = vmatprep.subr.bf16.mxu1 %v9893_v17 }
 0x624   :  { %2346 = vmatpush1.bf16.msra.mxu1 %v9891_v18 }
 0x625   :  { %2347 = vmatprep.subr.bf16.mxu1 %v9896_v42 }
 0x628   :  { %2348 = vmatpush1.bf16.msra.mxu1 %v9894_v22 }
 0x629   :  { %2349 = vmatprep.subr.bf16.mxu1 %v9899_v24 }
 0x62c   :  { %2350 = vmatpush1.bf16.msra.mxu1 %v9897_v31 }
 0x62d   :  { %2351 = vmatprep.subr.bf16.mxu1 %v9902_v40 }
 0x630   :  { %2352 = vmatpush1.bf16.msra.mxu1 %v9900_v43 }
 0x631   :  { %2353 = vmatprep.subr.bf16.mxu1 %v9905_v44 }
 0x634   :  { %2354 = vmatpush1.bf16.msra.mxu1 %v9903_v46 }
 0x635   :  { %2355 = vmatprep.subr.bf16.mxu1 %v9908_v47 }
 0x638   :  { %2356 = vmatpush1.bf16.msra.mxu1 %v9906_v49 }
 0x639   :  { %2357 = vmatprep.subr.bf16.mxu1 %v9911_v51 }
 0x63c   :  { %2358 = vmatpush1.bf16.msra.mxu1 %v9909_v52 }
 0x63d   :  { %2359 = vmatprep.subr.bf16.mxu1 %v9914_v58 }
 0x640   :  { %2360 = vmatpush1.bf16.msra.mxu1 %v9912_v59 }
 0x643   :  { %2362 = vmatmul.mubr.bf16.vlgmr.msra.gmra.mrb[24].mxu1 %v1662_v48 }
 0x644   :  { %2446 = vmatprep.mubr.f32.mxu1 %v10519_v19 }
 0x716   :  { %v11117_v60 = vpop.f32.mrb[24].mxu1 }
 0x717   :  { %v11119_v63 = vpop.f32.mrb[25].mxu1  ;;  %v2378_v7 = vmul.f32 %v11117_v60, %v11117_v60 }
 0x718   :  { %v11121_v0 = vpop.f32.mrb[26].mxu1  ;;  %v2379_v48 = vmul.f32 %v11119_v63, %v11119_v63 }
 0x719   :  { %v2380_v8 = vmul.f32 %v11121_v0, %v11121_v0  ;;  %v9187_v13 = vpack.c.bf16 %v11121_v0, %v11117_v60  ;;  %v11129_v14 = vpop.f32.mrb[27].mxu1 }
 0x71a   :  { %v2381_v16 = vmul.f32 %v11129_v14, %v11129_v14  ;;  %v9185_v17 = vpack.c.bf16 %v11129_v14, %v11119_v63 }
 0x71b   :  { %v9191_v18 = vpack.c.bf16 %v2380_v8, %v2378_v7 }
 0x71c   :  { %9186 = vmatprep.subr.bf16.mxu1 %v9185_v17  ;;  %v9189_v42 = vpack.c.bf16 %v2381_v16, %v2379_v48  ;;  %v2376_v48 = vld [vmem:[#allocation5 + $0x2] sm:$0x1] }
 0x71d   :  { %9188 = vmatpush1.bf16.msra.mxu1 %v9187_v13 }
 0x71e   :  { %9190 = vmatprep.subr.bf16.mxu0 %v9189_v42  ;;  %v2377_v42 = vld [vmem:[#allocation5 + $0x3] sm:$0x1] }
 0x71f   :  { %9192 = vmatpush1.bf16.msra.mxu0 %v9191_v18 }
 0x720   :  { %7960 = vmatmul.mubr.msk.f32.vlgmr.msra.gmra.mrb[28].mxu1 %vm12134_vm5, %v10520_v53  ;;  %9194 = vmatprep.subr.msk.bf16.mxu0 %vm10766_vm15, %v10521_v56  ;;  %vm12139_vm5 = vnez %v12106_v54 }
 0x721   :  { %3724 = vmatprep.mubr.f32.mxu1 %v10519_v19 }
 0x722   :  { %7961 = vmatmul.mubr.msk.f32.vlgmr.msra.gmra.mrb[8].mxu0 %vm12135_vm9, %v10520_v53  ;;  %vm12140_vm9 = vnez %v12108_v55 }
 0x723   :  { %9196 = vmatpush3.bf16.msk.msra.mxu0 %vm10782_vm4, %v10521_v56 }
 0x724   :  { %9198 = vmatprep.subr.msk.bf16.mxu0 %vm10796_vm7, %v10521_v56 }
 0x727   :  { %9200 = vmatpush3.bf16.msk.msra.mxu0 %vm10826_vm10, %v10521_v56 }
 0x728   :  { %9202 = vmatprep.subr.msk.bf16.mxu0 %vm10842_vm14, %v10521_v56 }
 0x72b   :  { %9204 = vmatpush3.bf16.msk.msra.mxu0 %vm12119_vm2, %v10521_v56 }
 0x72c   :  { %9206 = vmatprep.subr.msk.bf16.mxu0 %vm12136_vm13, %v10521_v56 }
 0x72f   :  { %9208 = vmatpush3.bf16.msk.msra.mxu0 %vm12137_vm8, %v10521_v56 }
 0x730   :  { %9210 = vmatprep.subr.msk.bf16.mxu0 %vm12138_vm12, %v10521_v56 }
 0x733   :  { %9212 = vmatpush3.bf16.msk.msra.mxu0 %vm12139_vm5, %v10521_v56 }
 0x734   :  { %9214 = vmatprep.subr.msk.bf16.mxu0 %vm12140_vm9, %v10521_v56 }
 0x737   :  { %9216 = vmatpush3.bf16.msk.msra.mxu0 %vm12141_vm11, %v10521_v56 }
 0x738   :  { %9218 = vmatprep.subr.msk.bf16.mxu0 %vm12142_vm1, %v10521_v56 }
 0x73b   :  { %9220 = vmatpush3.bf16.msk.msra.mxu0 %vm12143_vm0, %v10521_v56 }
 0x73c   :  { %9222 = vmatprep.subr.msk.bf16.mxu0 %vm12144_vm6, %v10521_v56 }
 0x73f   :  { %9224 = vmatpush3.bf16.msk.msra.mxu0 %vm12145_vm3, %v10521_v56 }
 0x740   :  { %9226 = vmatprep.subr.msk.bf16.mxu0 %vm10766_vm15, %v10521_v56 }
 0x7f3   :  { %v2448_v22 = vpop.f32.mrb[28].mxu1 }
 0x7f4   :  { %v2450_v24 = vpop.f32.mrb[29].mxu1 }
 0x7f5   :  { %2588 = vmatprep.mubr.f32.mxu0 %v2450_v24  ;;  %v2519_v31 = vpop.f32.mrb[8].mxu0 }
 0x7f6   :  { %2589 = vmatmul.mubr.f32.vlgmr.msra.gmra.mrb[10].mxu0 %v2448_v22  ;;  %v2521_v40 = vpop.f32.mrb[9].mxu0 }
 0x7f7   :  { %9228 = vmatpush3.bf16.msk.msra.mxu0 %vm10782_vm4, %v10521_v56  ;;  %2658 = vmatprep.mubr.f32.mxu0 %v2521_v40 }
 0x7f8   :  { %9230 = vmatprep.subr.msk.bf16.mxu0 %vm10796_vm7, %v10521_v56 }
 0x7fb   :  { %9232 = vmatpush3.bf16.msk.msra.mxu0 %vm10826_vm10, %v10521_v56 }
 0x7fc   :  { %9234 = vmatprep.subr.msk.bf16.mxu0 %vm10842_vm14, %v10521_v56 }
 0x7ff   :  { %9236 = vmatpush3.bf16.msk.msra.mxu0 %vm12119_vm2, %v10521_v56 }
 0x800   :  { %9238 = vmatprep.subr.msk.bf16.mxu0 %vm12136_vm13, %v10521_v56 }
 0x803   :  { %9240 = vmatpush3.bf16.msk.msra.mxu0 %vm12137_vm8, %v10521_v56 }
 0x804   :  { %9242 = vmatprep.subr.msk.bf16.mxu0 %vm12138_vm12, %v10521_v56 }
 0x807   :  { %9244 = vmatpush3.bf16.msk.msra.mxu0 %vm12139_vm5, %v10521_v56 }
 0x808   :  { %9246 = vmatprep.subr.msk.bf16.mxu0 %vm12140_vm9, %v10521_v56  ;;  %vm12146_vm9 = vnez %v12125_v26 }
 0x80b   :  { %9248 = vmatpush3.bf16.msk.msra.mxu0 %vm12141_vm11, %v10521_v56 }
 0x80c   :  { %9250 = vmatprep.subr.msk.bf16.mxu0 %vm12142_vm1, %v10521_v56  ;;  %vm12147_vm1 = vnez %v12127_v29 }
 0x80f   :  { %9252 = vmatpush3.bf16.msk.msra.mxu0 %vm12143_vm0, %v10521_v56  ;;  %vm12148_vm0 = vnez %v12129_v30 }
 0x810   :  { %9254 = vmatprep.subr.msk.bf16.mxu0 %vm12144_vm6, %v10521_v56  ;;  %vm12149_vm6 = vnez %v12131_v39 }
 0x813   :  { %9256 = vmatpush3.bf16.msk.msra.mxu0 %vm12145_vm3, %v10521_v56  ;;  %vm12150_vm3 = vcmask 261120  }
 0x814   :  { %9258 = vmatprep.subr.msk.bf16.mxu0 %vm12146_vm9, %v10521_v56 }
 0x816   :  { %2659 = vmatmul.mubr.f32.vlgmr.msra.gmra.mrb[12].mxu0 %v2519_v31 }
 0x817   :  { %9260 = vmatpush1.bf16.msk.msra.mxu0 %vm12147_vm1, %v10521_v56  ;;  %2741 = vmatprep.mubr.f32.mxu0 %v10519_v19 }
 0x818   :  { %9262 = vmatprep.subr.msk.bf16.mxu0 %vm12148_vm0, %v10521_v56 }
 0x81b   :  { %9264 = vmatpush1.bf16.msk.msra.mxu0 %vm12149_vm6, %v10521_v56 }
 0x81c   :  { %9266 = vmatprep.subr.msk.bf16.mxu0 %vm12146_vm9, %v10521_v56  ;;  %vm12151_vm9 = vmmov %vm12150_vm3 }
 0x8c9   :  { %v8746_v43 = vpop.f32.mrb[10].mxu0 }
 0x8ca   :  { %v8747_v44 = vpop.f32.mrb[11].mxu0 }
 0x8cb   :  { %v8748_v46 = vadd.f32 %v8747_v44, %v8746_v43 }
 0x8cd   :  { %v2664_v47 = vmul.f32 0.0078125, %v8748_v46 }
 0x8cf   :  { %v2666_v58 = vmul.f32 %v2664_v47, %v2664_v47 }
 0x8e9   :  { %v8781_v49 = vpop.f32.mrb[12].mxu0 }
 0x8ea   :  { %v8782_v51 = vpop.f32.mrb[13].mxu0 }
 0x8eb   :  { %v8783_v52 = vadd.f32 %v8782_v51, %v8781_v49 }
 0x8ed   :  { %v2665_v59 = vmul.f32 0.0078125, %v8783_v52 }
 0x8ef   :  { %v2667_v7 = vsub.f32 %v2665_v59, %v2666_v58 }
 0x8f1   :  { %v2668_v8 = vmax.f32 %v2667_v7, 0.0 }
 0x8f3   :  { %v2669_v13 = vadd.f32 1e-05, %v2668_v8 }
 0x8f5   :  { %10377 = vrsqrt.f32 %v2669_v13 }
 0x8ff   :  { %v10378_v16 = vpop.eup %10377 }
 0x900   :  { %v2671_v17 = vmul.f32 %v10378_v16, %v2376_v48 }
 0x902   :  { %8034 = vmatmul.mubr.msk.f32.vlgmr.msra.gmra.mrb[14].mxu0 %vm12150_vm3, %v2671_v17  ;;  %v2672_v18 = vmul.f32 %v2671_v17, %v2664_v47  ;;  %vm12152_vm3 = vcmask 130048  }
 0x903   :  { %9268 = vmatpush1.bf16.msk.msra.mxu0 %vm12147_vm1, %v10521_v56  ;;  %2827 = vmatprep.mubr.f32.mxu0 %v10519_v19  ;;  %vm12159_vm1 = vnez %v12118_v12 }
 0x904   :  { %9270 = vmatprep.subr.msk.bf16.mxu0 %vm12148_vm0, %v10521_v56  ;;  %v2673_v22 = vsub.f32 %v2377_v42, %v2672_v18  ;;  %vm12158_vm0 = vnez %v12116_v10 }
 0x907   :  { %9272 = vmatpush1.bf16.msk.msra.mxu0 %vm12149_vm6, %v10521_v56  ;;  %vm12157_vm6 = vnez %v12114_v9 }
 0x90a   :  { %8043 = vmatmul.mubr.msk.f32.vlgmr.msra.gmra.mrb[16].mxu0 %vm12151_vm9, %v2673_v22  ;;  %v9920_v22 = vld [vmem:[#allocation3 + $0x714] ss:$8 sps:$4 sm:$0xff]   ;;  %vm12153_vm9 = vmmov %vm12152_vm3 }
 0x90b   :  { %2884 = vmatprep.mubr.bf16.mxu0 %v10518_v1 }
 0x9d5   :  { %v2743_v24 = vpop.f32.mrb[14].mxu0 }
 0x9d6   :  { %v2751_v31 = vrot.slane %v2743_v24, %v11073_v61  ;;  %v2745_v40 = vpop.f32.mrb[15].mxu0  ;;  %v9918_v24 = vld [vmem:[#allocation3 + $0x710] ss:$8 sps:$4 sm:$0xff]  }
 0x9d7   :  { %v2755_v43 = vrot.slane %v2745_v40, %v11073_v61  ;;  %v9921_v40 = vld [vmem:[#allocation3 + $0x720] ss:$8 sps:$4 sm:$0xff]  }
 0x9d8   :  { %v2756_v44 = vmul.f32 %v2751_v31, %v11117_v60  ;;  %v2758_v46 = vmul.f32 %v2751_v31, %v11121_v0  ;;  %v9923_v31 = vld [vmem:[#allocation3 + $0x724] ss:$8 sps:$4 sm:$0xff]  }
 0x9d9   :  { %v2757_v47 = vmul.f32 %v2755_v43, %v11119_v63  ;;  %v2759_v49 = vmul.f32 %v2755_v43, %v11129_v14  ;;  %v9917_v63 = vld [vmem:[#allocation3 + $0x704] ss:$8 sps:$4 sm:$0xff]   ;;  %v9915_v14 = vld [vmem:[#allocation3 + $0x700] ss:$8 sps:$4 sm:$0xff]   ;;  %v9926_v43 = vld [vmem:[#allocation3 + $0x734] ss:$8 sps:$4 sm:$0xff]  }
 0x9dd   :  { %v2829_v51 = vpop.f32.mrb[16].mxu0 }
 0x9de   :  { %v2837_v52 = vrot.slane %v2829_v51, %v11073_v61  ;;  %v2831_v58 = vpop.f32.mrb[17].mxu0  ;;  %v9930_v51 = vld [vmem:[#allocation3 + $0x750] ss:$8 sps:$4 sm:$0xff]  }
 0x9df   :  { %v2841_v59 = vrot.slane %v2831_v58, %v11073_v61  ;;  %v9933_v58 = vld [vmem:[#allocation3 + $0x760] ss:$8 sps:$4 sm:$0xff]  }
 0x9e0   :  { %v2842_v7 = vadd.f32 %v2837_v52, %v2756_v44  ;;  %v2844_v8 = vadd.f32 %v2837_v52, %v2758_v46  ;;  %v9924_v44 = vld [vmem:[#allocation3 + $0x730] ss:$8 sps:$4 sm:$0xff]   ;;  %v9929_v46 = vld [vmem:[#allocation3 + $0x744] ss:$8 sps:$4 sm:$0xff]  }
 0x9e1   :  { %v2843_v13 = vadd.f32 %v2841_v59, %v2757_v47  ;;  %v2845_v48 = vadd.f32 %v2841_v59, %v2759_v49  ;;  %v9927_v47 = vld [vmem:[#allocation3 + $0x740] ss:$8 sps:$4 sm:$0xff]   ;;  %v9932_v49 = vld [vmem:[#allocation3 + $0x754] ss:$8 sps:$4 sm:$0xff]   ;;  %v9935_v52 = vld [vmem:[#allocation3 + $0x764] ss:$8 sps:$4 sm:$0xff]  }
 0x9e2   :  { %v2846_v16 = vmax.f32 %v2842_v7, 0.0  ;;  %v2848_v17 = vmax.f32 %v2844_v8, 0.0  ;;  %v9938_v59 = vld [vmem:[#allocation3 + $0x774] ss:$8 sps:$4 sm:$0xff]   ;;  %v9936_v7 = vld [vmem:[#allocation3 + $0x770] ss:$8 sps:$4 sm:$0xff]  }
 0x9e3   :  { %v2847_v18 = vmax.f32 %v2843_v13, 0.0  ;;  %v2849_v60 = vmax.f32 %v2845_v48, 0.0  ;;  %v9941_v8 = vld [vmem:[#allocation3 + $0x784] ss:$8 sps:$4 sm:$0xff]   ;;  %v9939_v13 = vld [vmem:[#allocation3 + $0x780] ss:$8 sps:$4 sm:$0xff]  }
 0x9e4   :  { %v11275_v42 = vpack.c.bf16 %v2848_v17, %v2846_v16  ;;  %v9944_v48 = vld [vmem:[#allocation3 + $0x794] ss:$8 sps:$4 sm:$0xff]   ;;  %v9942_v16 = vld [vmem:[#allocation3 + $0x790] ss:$8 sps:$4 sm:$0xff]   ;;  %v9947_v17 = vld [vmem:[#allocation3 + $0x7a4] ss:$8 sps:$4 sm:$0xff]  }
 0x9e5   :  { %v2851_v0 = vpack.c.bf16 %v2849_v60, %v2847_v18  ;;  %v9945_v18 = vld [vmem:[#allocation3 + $0x7a0] ss:$8 sps:$4 sm:$0xff]   ;;  %v9950_v60 = vld [vmem:[#allocation3 + $0x7b4] ss:$8 sps:$4 sm:$0xff]  }
 0x9e7   :  { %2852 = vmatprep.subr.bf16.mxu0 %v2851_v0 }
 0x9e8   :  { %2853 = vmatpush1.bf16.msra.mxu0 %v11275_v42 }
 0x9e9   :  { %2897 = vmatprep.subr.bf16.mxu0 %v2851_v0 }
 0x9eb   :  { %8044 = vmatmul.mubr.msk.bf16.vlgmr.msra.gmra.mrb[20].mxu0 %vm12152_vm3, %v10701_v23 }
 0x9ec   :  { %2898 = vmatpush1.bf16.msra.mxu0 %v11275_v42  ;;  %2929 = vmatprep.mubr.bf16.mxu0 %v10518_v1 }
 0x9ed   :  { %3168 = vmatprep.subr.bf16.mxu0 %v9917_v63  ;;  %v9953_v63 = vld [vmem:[#allocation3 + $0x7c4] ss:$8 sps:$4 sm:$0xff]  }
 0x9f3   :  { %8045 = vmatmul.mubr.msk.bf16.vlgmr.msra.gmra.mrb[24].mxu0 %vm12153_vm9, %v10708_v28  ;;  %vm12154_vm9 = vmmov %vm12152_vm3 }
 0x9f4   :  { %3169 = vmatpush1.bf16.msra.mxu0 %v9915_v14  ;;  %3200 = vmatprep.mubr.bf16.mxu0 %v2851_v0  ;;  %v9948_v0 = vld [vmem:[#allocation3 + $0x7b0] ss:$8 sps:$4 sm:$0xff]   ;;  %v9951_v14 = vld [vmem:[#allocation3 + $0x7c0] ss:$8 sps:$4 sm:$0xff]  }
 0x9f5   :  { %3170 = vmatprep.subr.bf16.mxu0 %v9920_v22  ;;  %v9956_v22 = vld [vmem:[#allocation3 + $0x7d4] ss:$8 sps:$4 sm:$0xff]  }
 0x9f8   :  { %3171 = vmatpush1.bf16.msra.mxu0 %v9918_v24  ;;  %v9954_v24 = vld [vmem:[#allocation3 + $0x7d0] ss:$8 sps:$4 sm:$0xff]  }
 0x9f9   :  { %3172 = vmatprep.subr.bf16.mxu0 %v9923_v31  ;;  %v9959_v31 = vld [vmem:[#allocation3 + $0x7e4] ss:$8 sps:$4 sm:$0xff]  }
 0x9fc   :  { %3173 = vmatpush1.bf16.msra.mxu0 %v9921_v40  ;;  %v9957_v40 = vld [vmem:[#allocation3 + $0x7e0] ss:$8 sps:$4 sm:$0xff]  }
 0x9fd   :  { %3174 = vmatprep.subr.bf16.mxu0 %v9926_v43  ;;  %v9962_v43 = vld [vmem:[#allocation3 + $0x7f4] ss:$8 sps:$4 sm:$0xff]  }
 0xa00   :  { %3175 = vmatpush1.bf16.msra.mxu0 %v9924_v44  ;;  %v9960_v44 = vld [vmem:[#allocation3 + $0x7f0] ss:$8 sps:$4 sm:$0xff]  }
 0xa01   :  { %3176 = vmatprep.subr.bf16.mxu0 %v9929_v46  ;;  %v9965_v46 = vld [vmem:[#allocation3 + $0x604] ss:$8 sps:$4 sm:$0xff]  }
 0xa04   :  { %3177 = vmatpush1.bf16.msra.mxu0 %v9927_v47  ;;  %v9963_v47 = vld [vmem:[#allocation3 + $0x600] ss:$8 sps:$4 sm:$0xff]  }
 0xa05   :  { %3178 = vmatprep.subr.bf16.mxu0 %v9932_v49  ;;  %v9968_v49 = vld [vmem:[#allocation3 + $0x614] ss:$8 sps:$4 sm:$0xff]  }
 0xa08   :  { %3179 = vmatpush1.bf16.msra.mxu0 %v9930_v51  ;;  %v9966_v51 = vld [vmem:[#allocation3 + $0x610] ss:$8 sps:$4 sm:$0xff]  }
 0xa09   :  { %3180 = vmatprep.subr.bf16.mxu0 %v9935_v52  ;;  %v9971_v52 = vld [vmem:[#allocation3 + $0x624] ss:$8 sps:$4 sm:$0xff]  }
 0xa0c   :  { %3181 = vmatpush1.bf16.msra.mxu0 %v9933_v58  ;;  %v9969_v58 = vld [vmem:[#allocation3 + $0x620] ss:$8 sps:$4 sm:$0xff]  }
 0xa0d   :  { %3182 = vmatprep.subr.bf16.mxu0 %v9938_v59  ;;  %v9974_v59 = vld [vmem:[#allocation3 + $0x634] ss:$8 sps:$4 sm:$0xff]  }
 0xa10   :  { %3183 = vmatpush1.bf16.msra.mxu0 %v9936_v7  ;;  %v9972_v7 = vld [vmem:[#allocation3 + $0x630] ss:$8 sps:$4 sm:$0xff]  }
 0xa11   :  { %3184 = vmatprep.subr.bf16.mxu0 %v9941_v8  ;;  %v9977_v8 = vld [vmem:[#allocation3 + $0x644] ss:$8 sps:$4 sm:$0xff]  }
 0xa14   :  { %3185 = vmatpush1.bf16.msra.mxu0 %v9939_v13  ;;  %v9975_v13 = vld [vmem:[#allocation3 + $0x640] ss:$8 sps:$4 sm:$0xff]  }
 0xa15   :  { %3186 = vmatprep.subr.bf16.mxu0 %v9944_v48  ;;  %v9980_v48 = vld [vmem:[#allocation3 + $0x654] ss:$8 sps:$4 sm:$0xff]  }
 0xa18   :  { %3187 = vmatpush1.bf16.msra.mxu0 %v9942_v16  ;;  %v9978_v16 = vld [vmem:[#allocation3 + $0x650] ss:$8 sps:$4 sm:$0xff]  }
 0xa19   :  { %3188 = vmatprep.subr.bf16.mxu0 %v9947_v17  ;;  %v9981_v17 = vld [vmem:[#allocation3 + $0x660] ss:$8 sps:$4 sm:$0xff]  }
 0xa1c   :  { %3189 = vmatpush1.bf16.msra.mxu0 %v9945_v18  ;;  %v9986_v18 = vld [vmem:[#allocation3 + $0x674] ss:$8 sps:$4 sm:$0xff]  }
 0xa1d   :  { %3190 = vmatprep.subr.bf16.mxu0 %v9950_v60  ;;  %v9984_v60 = vld [vmem:[#allocation3 + $0x670] ss:$8 sps:$4 sm:$0xff]  }
 0xa20   :  { %3191 = vmatpush1.bf16.msra.mxu0 %v9948_v0  ;;  %v9989_v0 = vld [vmem:[#allocation3 + $0x684] ss:$8 sps:$4 sm:$0xff]  }
 0xa21   :  { %3192 = vmatprep.subr.bf16.mxu0 %v9953_v63  ;;  %v9987_v63 = vld [vmem:[#allocation3 + $0x680] ss:$8 sps:$4 sm:$0xff]  }
 0xa24   :  { %3193 = vmatpush1.bf16.msra.mxu0 %v9951_v14  ;;  %v9992_v14 = vld [vmem:[#allocation3 + $0x694] ss:$8 sps:$4 sm:$0xff]  }
 0xa25   :  { %3194 = vmatprep.subr.bf16.mxu0 %v9956_v22  ;;  %v9990_v22 = vld [vmem:[#allocation3 + $0x690] ss:$8 sps:$4 sm:$0xff]  }
 0xa28   :  { %3195 = vmatpush1.bf16.msra.mxu0 %v9954_v24  ;;  %v9995_v24 = vld [vmem:[#allocation3 + $0x6a4] ss:$8 sps:$4 sm:$0xff]  }
 0xa29   :  { %3196 = vmatprep.subr.bf16.mxu0 %v9959_v31  ;;  %v9993_v31 = vld [vmem:[#allocation3 + $0x6a0] ss:$8 sps:$4 sm:$0xff]  }
 0xa2c   :  { %3197 = vmatpush1.bf16.msra.mxu0 %v9957_v40  ;;  %v9998_v40 = vld [vmem:[#allocation3 + $0x6b4] ss:$8 sps:$4 sm:$0xff]  }
 0xa2d   :  { %3198 = vmatprep.subr.bf16.mxu0 %v9962_v43  ;;  %v9996_v43 = vld [vmem:[#allocation3 + $0x6b0] ss:$8 sps:$4 sm:$0xff]  }
 0xa30   :  { %3199 = vmatpush1.bf16.msra.mxu0 %v9960_v44  ;;  %v10001_v44 = vld [vmem:[#allocation3 + $0x6c4] ss:$8 sps:$4 sm:$0xff]  }
 0xa31   :  { %3371 = vmatprep.subr.bf16.mxu0 %v9965_v46  ;;  %v9999_v46 = vld [vmem:[#allocation3 + $0x6c0] ss:$8 sps:$4 sm:$0xff]  }
 0xa33   :  { %3201 = vmatmul.mubr.bf16.vlgmr.msra.gmra.mrb[28].mxu0 %v11275_v42  ;;  %v9983_v42 = vld [vmem:[#allocation3 + $0x664] ss:$8 sps:$4 sm:$0xff]  }
 0xa34   :  { %3372 = vmatpush1.bf16.msra.mxu0 %v9963_v47  ;;  %v10004_v47 = vld [vmem:[#allocation3 + $0x6d4] ss:$8 sps:$4 sm:$0xff]  }
 0xa35   :  { %3373 = vmatprep.subr.bf16.mxu0 %v9968_v49  ;;  %v10002_v49 = vld [vmem:[#allocation3 + $0x6d0] ss:$8 sps:$4 sm:$0xff]  }
 0xa38   :  { %3374 = vmatpush1.bf16.msra.mxu0 %v9966_v51  ;;  %v10007_v51 = vld [vmem:[#allocation3 + $0x6e4] ss:$8 sps:$4 sm:$0xff]  }
 0xa39   :  { %3375 = vmatprep.subr.bf16.mxu0 %v9971_v52  ;;  %v10005_v52 = vld [vmem:[#allocation3 + $0x6e0] ss:$8 sps:$4 sm:$0xff]  }
 0xa3c   :  { %3376 = vmatpush1.bf16.msra.mxu0 %v9969_v58  ;;  %v10010_v58 = vld [vmem:[#allocation3 + $0x6f4] ss:$8 sps:$4 sm:$0xff]  }
 0xa3d   :  { %3377 = vmatprep.subr.bf16.mxu0 %v9974_v59  ;;  %v10008_v59 = vld [vmem:[#allocation3 + $0x6f0] ss:$8 sps:$4 sm:$0xff]  }
 0xa40   :  { %3378 = vmatpush1.bf16.msra.mxu0 %v9972_v7  ;;  %v10013_v7 = vld [vmem:[#allocation3 + $0x804] ss:$8 sps:$4 sm:$0xff]  }
 0xa41   :  { %3379 = vmatprep.subr.bf16.mxu0 %v9977_v8 }
 0xa44   :  { %3380 = vmatpush1.bf16.msra.mxu0 %v9975_v13 }
 0xa45   :  { %3381 = vmatprep.subr.bf16.mxu0 %v9980_v48 }
 0xa48   :  { %3382 = vmatpush1.bf16.msra.mxu0 %v9978_v16 }
 0xa49   :  { %3383 = vmatprep.subr.bf16.mxu0 %v9983_v42 }
 0xa4c   :  { %3384 = vmatpush1.bf16.msra.mxu0 %v9981_v17 }
 0xa4d   :  { %3385 = vmatprep.subr.bf16.mxu0 %v9986_v18  ;;  %v10011_v18 = vld [vmem:[#allocation3 + $0x800] ss:$8 sps:$4 sm:$0xff]  }
 0xa50   :  { %3386 = vmatpush1.bf16.msra.mxu0 %v9984_v60  ;;  %v10016_v60 = vld [vmem:[#allocation3 + $0x814] ss:$8 sps:$4 sm:$0xff]  }
 0xa51   :  { %3387 = vmatprep.subr.bf16.mxu0 %v9989_v0  ;;  %v10014_v0 = vld [vmem:[#allocation3 + $0x810] ss:$8 sps:$4 sm:$0xff]  }
 0xa54   :  { %3388 = vmatpush1.bf16.msra.mxu0 %v9987_v63 }
 0xa55   :  { %3389 = vmatprep.subr.bf16.mxu0 %v9992_v14  ;;  %v10019_v14 = vld [vmem:[#allocation3 + $0x824] ss:$8 sps:$4 sm:$0xff]  }
 0xa58   :  { %3390 = vmatpush1.bf16.msra.mxu0 %v9990_v22 }
 0xa59   :  { %3391 = vmatprep.subr.bf16.mxu0 %v9995_v24 }
 0xa5c   :  { %3392 = vmatpush1.bf16.msra.mxu0 %v9993_v31 }
 0xa5d   :  { %3393 = vmatprep.subr.bf16.mxu0 %v9998_v40 }
 0xa60   :  { %3394 = vmatpush1.bf16.msra.mxu0 %v9996_v43  ;;  %v10017_v43 = vld [vmem:[#allocation3 + $0x820] ss:$8 sps:$4 sm:$0xff]  }
 0xa61   :  { %3395 = vmatprep.subr.bf16.mxu0 %v10001_v44 }
 0xa64   :  { %3396 = vmatpush1.bf16.msra.mxu0 %v9999_v46  ;;  %v10022_v46 = vld [vmem:[#allocation3 + $0x834] ss:$8 sps:$4 sm:$0xff]  }
 0xa65   :  { %3397 = vmatprep.subr.bf16.mxu0 %v10004_v47  ;;  %v10020_v47 = vld [vmem:[#allocation3 + $0x830] ss:$8 sps:$4 sm:$0xff]  }
 0xa68   :  { %3398 = vmatpush1.bf16.msra.mxu0 %v10002_v49  ;;  %v10025_v49 = vld [vmem:[#allocation3 + $0x844] ss:$8 sps:$4 sm:$0xff]  }
 0xa69   :  { %3399 = vmatprep.subr.bf16.mxu0 %v10007_v51  ;;  %v10023_v51 = vld [vmem:[#allocation3 + $0x840] ss:$8 sps:$4 sm:$0xff]  }
 0xa6c   :  { %3400 = vmatpush1.bf16.msra.mxu0 %v10005_v52  ;;  %v10028_v52 = vld [vmem:[#allocation3 + $0x854] ss:$8 sps:$4 sm:$0xff]  }
 0xa6d   :  { %3401 = vmatprep.subr.bf16.mxu0 %v10010_v58  ;;  %v10026_v58 = vld [vmem:[#allocation3 + $0x850] ss:$8 sps:$4 sm:$0xff]  }
 0xa70   :  { %3402 = vmatpush1.bf16.msra.mxu0 %v10008_v59  ;;  %v10031_v59 = vld [vmem:[#allocation3 + $0x864] ss:$8 sps:$4 sm:$0xff]  }
 0xa71   :  { %3607 = vmatprep.subr.bf16.mxu0 %v10013_v7  ;;  %v10029_v7 = vld [vmem:[#allocation3 + $0x860] ss:$8 sps:$4 sm:$0xff]  }
 0xabe   :  { %v2886_v8 = vpop.f32.mrb[20].mxu0 }
 0xabf   :  { %v2888_v13 = vpop.f32.mrb[21].mxu0 }
 0xac0   :  { %v2890_v48 = vpop.f32.mrb[22].mxu0 }
 0xac1   :  { %v2895_v16 = vpack.c.bf16 %v2890_v48, %v2886_v8  ;;  %v2892_v42 = vpop.f32.mrb[23].mxu0  ;;  %v10034_v8 = vld [vmem:[#allocation3 + $0x874] ss:$8 sps:$4 sm:$0xff]   ;;  %v10037_v48 = vld [vmem:[#allocation3 + $0x884] ss:$8 sps:$4 sm:$0xff]  }
 0xac2   :  { %v2896_v17 = vpack.c.bf16 %v2892_v42, %v2888_v13  ;;  %v10032_v13 = vld [vmem:[#allocation3 + $0x870] ss:$8 sps:$4 sm:$0xff]   ;;  %v10040_v42 = vld [vmem:[#allocation3 + $0x894] ss:$8 sps:$4 sm:$0xff]  }
 0xac4   :  { %3403 = vmatprep.mubr.bf16.mxu0 %v2896_v17  ;;  %v10038_v17 = vld [vmem:[#allocation3 + $0x890] ss:$8 sps:$4 sm:$0xff]  }
 0xac5   :  { %3404 = vmatmul.mubr.bf16.vlgmr.msra.gmra.mrb[28].mxu0 %v2895_v16  ;;  %v10035_v16 = vld [vmem:[#allocation3 + $0x880] ss:$8 sps:$4 sm:$0xff]  }
 0xac6   :  { %3608 = vmatpush1.bf16.msra.mxu0 %v10011_v18  ;;  %v11285_v63 = vpop.f32.mrb[24].mxu0  ;;  %v10043_v18 = vld [vmem:[#allocation3 + $0x8a4] ss:$8 sps:$4 sm:$0xff]  }
 0xac7   :  { %3609 = vmatprep.subr.bf16.mxu0 %v10016_v60  ;;  %v2933_v22 = vpop.f32.mrb[25].mxu0  ;;  %v10041_v60 = vld [vmem:[#allocation3 + $0x8a0] ss:$8 sps:$4 sm:$0xff]  }
 0xac8   :  { %v2935_v24 = vpop.f32.mrb[26].mxu0 }
 0xac9   :  { %v2940_v31 = vpack.c.bf16 %v2935_v24, %v11285_v63  ;;  %v2937_v40 = vpop.f32.mrb[27].mxu0  ;;  %v10044_v63 = vld [vmem:[#allocation3 + $0x8b0] ss:$8 sps:$4 sm:$0xff]   ;;  %v10052_v24 = vld [vmem:[#allocation3 + $0x8d4] ss:$8 sps:$4 sm:$0xff]  }
 0xaca   :  { %3610 = vmatpush1.bf16.msra.mxu0 %v10014_v0  ;;  %v2941_v44 = vpack.c.bf16 %v2937_v40, %v2933_v22  ;;  %v10046_v0 = vld [vmem:[#allocation3 + $0x8b4] ss:$8 sps:$4 sm:$0xff]   ;;  %v10047_v22 = vld [vmem:[#allocation3 + $0x8c0] ss:$8 sps:$4 sm:$0xff]   ;;  %v10050_v40 = vld [vmem:[#allocation3 + $0x8d0] ss:$8 sps:$4 sm:$0xff]  }
 0xacb   :  { %3611 = vmatprep.subr.bf16.mxu0 %v10019_v14  ;;  %v10049_v14 = vld [vmem:[#allocation3 + $0x8c4] ss:$8 sps:$4 sm:$0xff]  }
 0xacc   :  { %3639 = vmatprep.mubr.bf16.mxu0 %v2941_v44  ;;  %v10053_v44 = vld [vmem:[#allocation3 + $0x8e0] ss:$8 sps:$4 sm:$0xff]  }
 0xace   :  { %3612 = vmatpush1.bf16.msra.mxu0 %v10017_v43  ;;  %v10055_v43 = vld [vmem:[#allocation3 + $0x8e4] ss:$8 sps:$4 sm:$0xff]  }
 0xacf   :  { %3613 = vmatprep.subr.bf16.mxu0 %v10022_v46  ;;  %v10058_v46 = vld [vmem:[#allocation3 + $0x8f4] ss:$8 sps:$4 sm:$0xff]  }
 0xad2   :  { %3614 = vmatpush1.bf16.msra.mxu0 %v10020_v47  ;;  %v10056_v47 = vld [vmem:[#allocation3 + $0x8f0] ss:$8 sps:$4 sm:$0xff]  }
 0xad3   :  { %3615 = vmatprep.subr.bf16.mxu0 %v10025_v49 }
 0xad6   :  { %3616 = vmatpush1.bf16.msra.mxu0 %v10023_v51 }
 0xad7   :  { %3617 = vmatprep.subr.bf16.mxu0 %v10028_v52 }
 0xada   :  { %3618 = vmatpush1.bf16.msra.mxu0 %v10026_v58 }
 0xadb   :  { %3619 = vmatprep.subr.bf16.mxu0 %v10031_v59 }
 0xade   :  { %3620 = vmatpush1.bf16.msra.mxu0 %v10029_v7 }
 0xadf   :  { %3621 = vmatprep.subr.bf16.mxu0 %v10034_v8 }
 0xae2   :  { %3622 = vmatpush1.bf16.msra.mxu0 %v10032_v13 }
 0xae3   :  { %3623 = vmatprep.subr.bf16.mxu0 %v10037_v48 }
 0xae6   :  { %3624 = vmatpush1.bf16.msra.mxu0 %v10035_v16 }
 0xae7   :  { %3625 = vmatprep.subr.bf16.mxu0 %v10040_v42 }
 0xaea   :  { %3626 = vmatpush1.bf16.msra.mxu0 %v10038_v17 }
 0xaeb   :  { %3627 = vmatprep.subr.bf16.mxu0 %v10043_v18 }
 0xaee   :  { %3628 = vmatpush1.bf16.msra.mxu0 %v10041_v60 }
 0xaef   :  { %3629 = vmatprep.subr.bf16.mxu0 %v10046_v0 }
 0xaf2   :  { %3630 = vmatpush1.bf16.msra.mxu0 %v10044_v63 }
 0xaf3   :  { %3631 = vmatprep.subr.bf16.mxu0 %v10049_v14 }
 0xaf6   :  { %3632 = vmatpush1.bf16.msra.mxu0 %v10047_v22 }
 0xaf7   :  { %3633 = vmatprep.subr.bf16.mxu0 %v10052_v24 }
 0xafa   :  { %3634 = vmatpush1.bf16.msra.mxu0 %v10050_v40 }
 0xafb   :  { %3635 = vmatprep.subr.bf16.mxu0 %v10055_v43 }
 0xafe   :  { %3636 = vmatpush1.bf16.msra.mxu0 %v10053_v44 }
 0xaff   :  { %3637 = vmatprep.subr.bf16.mxu0 %v10058_v46 }
 0xb02   :  { %3638 = vmatpush1.bf16.msra.mxu0 %v10056_v47 }
 0xb05   :  { %3640 = vmatmul.mubr.bf16.vlgmr.msra.gmra.mrb[28].mxu0 %v2940_v31 }
 0xb06   :  { %5006 = vmatprep.mubr.f32.mxu0 %v10519_v19 }
 0xbd8   :  { %v11289_v49 = vpop.f32.mrb[28].mxu0 }
 0xbd9   :  { %v11291_v51 = vpop.f32.mrb[29].mxu0  ;;  %v3656_v58 = vmul.f32 %v11289_v49, %v11289_v49 }
 0xbda   :  { %v11293_v52 = vpop.f32.mrb[30].mxu0  ;;  %v3657_v31 = vmul.f32 %v11291_v51, %v11291_v51 }
 0xbdb   :  { %v3658_v59 = vmul.f32 %v11293_v52, %v11293_v52  ;;  %v9275_v7 = vpack.c.bf16 %v11293_v52, %v11289_v49  ;;  %v11301_v8 = vpop.f32.mrb[31].mxu0 }
 0xbdc   :  { %v3659_v13 = vmul.f32 %v11301_v8, %v11301_v8  ;;  %v9273_v48 = vpack.c.bf16 %v11301_v8, %v11291_v51 }
 0xbdd   :  { %v9279_v16 = vpack.c.bf16 %v3658_v59, %v3656_v58 }
 0xbde   :  { %9274 = vmatprep.subr.bf16.mxu1 %v9273_v48  ;;  %v9277_v42 = vpack.c.bf16 %v3659_v13, %v3657_v31  ;;  %v3654_v31 = vld [vmem:[#allocation5 + $0x4] sm:$0x1] }
 0xbdf   :  { %9276 = vmatpush1.bf16.msra.mxu1 %v9275_v7 }
 0xbe0   :  { %9278 = vmatprep.subr.bf16.mxu1 %v9277_v42  ;;  %v3655_v42 = vld [vmem:[#allocation5 + $0x5] sm:$0x1] }
 0xbe2   :  { %8142 = vmatmul.mubr.msk.f32.vlgmr.msra.gmra.mrb[30].mxu1 %vm12152_vm3, %v10520_v53  ;;  %vm12155_vm3 = vnez %v12108_v55 }
 0xbe3   :  { %9280 = vmatpush1.bf16.msra.mxu1 %v9279_v16  ;;  %3795 = vmatprep.mubr.f32.mxu1 %v10519_v19 }
 0xbe4   :  { %9282 = vmatprep.subr.msk.bf16.mxu1 %vm10766_vm15, %v10521_v56 }
 0xbe6   :  { %8143 = vmatmul.mubr.msk.f32.vlgmr.msra.gmra.mrb[32].mxu1 %vm12154_vm9, %v10520_v53  ;;  %vm12156_vm9 = vnez %v12112_v6 }
 0xbe7   :  { %9284 = vmatpush3.bf16.msk.msra.mxu1 %vm10782_vm4, %v10521_v56 }
 0xbe8   :  { %9286 = vmatprep.subr.msk.bf16.mxu1 %vm10796_vm7, %v10521_v56 }
 0xbeb   :  { %9288 = vmatpush3.bf16.msk.msra.mxu1 %vm10826_vm10, %v10521_v56 }
 0xbec   :  { %9290 = vmatprep.subr.msk.bf16.mxu1 %vm10842_vm14, %v10521_v56 }
 0xbef   :  { %9292 = vmatpush3.bf16.msk.msra.mxu1 %vm12119_vm2, %v10521_v56 }
 0xbf0   :  { %9294 = vmatprep.subr.msk.bf16.mxu1 %vm12136_vm13, %v10521_v56 }
 0xbf3   :  { %9296 = vmatpush3.bf16.msk.msra.mxu1 %vm12137_vm8, %v10521_v56 }
 0xbf4   :  { %9298 = vmatprep.subr.msk.bf16.mxu1 %vm12138_vm12, %v10521_v56 }
 0xbf7   :  { %9300 = vmatpush3.bf16.msk.msra.mxu1 %vm12139_vm5, %v10521_v56 }
 0xbf8   :  { %9302 = vmatprep.subr.msk.bf16.mxu1 %vm12155_vm3, %v10521_v56 }
 0xbfb   :  { %9304 = vmatpush3.bf16.msk.msra.mxu1 %vm12141_vm11, %v10521_v56 }
 0xbfc   :  { %9306 = vmatprep.subr.msk.bf16.mxu1 %vm12156_vm9, %v10521_v56 }
 0xbff   :  { %9308 = vmatpush3.bf16.msk.msra.mxu1 %vm12157_vm6, %v10521_v56 }
 0xc00   :  { %9310 = vmatprep.subr.msk.bf16.mxu1 %vm12158_vm0, %v10521_v56 }
 0xc03   :  { %9312 = vmatpush3.bf16.msk.msra.mxu1 %vm12159_vm1, %v10521_v56 }
 0xc04   :  { %9314 = vmatprep.subr.msk.bf16.mxu1 %vm10766_vm15, %v10521_v56 }
 0xcb5   :  { %v3726_v17 = vpop.f32.mrb[30].mxu1 }
 0xcb6   :  { %v3728_v18 = vpop.f32.mrb[31].mxu1 }
 0xcb7   :  { %3866 = vmatprep.mubr.f32.mxu1 %v3728_v18 }
 0xcb8   :  { %3867 = vmatmul.mubr.f32.vlgmr.msra.gmra.mrb[34].mxu1 %v3726_v17 }
 0xcb9   :  { %9316 = vmatpush3.bf16.msk.msra.mxu1 %vm10782_vm4, %v10521_v56  ;;  %v3797_v60 = vpop.f32.mrb[32].mxu1 }
 0xcba   :  { %9318 = vmatprep.subr.msk.bf16.mxu1 %vm10796_vm7, %v10521_v56  ;;  %v3799_v0 = vpop.f32.mrb[33].mxu1 }
 0xcbb   :  { %3936 = vmatprep.mubr.f32.mxu1 %v3799_v0 }
 0xcbd   :  { %9320 = vmatpush3.bf16.msk.msra.mxu1 %vm10826_vm10, %v10521_v56 }
 0xcbe   :  { %9322 = vmatprep.subr.msk.bf16.mxu1 %vm10842_vm14, %v10521_v56 }
 0xcc1   :  { %9324 = vmatpush3.bf16.msk.msra.mxu1 %vm12119_vm2, %v10521_v56 }
 0xcc2   :  { %9326 = vmatprep.subr.msk.bf16.mxu1 %vm12136_vm13, %v10521_v56 }
 0xcc5   :  { %9328 = vmatpush3.bf16.msk.msra.mxu1 %vm12137_vm8, %v10521_v56 }
 0xcc6   :  { %9330 = vmatprep.subr.msk.bf16.mxu1 %vm12138_vm12, %v10521_v56 }
 0xcc9   :  { %9332 = vmatpush3.bf16.msk.msra.mxu1 %vm12139_vm5, %v10521_v56 }
 0xcca   :  { %9334 = vmatprep.subr.msk.bf16.mxu1 %vm12155_vm3, %v10521_v56  ;;  %vm12160_vm3 = vnez %v12125_v26 }
 0xccd   :  { %9336 = vmatpush3.bf16.msk.msra.mxu1 %vm12141_vm11, %v10521_v56 }
 0xcce   :  { %9338 = vmatprep.subr.msk.bf16.mxu1 %vm12156_vm9, %v10521_v56  ;;  %vm12161_vm9 = vnez %v12127_v29 }
 0xcd1   :  { %9340 = vmatpush3.bf16.msk.msra.mxu1 %vm12157_vm6, %v10521_v56  ;;  %vm12162_vm6 = vnez %v12129_v30 }
 0xcd2   :  { %9342 = vmatprep.subr.msk.bf16.mxu1 %vm12158_vm0, %v10521_v56  ;;  %vm12163_vm0 = vnez %v12131_v39 }
 0xcd5   :  { %9344 = vmatpush3.bf16.msk.msra.mxu1 %vm12159_vm1, %v10521_v56  ;;  %vm12164_vm1 = vcmask 261120  }
 0xcd6   :  { %9346 = vmatprep.subr.msk.bf16.mxu1 %vm12160_vm3, %v10521_v56 }
 0xcd8   :  { %3937 = vmatmul.mubr.f32.vlgmr.msra.gmra.mrb[36].mxu1 %v3797_v60 }
 0xcd9   :  { %9348 = vmatpush1.bf16.msk.msra.mxu1 %vm12161_vm9, %v10521_v56  ;;  %4019 = vmatprep.mubr.f32.mxu1 %v10519_v19 }
 0xcda   :  { %9350 = vmatprep.subr.msk.bf16.mxu1 %vm12162_vm6, %v10521_v56 }
 0xcdd   :  { %9352 = vmatpush1.bf16.msk.msra.mxu1 %vm12163_vm0, %v10521_v56 }
 0xcde   :  { %9354 = vmatprep.subr.msk.bf16.mxu1 %vm12160_vm3, %v10521_v56  ;;  %vm12165_vm3 = vmmov %vm12164_vm1 }
 0xd8b   :  { %v8816_v63 = vpop.f32.mrb[34].mxu1 }
 0xd8c   :  { %v8817_v14 = vpop.f32.mrb[35].mxu1 }
 0xd8d   :  { %v8818_v22 = vadd.f32 %v8817_v14, %v8816_v63 }
 0xd8f   :  { %v3942_v24 = vmul.f32 0.0078125, %v8818_v22 }
 0xd91   :  { %v3944_v46 = vmul.f32 %v3942_v24, %v3942_v24 }
 0xdab   :  { %v8851_v40 = vpop.f32.mrb[36].mxu1 }
 0xdac   :  { %v8852_v43 = vpop.f32.mrb[37].mxu1 }
 0xdad   :  { %v8853_v44 = vadd.f32 %v8852_v43, %v8851_v40 }
 0xdaf   :  { %v3943_v47 = vmul.f32 0.0078125, %v8853_v44 }
 0xdb1   :  { %v3945_v58 = vsub.f32 %v3943_v47, %v3944_v46 }
 0xdb3   :  { %v3946_v59 = vmax.f32 %v3945_v58, 0.0 }
 0xdb5   :  { %v3947_v7 = vadd.f32 1e-05, %v3946_v59 }
 0xdb7   :  { %10379 = vrsqrt.f32 %v3947_v7 }
 0xdc1   :  { %v10380_v13 = vpop.eup %10379 }
 0xdc2   :  { %v3949_v48 = vmul.f32 %v10380_v13, %v3654_v31 }
 0xdc4   :  { %8216 = vmatmul.mubr.msk.f32.vlgmr.msra.gmra.mrb[38].mxu1 %vm12164_vm1, %v3949_v48  ;;  %v3950_v16 = vmul.f32 %v3949_v48, %v3942_v24  ;;  %vm12166_vm1 = vcmask 130048  }
 0xdc5   :  { %9356 = vmatpush1.bf16.msk.msra.mxu1 %vm12161_vm9, %v10521_v56  ;;  %4105 = vmatprep.mubr.f32.mxu1 %v10519_v19  ;;  %vm12173_vm9 = vnez %v12118_v12 }
 0xdc6   :  { %9358 = vmatprep.subr.msk.bf16.mxu1 %vm12162_vm6, %v10521_v56  ;;  %v3951_v17 = vsub.f32 %v3655_v42, %v3950_v16  ;;  %v10067_v16 = vld [vmem:[#allocation3 + $0xa24] ss:$8 sps:$4 sm:$0xff]   ;;  %v10065_v42 = vld [vmem:[#allocation3 + $0xa20] ss:$8 sps:$4 sm:$0xff]   ;;  %vm12172_vm6 = vnez %v12116_v10 }
 0xdc9   :  { %9360 = vmatpush1.bf16.msk.msra.mxu1 %vm12163_vm0, %v10521_v56  ;;  %vm12171_vm0 = vnez %v12114_v9 }
 0xdcc   :  { %8225 = vmatmul.mubr.msk.f32.vlgmr.msra.gmra.mrb[40].mxu1 %vm12165_vm3, %v3951_v17  ;;  %vm12167_vm3 = vmmov %vm12166_vm1  ;;  %v10070_v17 = vld [vmem:[#allocation3 + $0xa34] ss:$8 sps:$4 sm:$0xff]  }
 0xdcd   :  { %4166 = vmatprep.mubr.bf16.mxu1 %v10518_v1 }
 0xe97   :  { %v4021_v18 = vpop.f32.mrb[38].mxu1 }
 0xe98   :  { %v4029_v60 = vrot.slane %v4021_v18, %v11073_v61  ;;  %v4023_v0 = vpop.f32.mrb[39].mxu1  ;;  %v10068_v18 = vld [vmem:[#allocation3 + $0xa30] ss:$8 sps:$4 sm:$0xff]  }
 0xe99   :  { %v4033_v63 = vrot.slane %v4023_v0, %v11073_v61  ;;  %v10071_v0 = vld [vmem:[#allocation3 + $0xa40] ss:$8 sps:$4 sm:$0xff]  }
 0xe9a   :  { %v4034_v14 = vmul.f32 %v4029_v60, %v11289_v49  ;;  %v4036_v22 = vmul.f32 %v4029_v60, %v11293_v52  ;;  %v10073_v60 = vld [vmem:[#allocation3 + $0xa44] ss:$8 sps:$4 sm:$0xff]  }
 0xe9b   :  { %v4035_v24 = vmul.f32 %v4033_v63, %v11291_v51  ;;  %v4037_v40 = vmul.f32 %v4033_v63, %v11301_v8  ;;  %v10076_v63 = vld [vmem:[#allocation3 + $0xa54] ss:$8 sps:$4 sm:$0xff]  }
 0xe9f   :  { %v4107_v43 = vpop.f32.mrb[40].mxu1 }
 0xea0   :  { %v4115_v44 = vrot.slane %v4107_v43, %v11073_v61  ;;  %v4109_v46 = vpop.f32.mrb[41].mxu1  ;;  %v10080_v43 = vld [vmem:[#allocation3 + $0xa70] ss:$8 sps:$4 sm:$0xff]  }
 0xea1   :  { %v4119_v47 = vrot.slane %v4109_v46, %v11073_v61  ;;  %v10083_v46 = vld [vmem:[#allocation3 + $0xa80] ss:$8 sps:$4 sm:$0xff]  }
 0xea2   :  { %v4120_v58 = vadd.f32 %v4115_v44, %v4034_v14  ;;  %v4122_v59 = vadd.f32 %v4115_v44, %v4036_v22  ;;  %v10074_v14 = vld [vmem:[#allocation3 + $0xa50] ss:$8 sps:$4 sm:$0xff]   ;;  %v10079_v22 = vld [vmem:[#allocation3 + $0xa64] ss:$8 sps:$4 sm:$0xff]  }
 0xea3   :  { %v4121_v7 = vadd.f32 %v4119_v47, %v4035_v24  ;;  %v4123_v31 = vadd.f32 %v4119_v47, %v4037_v40  ;;  %v10077_v24 = vld [vmem:[#allocation3 + $0xa60] ss:$8 sps:$4 sm:$0xff]   ;;  %v10082_v40 = vld [vmem:[#allocation3 + $0xa74] ss:$8 sps:$4 sm:$0xff]   ;;  %v10085_v44 = vld [vmem:[#allocation3 + $0xa84] ss:$8 sps:$4 sm:$0xff]  }
 0xea4   :  { %v11449_v13 = vadd.f32 %v4120_v58, %v1568_v20  ;;  %v11453_v49 = vadd.f32 %v4122_v59, %v1570_v21  ;;  %v10059_v21 = vld [vmem:[#allocation3 + $0xa00] ss:$8 sps:$4 sm:$0xff]   ;;  %v10088_v47 = vld [vmem:[#allocation3 + $0xa94] ss:$8 sps:$4 sm:$0xff]   ;;  %v10086_v58 = vld [vmem:[#allocation3 + $0xa90] ss:$8 sps:$4 sm:$0xff]  }
 0xea5   :  { %v11457_v51 = vadd.f32 %v4121_v7, %v1569_v25  ;;  %v11461_v52 = vadd.f32 %v4123_v31, %v1571_v34  ;;  %v10064_v25 = vld [vmem:[#allocation3 + $0xa14] ss:$8 sps:$4 sm:$0xff]   ;;  %v10062_v34 = vld [vmem:[#allocation3 + $0xa10] ss:$8 sps:$4 sm:$0xff]   ;;  %v10091_v59 = vld [vmem:[#allocation3 + $0xaa4] ss:$8 sps:$4 sm:$0xff]  }
 0xea6   :  { %v4128_v8 = vmax.f32 %v11449_v13, 0.0  ;;  %v4130_v48 = vmax.f32 %v11453_v49, 0.0  ;;  %v10089_v7 = vld [vmem:[#allocation3 + $0xaa0] ss:$8 sps:$4 sm:$0xff]   ;;  %v10094_v31 = vld [vmem:[#allocation3 + $0xab4] ss:$8 sps:$4 sm:$0xff]  }
 0xea7   :  { %v4129_v32 = vmax.f32 %v11457_v51, 0.0  ;;  %v4131_v20 = vmax.f32 %v11461_v52, 0.0 }
 0xea8   :  { %v11475_v37 = vpack.c.bf16 %v4130_v48, %v4128_v8 }
 0xea9   :  { %v4133_v36 = vpack.c.bf16 %v4131_v20, %v4129_v32 }
 0xeab   :  { %4134 = vmatprep.subr.bf16.mxu1 %v4133_v36 }
 0xeac   :  { %4135 = vmatpush1.bf16.msra.mxu1 %v11475_v37 }
 0xead   :  { %4179 = vmatprep.subr.bf16.mxu1 %v4133_v36 }
 0xeaf   :  { %8226 = vmatmul.mubr.msk.bf16.vlgmr.msra.gmra.mrb[44].mxu1 %vm12166_vm1, %v10701_v23 }
 0xeb0   :  { %4180 = vmatpush1.bf16.msra.mxu1 %v11475_v37  ;;  %4211 = vmatprep.mubr.bf16.mxu1 %v10518_v1 }
 0xeb1   :  { %4450 = vmatprep.subr.bf16.mxu1 %v10061_v38  ;;  %v10097_v38 = vld [vmem:[#allocation3 + $0xac4] ss:$8 sps:$4 sm:$0xff]  }
 0xeb7   :  { %8227 = vmatmul.mubr.msk.bf16.vlgmr.msra.gmra.mrb[48].mxu1 %vm12167_vm3, %v10708_v28  ;;  %vm12168_vm3 = vmmov %vm12166_vm1 }
 0xeb8   :  { %4451 = vmatpush1.bf16.msra.mxu1 %v10059_v21  ;;  %4482 = vmatprep.mubr.bf16.mxu1 %v4133_v36  ;;  %v10092_v36 = vld [vmem:[#allocation3 + $0xab0] ss:$8 sps:$4 sm:$0xff]   ;;  %v10095_v21 = vld [vmem:[#allocation3 + $0xac0] ss:$8 sps:$4 sm:$0xff]  }
 0xeb9   :  { %4452 = vmatprep.subr.bf16.mxu1 %v10064_v25  ;;  %v10100_v25 = vld [vmem:[#allocation3 + $0xad4] ss:$8 sps:$4 sm:$0xff]  }
 0xebc   :  { %4453 = vmatpush1.bf16.msra.mxu1 %v10062_v34  ;;  %v10098_v34 = vld [vmem:[#allocation3 + $0xad0] ss:$8 sps:$4 sm:$0xff]  }
 0xebd   :  { %4454 = vmatprep.subr.bf16.mxu1 %v10067_v16  ;;  %v10103_v16 = vld [vmem:[#allocation3 + $0xae4] ss:$8 sps:$4 sm:$0xff]  }
 0xec0   :  { %4455 = vmatpush1.bf16.msra.mxu1 %v10065_v42  ;;  %v10101_v42 = vld [vmem:[#allocation3 + $0xae0] ss:$8 sps:$4 sm:$0xff]  }
 0xec1   :  { %4456 = vmatprep.subr.bf16.mxu1 %v10070_v17  ;;  %v10106_v17 = vld [vmem:[#allocation3 + $0xaf4] ss:$8 sps:$4 sm:$0xff]  }
 0xec4   :  { %4457 = vmatpush1.bf16.msra.mxu1 %v10068_v18  ;;  %v10104_v18 = vld [vmem:[#allocation3 + $0xaf0] ss:$8 sps:$4 sm:$0xff]  }
 0xec5   :  { %4458 = vmatprep.subr.bf16.mxu1 %v10073_v60  ;;  %v10109_v60 = vld [vmem:[#allocation3 + $0x904] ss:$8 sps:$4 sm:$0xff]  }
 0xec8   :  { %4459 = vmatpush1.bf16.msra.mxu1 %v10071_v0  ;;  %v10107_v0 = vld [vmem:[#allocation3 + $0x900] ss:$8 sps:$4 sm:$0xff]  }
 0xec9   :  { %4460 = vmatprep.subr.bf16.mxu1 %v10076_v63  ;;  %v10112_v63 = vld [vmem:[#allocation3 + $0x914] ss:$8 sps:$4 sm:$0xff]  }
 0xecc   :  { %4461 = vmatpush1.bf16.msra.mxu1 %v10074_v14  ;;  %v10110_v14 = vld [vmem:[#allocation3 + $0x910] ss:$8 sps:$4 sm:$0xff]  }
 0xecd   :  { %4462 = vmatprep.subr.bf16.mxu1 %v10079_v22  ;;  %v10115_v22 = vld [vmem:[#allocation3 + $0x924] ss:$8 sps:$4 sm:$0xff]  }
 0xed0   :  { %4463 = vmatpush1.bf16.msra.mxu1 %v10077_v24  ;;  %v10113_v24 = vld [vmem:[#allocation3 + $0x920] ss:$8 sps:$4 sm:$0xff]  }
 0xed1   :  { %4464 = vmatprep.subr.bf16.mxu1 %v10082_v40  ;;  %v10118_v40 = vld [vmem:[#allocation3 + $0x934] ss:$8 sps:$4 sm:$0xff]  }
 0xed4   :  { %4465 = vmatpush1.bf16.msra.mxu1 %v10080_v43  ;;  %v10116_v43 = vld [vmem:[#allocation3 + $0x930] ss:$8 sps:$4 sm:$0xff]  }
 0xed5   :  { %4466 = vmatprep.subr.bf16.mxu1 %v10085_v44  ;;  %v10121_v44 = vld [vmem:[#allocation3 + $0x944] ss:$8 sps:$4 sm:$0xff]  }
 0xed8   :  { %4467 = vmatpush1.bf16.msra.mxu1 %v10083_v46  ;;  %v10119_v46 = vld [vmem:[#allocation3 + $0x940] ss:$8 sps:$4 sm:$0xff]  }
 0xed9   :  { %4468 = vmatprep.subr.bf16.mxu1 %v10088_v47  ;;  %v10124_v47 = vld [vmem:[#allocation3 + $0x954] ss:$8 sps:$4 sm:$0xff]  }
 0xedc   :  { %4469 = vmatpush1.bf16.msra.mxu1 %v10086_v58  ;;  %v10122_v58 = vld [vmem:[#allocation3 + $0x950] ss:$8 sps:$4 sm:$0xff]  }
 0xedd   :  { %4470 = vmatprep.subr.bf16.mxu1 %v10091_v59  ;;  %v10125_v59 = vld [vmem:[#allocation3 + $0x960] ss:$8 sps:$4 sm:$0xff]  }
 0xee0   :  { %4471 = vmatpush1.bf16.msra.mxu1 %v10089_v7  ;;  %v10130_v7 = vld [vmem:[#allocation3 + $0x974] ss:$8 sps:$4 sm:$0xff]  }
 0xee1   :  { %4472 = vmatprep.subr.bf16.mxu1 %v10094_v31  ;;  %v10128_v31 = vld [vmem:[#allocation3 + $0x970] ss:$8 sps:$4 sm:$0xff]  }
 0xee4   :  { %4473 = vmatpush1.bf16.msra.mxu1 %v10092_v36  ;;  %v10133_v36 = vld [vmem:[#allocation3 + $0x984] ss:$8 sps:$4 sm:$0xff]  }
 0xee5   :  { %4474 = vmatprep.subr.bf16.mxu1 %v10097_v38  ;;  %v10131_v38 = vld [vmem:[#allocation3 + $0x980] ss:$8 sps:$4 sm:$0xff]  }
 0xee8   :  { %4475 = vmatpush1.bf16.msra.mxu1 %v10095_v21  ;;  %v10136_v21 = vld [vmem:[#allocation3 + $0x994] ss:$8 sps:$4 sm:$0xff]  }
 0xee9   :  { %4476 = vmatprep.subr.bf16.mxu1 %v10100_v25  ;;  %v10134_v25 = vld [vmem:[#allocation3 + $0x990] ss:$8 sps:$4 sm:$0xff]  }
 0xeec   :  { %4477 = vmatpush1.bf16.msra.mxu1 %v10098_v34  ;;  %v10139_v34 = vld [vmem:[#allocation3 + $0x9a4] ss:$8 sps:$4 sm:$0xff]  }
 0xeed   :  { %4478 = vmatprep.subr.bf16.mxu1 %v10103_v16  ;;  %v10137_v16 = vld [vmem:[#allocation3 + $0x9a0] ss:$8 sps:$4 sm:$0xff]  }
 0xef0   :  { %4479 = vmatpush1.bf16.msra.mxu1 %v10101_v42  ;;  %v10142_v42 = vld [vmem:[#allocation3 + $0x9b4] ss:$8 sps:$4 sm:$0xff]  }
 0xef1   :  { %4480 = vmatprep.subr.bf16.mxu1 %v10106_v17  ;;  %v10140_v17 = vld [vmem:[#allocation3 + $0x9b0] ss:$8 sps:$4 sm:$0xff]  }
 0xef4   :  { %4481 = vmatpush1.bf16.msra.mxu1 %v10104_v18  ;;  %v10145_v18 = vld [vmem:[#allocation3 + $0x9c4] ss:$8 sps:$4 sm:$0xff]  }
 0xef5   :  { %4653 = vmatprep.subr.bf16.mxu1 %v10109_v60  ;;  %v10143_v60 = vld [vmem:[#allocation3 + $0x9c0] ss:$8 sps:$4 sm:$0xff]  }
 0xef7   :  { %4483 = vmatmul.mubr.bf16.vlgmr.msra.gmra.mrb[52].mxu1 %v11475_v37  ;;  %v10127_v37 = vld [vmem:[#allocation3 + $0x964] ss:$8 sps:$4 sm:$0xff]  }
 0xef8   :  { %4654 = vmatpush1.bf16.msra.mxu1 %v10107_v0  ;;  %v10148_v0 = vld [vmem:[#allocation3 + $0x9d4] ss:$8 sps:$4 sm:$0xff]  }
 0xef9   :  { %4655 = vmatprep.subr.bf16.mxu1 %v10112_v63  ;;  %v10146_v63 = vld [vmem:[#allocation3 + $0x9d0] ss:$8 sps:$4 sm:$0xff]  }
 0xefc   :  { %4656 = vmatpush1.bf16.msra.mxu1 %v10110_v14  ;;  %v10151_v14 = vld [vmem:[#allocation3 + $0x9e4] ss:$8 sps:$4 sm:$0xff]  }
 0xefd   :  { %4657 = vmatprep.subr.bf16.mxu1 %v10115_v22  ;;  %v10149_v22 = vld [vmem:[#allocation3 + $0x9e0] ss:$8 sps:$4 sm:$0xff]  }
 0xf00   :  { %4658 = vmatpush1.bf16.msra.mxu1 %v10113_v24  ;;  %v10154_v24 = vld [vmem:[#allocation3 + $0x9f4] ss:$8 sps:$4 sm:$0xff]  }
 0xf01   :  { %4659 = vmatprep.subr.bf16.mxu1 %v10118_v40  ;;  %v10152_v40 = vld [vmem:[#allocation3 + $0x9f0] ss:$8 sps:$4 sm:$0xff]  }
 0xf04   :  { %4660 = vmatpush1.bf16.msra.mxu1 %v10116_v43  ;;  %v10157_v43 = vld [vmem:[#allocation3 + $0xb04] ss:$8 sps:$4 sm:$0xff]  }
 0xf05   :  { %4661 = vmatprep.subr.bf16.mxu1 %v10121_v44 }
 0xf08   :  { %4662 = vmatpush1.bf16.msra.mxu1 %v10119_v46 }
 0xf09   :  { %4663 = vmatprep.subr.bf16.mxu1 %v10124_v47 }
 0xf0c   :  { %4664 = vmatpush1.bf16.msra.mxu1 %v10122_v58 }
 0xf0d   :  { %4665 = vmatprep.subr.bf16.mxu1 %v10127_v37 }
 0xf10   :  { %4666 = vmatpush1.bf16.msra.mxu1 %v10125_v59 }
 0xf11   :  { %4667 = vmatprep.subr.bf16.mxu1 %v10130_v7  ;;  %v10155_v7 = vld [vmem:[#allocation3 + $0xb00] ss:$8 sps:$4 sm:$0xff]  }
 0xf14   :  { %4668 = vmatpush1.bf16.msra.mxu1 %v10128_v31  ;;  %v10160_v31 = vld [vmem:[#allocation3 + $0xb14] ss:$8 sps:$4 sm:$0xff]  }
 0xf15   :  { %4669 = vmatprep.subr.bf16.mxu1 %v10133_v36  ;;  %v10158_v36 = vld [vmem:[#allocation3 + $0xb10] ss:$8 sps:$4 sm:$0xff]  }
 0xf18   :  { %4670 = vmatpush1.bf16.msra.mxu1 %v10131_v38 }
 0xf19   :  { %4671 = vmatprep.subr.bf16.mxu1 %v10136_v21  ;;  %v10163_v21 = vld [vmem:[#allocation3 + $0xb24] ss:$8 sps:$4 sm:$0xff]  }
 0xf1c   :  { %4672 = vmatpush1.bf16.msra.mxu1 %v10134_v25 }
 0xf1d   :  { %4673 = vmatprep.subr.bf16.mxu1 %v10139_v34 }
 0xf20   :  { %4674 = vmatpush1.bf16.msra.mxu1 %v10137_v16 }
 0xf21   :  { %4675 = vmatprep.subr.bf16.mxu1 %v10142_v42 }
 0xf24   :  { %4676 = vmatpush1.bf16.msra.mxu1 %v10140_v17  ;;  %v10161_v17 = vld [vmem:[#allocation3 + $0xb20] ss:$8 sps:$4 sm:$0xff]  }
 0xf25   :  { %4677 = vmatprep.subr.bf16.mxu1 %v10145_v18 }
 0xf28   :  { %4678 = vmatpush1.bf16.msra.mxu1 %v10143_v60  ;;  %v10166_v60 = vld [vmem:[#allocation3 + $0xb34] ss:$8 sps:$4 sm:$0xff]  }
 0xf29   :  { %4679 = vmatprep.subr.bf16.mxu1 %v10148_v0  ;;  %v10164_v0 = vld [vmem:[#allocation3 + $0xb30] ss:$8 sps:$4 sm:$0xff]  }
 0xf2c   :  { %4680 = vmatpush1.bf16.msra.mxu1 %v10146_v63  ;;  %v10169_v63 = vld [vmem:[#allocation3 + $0xb44] ss:$8 sps:$4 sm:$0xff]  }
 0xf2d   :  { %4681 = vmatprep.subr.bf16.mxu1 %v10151_v14  ;;  %v10167_v14 = vld [vmem:[#allocation3 + $0xb40] ss:$8 sps:$4 sm:$0xff]  }
 0xf30   :  { %4682 = vmatpush1.bf16.msra.mxu1 %v10149_v22  ;;  %v10172_v22 = vld [vmem:[#allocation3 + $0xb54] ss:$8 sps:$4 sm:$0xff]  }
 0xf31   :  { %4683 = vmatprep.subr.bf16.mxu1 %v10154_v24  ;;  %v10170_v24 = vld [vmem:[#allocation3 + $0xb50] ss:$8 sps:$4 sm:$0xff]  }
 0xf34   :  { %4684 = vmatpush1.bf16.msra.mxu1 %v10152_v40  ;;  %v10175_v40 = vld [vmem:[#allocation3 + $0xb64] ss:$8 sps:$4 sm:$0xff]  }
 0xf35   :  { %4889 = vmatprep.subr.bf16.mxu1 %v10157_v43  ;;  %v10173_v43 = vld [vmem:[#allocation3 + $0xb60] ss:$8 sps:$4 sm:$0xff]  }
 0xf82   :  { %v4168_v44 = vpop.f32.mrb[44].mxu1 }
 0xf83   :  { %v4170_v46 = vpop.f32.mrb[45].mxu1 }
 0xf84   :  { %v4172_v47 = vpop.f32.mrb[46].mxu1 }
 0xf85   :  { %v4177_v58 = vpack.c.bf16 %v4172_v47, %v4168_v44  ;;  %v4174_v37 = vpop.f32.mrb[47].mxu1  ;;  %v10178_v44 = vld [vmem:[#allocation3 + $0xb74] ss:$8 sps:$4 sm:$0xff]   ;;  %v10181_v47 = vld [vmem:[#allocation3 + $0xb84] ss:$8 sps:$4 sm:$0xff]  }
 0xf86   :  { %v4178_v59 = vpack.c.bf16 %v4174_v37, %v4170_v46  ;;  %v10176_v46 = vld [vmem:[#allocation3 + $0xb70] ss:$8 sps:$4 sm:$0xff]   ;;  %v10184_v37 = vld [vmem:[#allocation3 + $0xb94] ss:$8 sps:$4 sm:$0xff]  }
 0xf88   :  { %4685 = vmatprep.mubr.bf16.mxu1 %v4178_v59  ;;  %v10182_v59 = vld [vmem:[#allocation3 + $0xb90] ss:$8 sps:$4 sm:$0xff]  }
 0xf89   :  { %4686 = vmatmul.mubr.bf16.vlgmr.msra.gmra.mrb[52].mxu1 %v4177_v58  ;;  %v10179_v58 = vld [vmem:[#allocation3 + $0xb80] ss:$8 sps:$4 sm:$0xff]  }
 0xf8a   :  { %4890 = vmatpush1.bf16.msra.mxu1 %v10155_v7  ;;  %v11485_v38 = vpop.f32.mrb[48].mxu1  ;;  %v10187_v7 = vld [vmem:[#allocation3 + $0xba4] ss:$8 sps:$4 sm:$0xff]  }
 0xf8b   :  { %4891 = vmatprep.subr.bf16.mxu1 %v10160_v31  ;;  %v4215_v25 = vpop.f32.mrb[49].mxu1  ;;  %v10185_v31 = vld [vmem:[#allocation3 + $0xba0] ss:$8 sps:$4 sm:$0xff]  }
 0xf8c   :  { %v4217_v34 = vpop.f32.mrb[50].mxu1 }
 0xf8d   :  { %v4222_v16 = vpack.c.bf16 %v4217_v34, %v11485_v38  ;;  %v4219_v42 = vpop.f32.mrb[51].mxu1  ;;  %v10188_v38 = vld [vmem:[#allocation3 + $0xbb0] ss:$8 sps:$4 sm:$0xff]   ;;  %v10196_v34 = vld [vmem:[#allocation3 + $0xbd4] ss:$8 sps:$4 sm:$0xff]  }
 0xf8e   :  { %4892 = vmatpush1.bf16.msra.mxu1 %v10158_v36  ;;  %v4223_v18 = vpack.c.bf16 %v4219_v42, %v4215_v25  ;;  %v10190_v36 = vld [vmem:[#allocation3 + $0xbb4] ss:$8 sps:$4 sm:$0xff]   ;;  %v10191_v25 = vld [vmem:[#allocation3 + $0xbc0] ss:$8 sps:$4 sm:$0xff]   ;;  %v10194_v42 = vld [vmem:[#allocation3 + $0xbd0] ss:$8 sps:$4 sm:$0xff]  }
 0xf8f   :  { %4893 = vmatprep.subr.bf16.mxu1 %v10163_v21  ;;  %v10193_v21 = vld [vmem:[#allocation3 + $0xbc4] ss:$8 sps:$4 sm:$0xff]  }
 0xf90   :  { %4921 = vmatprep.mubr.bf16.mxu1 %v4223_v18  ;;  %v10197_v18 = vld [vmem:[#allocation3 + $0xbe0] ss:$8 sps:$4 sm:$0xff]  }
 0xf92   :  { %4894 = vmatpush1.bf16.msra.mxu1 %v10161_v17  ;;  %v10199_v17 = vld [vmem:[#allocation3 + $0xbe4] ss:$8 sps:$4 sm:$0xff]  }
 0xf93   :  { %4895 = vmatprep.subr.bf16.mxu1 %v10166_v60  ;;  %v10202_v60 = vld [vmem:[#allocation3 + $0xbf4] ss:$8 sps:$4 sm:$0xff]  }
 0xf96   :  { %4896 = vmatpush1.bf16.msra.mxu1 %v10164_v0  ;;  %v10200_v0 = vld [vmem:[#allocation3 + $0xbf0] ss:$8 sps:$4 sm:$0xff]  }
 0xf97   :  { %4897 = vmatprep.subr.bf16.mxu1 %v10169_v63 }
 0xf9a   :  { %4898 = vmatpush1.bf16.msra.mxu1 %v10167_v14 }
 0xf9b   :  { %4899 = vmatprep.subr.bf16.mxu1 %v10172_v22 }
 0xf9e   :  { %4900 = vmatpush1.bf16.msra.mxu1 %v10170_v24 }
 0xf9f   :  { %4901 = vmatprep.subr.bf16.mxu1 %v10175_v40 }
 0xfa2   :  { %4902 = vmatpush1.bf16.msra.mxu1 %v10173_v43 }
 0xfa3   :  { %4903 = vmatprep.subr.bf16.mxu1 %v10178_v44 }
 0xfa6   :  { %4904 = vmatpush1.bf16.msra.mxu1 %v10176_v46 }
 0xfa7   :  { %4905 = vmatprep.subr.bf16.mxu1 %v10181_v47 }
 0xfaa   :  { %4906 = vmatpush1.bf16.msra.mxu1 %v10179_v58 }
 0xfab   :  { %4907 = vmatprep.subr.bf16.mxu1 %v10184_v37 }
 0xfae   :  { %4908 = vmatpush1.bf16.msra.mxu1 %v10182_v59 }
 0xfaf   :  { %4909 = vmatprep.subr.bf16.mxu1 %v10187_v7 }
 0xfb2   :  { %4910 = vmatpush1.bf16.msra.mxu1 %v10185_v31 }
 0xfb3   :  { %4911 = vmatprep.subr.bf16.mxu1 %v10190_v36 }
 0xfb6   :  { %4912 = vmatpush1.bf16.msra.mxu1 %v10188_v38 }
 0xfb7   :  { %4913 = vmatprep.subr.bf16.mxu1 %v10193_v21 }
 0xfba   :  { %4914 = vmatpush1.bf16.msra.mxu1 %v10191_v25 }
 0xfbb   :  { %4915 = vmatprep.subr.bf16.mxu1 %v10196_v34 }
 0xfbe   :  { %4916 = vmatpush1.bf16.msra.mxu1 %v10194_v42 }
 0xfbf   :  { %4917 = vmatprep.subr.bf16.mxu1 %v10199_v17 }
 0xfc2   :  { %4918 = vmatpush1.bf16.msra.mxu1 %v10197_v18 }
 0xfc3   :  { %4919 = vmatprep.subr.bf16.mxu1 %v10202_v60 }
 0xfc6   :  { %4920 = vmatpush1.bf16.msra.mxu1 %v10200_v0 }
 0xfc9   :  { %4922 = vmatmul.mubr.bf16.vlgmr.msra.gmra.mrb[52].mxu1 %v4222_v16 }
 0xfca   :  { %6284 = vmatprep.mubr.f32.mxu1 %v10519_v19 }
0x109c   :  { %v11489_v63 = vpop.f32.mrb[52].mxu1 }
0x109d   :  { %v11491_v14 = vpop.f32.mrb[53].mxu1  ;;  %v4938_v24 = vmul.f32 %v11489_v63, %v11489_v63 }
0x109e   :  { %v11493_v22 = vpop.f32.mrb[54].mxu1  ;;  %v4939_v16 = vmul.f32 %v11491_v14, %v11491_v14 }
0x109f   :  { %v4940_v40 = vmul.f32 %v11493_v22, %v11493_v22  ;;  %v9363_v43 = vpack.c.bf16 %v11493_v22, %v11489_v63  ;;  %v11501_v44 = vpop.f32.mrb[55].mxu1 }
0x10a0   :  { %v4941_v46 = vmul.f32 %v11501_v44, %v11501_v44  ;;  %v9361_v47 = vpack.c.bf16 %v11501_v44, %v11491_v14 }
0x10a1   :  { %v9367_v58 = vpack.c.bf16 %v4940_v40, %v4938_v24 }
0x10a2   :  { %9362 = vmatprep.subr.bf16.mxu0 %v9361_v47  ;;  %v9365_v37 = vpack.c.bf16 %v4941_v46, %v4939_v16  ;;  %v4936_v16 = vld [vmem:[#allocation5 + $0x6] sm:$0x1] }
0x10a3   :  { %9364 = vmatpush1.bf16.msra.mxu0 %v9363_v43 }
0x10a4   :  { %9366 = vmatprep.subr.bf16.mxu0 %v9365_v37  ;;  %v4937_v37 = vld [vmem:[#allocation5 + $0x7] sm:$0x1] }
0x10a6   :  { %8324 = vmatmul.mubr.msk.f32.vlgmr.msra.gmra.mrb[18].mxu0 %vm12166_vm1, %v10520_v53  ;;  %vm12169_vm1 = vnez %v12108_v55 }
0x10a7   :  { %9368 = vmatpush1.bf16.msra.mxu0 %v9367_v58  ;;  %5077 = vmatprep.mubr.f32.mxu0 %v10519_v19 }
0x10a8   :  { %9370 = vmatprep.subr.msk.bf16.mxu0 %vm10766_vm15, %v10521_v56 }
0x10aa   :  { %8325 = vmatmul.mubr.msk.f32.vlgmr.msra.gmra.mrb[32].mxu0 %vm12168_vm3, %v10520_v53  ;;  %vm12170_vm3 = vnez %v12112_v6 }
0x10ab   :  { %9372 = vmatpush3.bf16.msk.msra.mxu0 %vm10782_vm4, %v10521_v56 }
0x10ac   :  { %9374 = vmatprep.subr.msk.bf16.mxu0 %vm10796_vm7, %v10521_v56 }
0x10af   :  { %9376 = vmatpush3.bf16.msk.msra.mxu0 %vm10826_vm10, %v10521_v56 }
0x10b0   :  { %9378 = vmatprep.subr.msk.bf16.mxu0 %vm10842_vm14, %v10521_v56 }
0x10b3   :  { %9380 = vmatpush3.bf16.msk.msra.mxu0 %vm12119_vm2, %v10521_v56 }
0x10b4   :  { %9382 = vmatprep.subr.msk.bf16.mxu0 %vm12136_vm13, %v10521_v56 }
0x10b7   :  { %9384 = vmatpush3.bf16.msk.msra.mxu0 %vm12137_vm8, %v10521_v56 }
0x10b8   :  { %9386 = vmatprep.subr.msk.bf16.mxu0 %vm12138_vm12, %v10521_v56 }
0x10bb   :  { %9388 = vmatpush3.bf16.msk.msra.mxu0 %vm12139_vm5, %v10521_v56 }
0x10bc   :  { %9390 = vmatprep.subr.msk.bf16.mxu0 %vm12169_vm1, %v10521_v56 }
0x10bf   :  { %9392 = vmatpush3.bf16.msk.msra.mxu0 %vm12141_vm11, %v10521_v56 }
0x10c0   :  { %9394 = vmatprep.subr.msk.bf16.mxu0 %vm12170_vm3, %v10521_v56 }
0x10c3   :  { %9396 = vmatpush3.bf16.msk.msra.mxu0 %vm12171_vm0, %v10521_v56 }
0x10c4   :  { %9398 = vmatprep.subr.msk.bf16.mxu0 %vm12172_vm6, %v10521_v56 }
0x10c7   :  { %9400 = vmatpush3.bf16.msk.msra.mxu0 %vm12173_vm9, %v10521_v56 }
0x10c8   :  { %9402 = vmatprep.subr.msk.bf16.mxu0 %vm10766_vm15, %v10521_v56 }
0x1179   :  { %v5008_v59 = vpop.f32.mrb[18].mxu0 }
0x117a   :  { %v5010_v7 = vpop.f32.mrb[19].mxu0 }
0x117b   :  { %5148 = vmatprep.mubr.f32.mxu0 %v5010_v7 }
0x117c   :  { %5149 = vmatmul.mubr.f32.vlgmr.msra.gmra.mrb[34].mxu0 %v5008_v59 }
0x117d   :  { %9404 = vmatpush3.bf16.msk.msra.mxu0 %vm10782_vm4, %v10521_v56  ;;  %v5079_v31 = vpop.f32.mrb[32].mxu0 }
0x117e   :  { %9406 = vmatprep.subr.msk.bf16.mxu0 %vm10796_vm7, %v10521_v56  ;;  %v5081_v36 = vpop.f32.mrb[33].mxu0 }
0x117f   :  { %5218 = vmatprep.mubr.f32.mxu0 %v5081_v36 }
0x1181   :  { %9408 = vmatpush3.bf16.msk.msra.mxu0 %vm10826_vm10, %v10521_v56 }
0x1182   :  { %9410 = vmatprep.subr.msk.bf16.mxu0 %vm10842_vm14, %v10521_v56 }
0x1185   :  { %9412 = vmatpush3.bf16.msk.msra.mxu0 %vm12119_vm2, %v10521_v56 }
0x1186   :  { %9414 = vmatprep.subr.msk.bf16.mxu0 %vm12136_vm13, %v10521_v56 }
0x1189   :  { %9416 = vmatpush3.bf16.msk.msra.mxu0 %vm12137_vm8, %v10521_v56 }
0x118a   :  { %9418 = vmatprep.subr.msk.bf16.mxu0 %vm12138_vm12, %v10521_v56 }
0x118d   :  { %9420 = vmatpush3.bf16.msk.msra.mxu0 %vm12139_vm5, %v10521_v56 }
0x118e   :  { %9422 = vmatprep.subr.msk.bf16.mxu0 %vm12169_vm1, %v10521_v56  ;;  %vm12174_vm1 = vnez %v12125_v26 }
0x1191   :  { %9424 = vmatpush3.bf16.msk.msra.mxu0 %vm12141_vm11, %v10521_v56 }
0x1192   :  { %9426 = vmatprep.subr.msk.bf16.mxu0 %vm12170_vm3, %v10521_v56  ;;  %vm12175_vm3 = vnez %v12127_v29 }
0x1195   :  { %9428 = vmatpush3.bf16.msk.msra.mxu0 %vm12171_vm0, %v10521_v56  ;;  %vm12176_vm0 = vnez %v12129_v30 }
0x1196   :  { %9430 = vmatprep.subr.msk.bf16.mxu0 %vm12172_vm6, %v10521_v56  ;;  %vm12177_vm6 = vnez %v12131_v39 }
0x1199   :  { %9432 = vmatpush3.bf16.msk.msra.mxu0 %vm12173_vm9, %v10521_v56  ;;  %vm12178_vm9 = vcmask 261120  }
0x119a   :  { %9434 = vmatprep.subr.msk.bf16.mxu0 %vm12174_vm1, %v10521_v56 }
0x119c   :  { %5219 = vmatmul.mubr.f32.vlgmr.msra.gmra.mrb[36].mxu0 %v5079_v31 }
0x119d   :  { %9436 = vmatpush1.bf16.msk.msra.mxu0 %vm12175_vm3, %v10521_v56  ;;  %5301 = vmatprep.mubr.f32.mxu0 %v10519_v19 }
0x119e   :  { %9438 = vmatprep.subr.msk.bf16.mxu0 %vm12176_vm0, %v10521_v56 }
0x11a1   :  { %9440 = vmatpush1.bf16.msk.msra.mxu0 %vm12177_vm6, %v10521_v56 }
0x11a2   :  { %9442 = vmatprep.subr.msk.bf16.mxu0 %vm12174_vm1, %v10521_v56  ;;  %vm12179_vm1 = vmmov %vm12178_vm9 }
0x124f   :  { %v8886_v38 = vpop.f32.mrb[34].mxu0 }
0x1250   :  { %v8887_v21 = vpop.f32.mrb[35].mxu0 }
0x1251   :  { %v8888_v25 = vadd.f32 %v8887_v21, %v8886_v38 }
0x1253   :  { %v5224_v34 = vmul.f32 0.0078125, %v8888_v25 }
0x1255   :  { %v5226_v60 = vmul.f32 %v5224_v34, %v5224_v34 }
0x126f   :  { %v8921_v42 = vpop.f32.mrb[36].mxu0 }
0x1270   :  { %v8922_v17 = vpop.f32.mrb[37].mxu0 }
0x1271   :  { %v8923_v18 = vadd.f32 %v8922_v17, %v8921_v42 }
0x1273   :  { %v5225_v0 = vmul.f32 0.0078125, %v8923_v18 }
0x1275   :  { %v5227_v24 = vsub.f32 %v5225_v0, %v5226_v60 }
0x1277   :  { %v5228_v40 = vmax.f32 %v5227_v24, 0.0 }
0x1279   :  { %v5229_v43 = vadd.f32 1e-05, %v5228_v40 }
0x127b   :  { %10381 = vrsqrt.f32 %v5229_v43 }
0x1285   :  { %v10382_v46 = vpop.eup %10381 }
0x1286   :  { %v5231_v47 = vmul.f32 %v10382_v46, %v4936_v16 }
0x1288   :  { %8398 = vmatmul.mubr.msk.f32.vlgmr.msra.gmra.mrb[38].mxu0 %vm12178_vm9, %v5231_v47  ;;  %v5232_v58 = vmul.f32 %v5231_v47, %v5224_v34  ;;  %vm12180_vm9 = vcmask 130048  }
0x1289   :  { %9444 = vmatpush1.bf16.msk.msra.mxu0 %vm12175_vm3, %v10521_v56  ;;  %5387 = vmatprep.mubr.f32.mxu0 %v10519_v19  ;;  %vm12187_vm3 = vnez %v12118_v12 }
0x128a   :  { %9446 = vmatprep.subr.msk.bf16.mxu0 %vm12176_vm0, %v10521_v56  ;;  %v5233_v59 = vsub.f32 %v4937_v37, %v5232_v58  ;;  %vm12186_vm0 = vnez %v12116_v10 }
0x128d   :  { %9448 = vmatpush1.bf16.msk.msra.mxu0 %vm12177_vm6, %v10521_v56  ;;  %vm12185_vm6 = vnez %v12114_v9 }
0x1290   :  { %8407 = vmatmul.mubr.msk.f32.vlgmr.msra.gmra.mrb[40].mxu0 %vm12179_vm1, %v5233_v59  ;;  %v10208_v59 = vld [vmem:[#allocation3 + $0xd14] ss:$8 sps:$4 sm:$0xff]   ;;  %vm12181_vm1 = vmmov %vm12180_vm9 }
0x1291   :  { %5444 = vmatprep.mubr.bf16.mxu0 %v10518_v1 }
0x135b   :  { %v5303_v7 = vpop.f32.mrb[38].mxu0 }
0x135c   :  { %v5311_v31 = vrot.slane %v5303_v7, %v11073_v61  ;;  %v5305_v36 = vpop.f32.mrb[39].mxu0  ;;  %v10206_v7 = vld [vmem:[#allocation3 + $0xd10] ss:$8 sps:$4 sm:$0xff]  }
0x135d   :  { %v5315_v38 = vrot.slane %v5305_v36, %v11073_v61  ;;  %v10209_v36 = vld [vmem:[#allocation3 + $0xd20] ss:$8 sps:$4 sm:$0xff]  }
0x135e   :  { %v5316_v21 = vmul.f32 %v5311_v31, %v11489_v63  ;;  %v5318_v25 = vmul.f32 %v5311_v31, %v11493_v22  ;;  %v10211_v31 = vld [vmem:[#allocation3 + $0xd24] ss:$8 sps:$4 sm:$0xff]  }
0x135f   :  { %v5317_v34 = vmul.f32 %v5315_v38, %v11491_v14  ;;  %v5319_v42 = vmul.f32 %v5315_v38, %v11501_v44  ;;  %v10205_v14 = vld [vmem:[#allocation3 + $0xd04] ss:$8 sps:$4 sm:$0xff]   ;;  %v10203_v44 = vld [vmem:[#allocation3 + $0xd00] ss:$8 sps:$4 sm:$0xff]   ;;  %v10214_v38 = vld [vmem:[#allocation3 + $0xd34] ss:$8 sps:$4 sm:$0xff]  }
0x1363   :  { %v5389_v17 = vpop.f32.mrb[40].mxu0 }
0x1364   :  { %v5397_v18 = vrot.slane %v5389_v17, %v11073_v61  ;;  %v5391_v60 = vpop.f32.mrb[41].mxu0  ;;  %v10221_v17 = vld [vmem:[#allocation3 + $0xd60] ss:$8 sps:$4 sm:$0xff]  }
0x1365   :  { %v5401_v0 = vrot.slane %v5391_v60, %v11073_v61  ;;  %v10224_v60 = vld [vmem:[#allocation3 + $0xd70] ss:$8 sps:$4 sm:$0xff]  }
0x1366   :  { %v5402_v24 = vadd.f32 %v5397_v18, %v5316_v21  ;;  %v5404_v40 = vadd.f32 %v5397_v18, %v5318_v25  ;;  %v10217_v21 = vld [vmem:[#allocation3 + $0xd44] ss:$8 sps:$4 sm:$0xff]   ;;  %v10215_v25 = vld [vmem:[#allocation3 + $0xd40] ss:$8 sps:$4 sm:$0xff]   ;;  %v10226_v18 = vld [vmem:[#allocation3 + $0xd74] ss:$8 sps:$4 sm:$0xff]  }
0x1367   :  { %v5403_v43 = vadd.f32 %v5401_v0, %v5317_v34  ;;  %v5405_v16 = vadd.f32 %v5401_v0, %v5319_v42  ;;  %v10220_v34 = vld [vmem:[#allocation3 + $0xd54] ss:$8 sps:$4 sm:$0xff]   ;;  %v10218_v42 = vld [vmem:[#allocation3 + $0xd50] ss:$8 sps:$4 sm:$0xff]   ;;  %v10229_v0 = vld [vmem:[#allocation3 + $0xd84] ss:$8 sps:$4 sm:$0xff]  }
0x1368   :  { %v5406_v46 = vmax.f32 %v5402_v24, 0.0  ;;  %v5408_v47 = vmax.f32 %v5404_v40, 0.0  ;;  %v10227_v24 = vld [vmem:[#allocation3 + $0xd80] ss:$8 sps:$4 sm:$0xff]   ;;  %v10232_v40 = vld [vmem:[#allocation3 + $0xd94] ss:$8 sps:$4 sm:$0xff]  }
0x1369   :  { %v5407_v58 = vmax.f32 %v5403_v43, 0.0  ;;  %v5409_v63 = vmax.f32 %v5405_v16, 0.0  ;;  %v10230_v43 = vld [vmem:[#allocation3 + $0xd90] ss:$8 sps:$4 sm:$0xff]   ;;  %v10235_v16 = vld [vmem:[#allocation3 + $0xda4] ss:$8 sps:$4 sm:$0xff]  }
0x136a   :  { %v11647_v37 = vpack.c.bf16 %v5408_v47, %v5406_v46  ;;  %v10233_v46 = vld [vmem:[#allocation3 + $0xda0] ss:$8 sps:$4 sm:$0xff]   ;;  %v10238_v47 = vld [vmem:[#allocation3 + $0xdb4] ss:$8 sps:$4 sm:$0xff]  }
0x136b   :  { %v5411_v22 = vpack.c.bf16 %v5409_v63, %v5407_v58  ;;  %v10236_v58 = vld [vmem:[#allocation3 + $0xdb0] ss:$8 sps:$4 sm:$0xff]   ;;  %v10241_v63 = vld [vmem:[#allocation3 + $0xdc4] ss:$8 sps:$4 sm:$0xff]  }
0x136d   :  { %5412 = vmatprep.subr.bf16.mxu0 %v5411_v22 }
0x136e   :  { %5413 = vmatpush1.bf16.msra.mxu0 %v11647_v37 }
0x136f   :  { %5457 = vmatprep.subr.bf16.mxu0 %v5411_v22 }
0x1371   :  { %8408 = vmatmul.mubr.msk.bf16.vlgmr.msra.gmra.mrb[44].mxu0 %vm12180_vm9, %v10701_v23  ;;  %v10212_v23 = vld [vmem:[#allocation3 + $0xd30] ss:$8 sps:$4 sm:$0xff]   ;;  %vm12182_vm9 = vmmov %vm12181_vm1 }
0x1372   :  { %5458 = vmatpush1.bf16.msra.mxu0 %v11647_v37  ;;  %5489 = vmatprep.mubr.bf16.mxu0 %v10518_v1 }
0x1373   :  { %5728 = vmatprep.subr.bf16.mxu0 %v10205_v14  ;;  %v10244_v14 = vld [vmem:[#allocation3 + $0xdd4] ss:$8 sps:$4 sm:$0xff]  }
0x1379   :  { %8409 = vmatmul.mubr.msk.bf16.vlgmr.msra.gmra.mrb[48].mxu0 %vm12181_vm1, %v10708_v28  ;;  %v10223_v28 = vld [vmem:[#allocation3 + $0xd64] ss:$8 sps:$4 sm:$0xff]  }
0x137a   :  { %5729 = vmatpush1.bf16.msra.mxu0 %v10203_v44  ;;  %5760 = vmatprep.mubr.bf16.mxu0 %v5411_v22  ;;  %v10239_v22 = vld [vmem:[#allocation3 + $0xdc0] ss:$8 sps:$4 sm:$0xff]   ;;  %v10242_v44 = vld [vmem:[#allocation3 + $0xdd0] ss:$8 sps:$4 sm:$0xff]  }
0x137b   :  { %5730 = vmatprep.subr.bf16.mxu0 %v10208_v59  ;;  %v10247_v59 = vld [vmem:[#allocation3 + $0xde4] ss:$8 sps:$4 sm:$0xff]  }
0x137e   :  { %5731 = vmatpush1.bf16.msra.mxu0 %v10206_v7  ;;  %v10245_v7 = vld [vmem:[#allocation3 + $0xde0] ss:$8 sps:$4 sm:$0xff]  }
0x137f   :  { %5732 = vmatprep.subr.bf16.mxu0 %v10211_v31  ;;  %v10250_v31 = vld [vmem:[#allocation3 + $0xdf4] ss:$8 sps:$4 sm:$0xff]  }
0x1382   :  { %5733 = vmatpush1.bf16.msra.mxu0 %v10209_v36  ;;  %v10248_v36 = vld [vmem:[#allocation3 + $0xdf0] ss:$8 sps:$4 sm:$0xff]  }
0x1383   :  { %5734 = vmatprep.subr.bf16.mxu0 %v10214_v38  ;;  %v10253_v38 = vld [vmem:[#allocation3 + $0xc04] ss:$8 sps:$4 sm:$0xff]  }
0x1386   :  { %5735 = vmatpush1.bf16.msra.mxu0 %v10212_v23  ;;  %v10251_v23 = vld [vmem:[#allocation3 + $0xc00] ss:$8 sps:$4 sm:$0xff]  }
0x1387   :  { %5736 = vmatprep.subr.bf16.mxu0 %v10217_v21  ;;  %v10256_v21 = vld [vmem:[#allocation3 + $0xc14] ss:$8 sps:$4 sm:$0xff]  }
0x138a   :  { %5737 = vmatpush1.bf16.msra.mxu0 %v10215_v25  ;;  %v10254_v25 = vld [vmem:[#allocation3 + $0xc10] ss:$8 sps:$4 sm:$0xff]  }
0x138b   :  { %5738 = vmatprep.subr.bf16.mxu0 %v10220_v34  ;;  %v10259_v34 = vld [vmem:[#allocation3 + $0xc24] ss:$8 sps:$4 sm:$0xff]  }
0x138e   :  { %5739 = vmatpush1.bf16.msra.mxu0 %v10218_v42  ;;  %v10257_v42 = vld [vmem:[#allocation3 + $0xc20] ss:$8 sps:$4 sm:$0xff]  }
0x138f   :  { %5740 = vmatprep.subr.bf16.mxu0 %v10223_v28  ;;  %v10262_v28 = vld [vmem:[#allocation3 + $0xc34] ss:$8 sps:$4 sm:$0xff]  }
0x1392   :  { %5741 = vmatpush1.bf16.msra.mxu0 %v10221_v17  ;;  %v10260_v17 = vld [vmem:[#allocation3 + $0xc30] ss:$8 sps:$4 sm:$0xff]  }
0x1393   :  { %5742 = vmatprep.subr.bf16.mxu0 %v10226_v18  ;;  %v10265_v18 = vld [vmem:[#allocation3 + $0xc44] ss:$8 sps:$4 sm:$0xff]  }
0x1396   :  { %5743 = vmatpush1.bf16.msra.mxu0 %v10224_v60  ;;  %v10263_v60 = vld [vmem:[#allocation3 + $0xc40] ss:$8 sps:$4 sm:$0xff]  }
0x1397   :  { %5744 = vmatprep.subr.bf16.mxu0 %v10229_v0  ;;  %v10268_v0 = vld [vmem:[#allocation3 + $0xc54] ss:$8 sps:$4 sm:$0xff]  }
0x139a   :  { %5745 = vmatpush1.bf16.msra.mxu0 %v10227_v24  ;;  %v10266_v24 = vld [vmem:[#allocation3 + $0xc50] ss:$8 sps:$4 sm:$0xff]  }
0x139b   :  { %5746 = vmatprep.subr.bf16.mxu0 %v10232_v40  ;;  %v10269_v40 = vld [vmem:[#allocation3 + $0xc60] ss:$8 sps:$4 sm:$0xff]  }
0x139e   :  { %5747 = vmatpush1.bf16.msra.mxu0 %v10230_v43  ;;  %v10274_v43 = vld [vmem:[#allocation3 + $0xc74] ss:$8 sps:$4 sm:$0xff]  }
0x139f   :  { %5748 = vmatprep.subr.bf16.mxu0 %v10235_v16  ;;  %v10272_v16 = vld [vmem:[#allocation3 + $0xc70] ss:$8 sps:$4 sm:$0xff]  }
0x13a2   :  { %5749 = vmatpush1.bf16.msra.mxu0 %v10233_v46  ;;  %v10277_v46 = vld [vmem:[#allocation3 + $0xc84] ss:$8 sps:$4 sm:$0xff]  }
0x13a3   :  { %5750 = vmatprep.subr.bf16.mxu0 %v10238_v47  ;;  %v10275_v47 = vld [vmem:[#allocation3 + $0xc80] ss:$8 sps:$4 sm:$0xff]  }
0x13a6   :  { %5751 = vmatpush1.bf16.msra.mxu0 %v10236_v58  ;;  %v10280_v58 = vld [vmem:[#allocation3 + $0xc94] ss:$8 sps:$4 sm:$0xff]  }
0x13a7   :  { %5752 = vmatprep.subr.bf16.mxu0 %v10241_v63  ;;  %v10278_v63 = vld [vmem:[#allocation3 + $0xc90] ss:$8 sps:$4 sm:$0xff]  }
0x13aa   :  { %5753 = vmatpush1.bf16.msra.mxu0 %v10239_v22  ;;  %v10283_v22 = vld [vmem:[#allocation3 + $0xca4] ss:$8 sps:$4 sm:$0xff]  }
0x13ab   :  { %5754 = vmatprep.subr.bf16.mxu0 %v10244_v14  ;;  %v10281_v14 = vld [vmem:[#allocation3 + $0xca0] ss:$8 sps:$4 sm:$0xff]  }
0x13ae   :  { %5755 = vmatpush1.bf16.msra.mxu0 %v10242_v44  ;;  %v10286_v44 = vld [vmem:[#allocation3 + $0xcb4] ss:$8 sps:$4 sm:$0xff]  }
0x13af   :  { %5756 = vmatprep.subr.bf16.mxu0 %v10247_v59  ;;  %v10284_v59 = vld [vmem:[#allocation3 + $0xcb0] ss:$8 sps:$4 sm:$0xff]  }
0x13b2   :  { %5757 = vmatpush1.bf16.msra.mxu0 %v10245_v7  ;;  %v10289_v7 = vld [vmem:[#allocation3 + $0xcc4] ss:$8 sps:$4 sm:$0xff]  }
0x13b3   :  { %5758 = vmatprep.subr.bf16.mxu0 %v10250_v31  ;;  %v10287_v31 = vld [vmem:[#allocation3 + $0xcc0] ss:$8 sps:$4 sm:$0xff]  }
0x13b6   :  { %5759 = vmatpush1.bf16.msra.mxu0 %v10248_v36  ;;  %v10292_v36 = vld [vmem:[#allocation3 + $0xcd4] ss:$8 sps:$4 sm:$0xff]  }
0x13b7   :  { %5931 = vmatprep.subr.bf16.mxu0 %v10253_v38  ;;  %v10290_v38 = vld [vmem:[#allocation3 + $0xcd0] ss:$8 sps:$4 sm:$0xff]  }
0x13b9   :  { %5761 = vmatmul.mubr.bf16.vlgmr.msra.gmra.mrb[52].mxu0 %v11647_v37  ;;  %v10271_v37 = vld [vmem:[#allocation3 + $0xc64] ss:$8 sps:$4 sm:$0xff]  }
0x13ba   :  { %5932 = vmatpush1.bf16.msra.mxu0 %v10251_v23  ;;  %v10295_v23 = vld [vmem:[#allocation3 + $0xce4] ss:$8 sps:$4 sm:$0xff]  }
0x13bb   :  { %5933 = vmatprep.subr.bf16.mxu0 %v10256_v21  ;;  %v10293_v21 = vld [vmem:[#allocation3 + $0xce0] ss:$8 sps:$4 sm:$0xff]  }
0x13be   :  { %5934 = vmatpush1.bf16.msra.mxu0 %v10254_v25  ;;  %v10298_v25 = vld [vmem:[#allocation3 + $0xcf4] ss:$8 sps:$4 sm:$0xff]  }
0x13bf   :  { %5935 = vmatprep.subr.bf16.mxu0 %v10259_v34  ;;  %v10296_v34 = vld [vmem:[#allocation3 + $0xcf0] ss:$8 sps:$4 sm:$0xff]  }
0x13c2   :  { %5936 = vmatpush1.bf16.msra.mxu0 %v10257_v42  ;;  %v10301_v42 = vld [vmem:[#allocation3 + $0xe04] ss:$8 sps:$4 sm:$0xff]  }
0x13c3   :  { %5937 = vmatprep.subr.bf16.mxu0 %v10262_v28 }
0x13c6   :  { %5938 = vmatpush1.bf16.msra.mxu0 %v10260_v17 }
0x13c7   :  { %5939 = vmatprep.subr.bf16.mxu0 %v10265_v18 }
0x13ca   :  { %5940 = vmatpush1.bf16.msra.mxu0 %v10263_v60 }
0x13cb   :  { %5941 = vmatprep.subr.bf16.mxu0 %v10268_v0 }
0x13ce   :  { %5942 = vmatpush1.bf16.msra.mxu0 %v10266_v24 }
0x13cf   :  { %5943 = vmatprep.subr.bf16.mxu0 %v10271_v37  ;;  %v10299_v37 = vld [vmem:[#allocation3 + $0xe00] ss:$8 sps:$4 sm:$0xff]  }
0x13d2   :  { %5944 = vmatpush1.bf16.msra.mxu0 %v10269_v40  ;;  %v10304_v40 = vld [vmem:[#allocation3 + $0xe14] ss:$8 sps:$4 sm:$0xff]  }
0x13d3   :  { %5945 = vmatprep.subr.bf16.mxu0 %v10274_v43  ;;  %v10302_v43 = vld [vmem:[#allocation3 + $0xe10] ss:$8 sps:$4 sm:$0xff]  }
0x13d6   :  { %5946 = vmatpush1.bf16.msra.mxu0 %v10272_v16 }
0x13d7   :  { %5947 = vmatprep.subr.bf16.mxu0 %v10277_v46  ;;  %v10307_v46 = vld [vmem:[#allocation3 + $0xe24] ss:$8 sps:$4 sm:$0xff]  }
0x13da   :  { %5948 = vmatpush1.bf16.msra.mxu0 %v10275_v47 }
0x13db   :  { %5949 = vmatprep.subr.bf16.mxu0 %v10280_v58 }
0x13de   :  { %5950 = vmatpush1.bf16.msra.mxu0 %v10278_v63 }
0x13df   :  { %5951 = vmatprep.subr.bf16.mxu0 %v10283_v22 }
0x13e2   :  { %5952 = vmatpush1.bf16.msra.mxu0 %v10281_v14  ;;  %v10305_v14 = vld [vmem:[#allocation3 + $0xe20] ss:$8 sps:$4 sm:$0xff]  }
0x13e3   :  { %5953 = vmatprep.subr.bf16.mxu0 %v10286_v44 }
0x13e6   :  { %5954 = vmatpush1.bf16.msra.mxu0 %v10284_v59  ;;  %v10310_v59 = vld [vmem:[#allocation3 + $0xe34] ss:$8 sps:$4 sm:$0xff]  }
0x13e7   :  { %5955 = vmatprep.subr.bf16.mxu0 %v10289_v7  ;;  %v10308_v7 = vld [vmem:[#allocation3 + $0xe30] ss:$8 sps:$4 sm:$0xff]  }
0x13ea   :  { %5956 = vmatpush1.bf16.msra.mxu0 %v10287_v31  ;;  %v10313_v31 = vld [vmem:[#allocation3 + $0xe44] ss:$8 sps:$4 sm:$0xff]  }
0x13eb   :  { %5957 = vmatprep.subr.bf16.mxu0 %v10292_v36  ;;  %v10311_v36 = vld [vmem:[#allocation3 + $0xe40] ss:$8 sps:$4 sm:$0xff]  }
0x13ee   :  { %5958 = vmatpush1.bf16.msra.mxu0 %v10290_v38  ;;  %v10316_v38 = vld [vmem:[#allocation3 + $0xe54] ss:$8 sps:$4 sm:$0xff]  }
0x13ef   :  { %5959 = vmatprep.subr.bf16.mxu0 %v10295_v23  ;;  %v10314_v23 = vld [vmem:[#allocation3 + $0xe50] ss:$8 sps:$4 sm:$0xff]  }
0x13f2   :  { %5960 = vmatpush1.bf16.msra.mxu0 %v10293_v21  ;;  %v10319_v21 = vld [vmem:[#allocation3 + $0xe64] ss:$8 sps:$4 sm:$0xff]  }
0x13f3   :  { %5961 = vmatprep.subr.bf16.mxu0 %v10298_v25  ;;  %v10317_v25 = vld [vmem:[#allocation3 + $0xe60] ss:$8 sps:$4 sm:$0xff]  }
0x13f6   :  { %5962 = vmatpush1.bf16.msra.mxu0 %v10296_v34  ;;  %v10322_v34 = vld [vmem:[#allocation3 + $0xe74] ss:$8 sps:$4 sm:$0xff]  }
0x13f7   :  { %6167 = vmatprep.subr.bf16.mxu0 %v10301_v42  ;;  %v10320_v42 = vld [vmem:[#allocation3 + $0xe70] ss:$8 sps:$4 sm:$0xff]  }
0x1444   :  { %v5446_v28 = vpop.f32.mrb[44].mxu0 }
0x1445   :  { %v5448_v17 = vpop.f32.mrb[45].mxu0 }
0x1446   :  { %v5450_v18 = vpop.f32.mrb[46].mxu0 }
0x1447   :  { %v5455_v60 = vpack.c.bf16 %v5450_v18, %v5446_v28  ;;  %v5452_v0 = vpop.f32.mrb[47].mxu0  ;;  %v10325_v28 = vld [vmem:[#allocation3 + $0xe84] ss:$8 sps:$4 sm:$0xff]   ;;  %v10328_v18 = vld [vmem:[#allocation3 + $0xe94] ss:$8 sps:$4 sm:$0xff]  }
0x1448   :  { %v5456_v24 = vpack.c.bf16 %v5452_v0, %v5448_v17  ;;  %v10323_v17 = vld [vmem:[#allocation3 + $0xe80] ss:$8 sps:$4 sm:$0xff]   ;;  %v10331_v0 = vld [vmem:[#allocation3 + $0xea4] ss:$8 sps:$4 sm:$0xff]  }
0x144a   :  { %5963 = vmatprep.mubr.bf16.mxu0 %v5456_v24  ;;  %v10329_v24 = vld [vmem:[#allocation3 + $0xea0] ss:$8 sps:$4 sm:$0xff]  }
0x144b   :  { %5964 = vmatmul.mubr.bf16.vlgmr.msra.gmra.mrb[52].mxu0 %v5455_v60  ;;  %v10326_v60 = vld [vmem:[#allocation3 + $0xe90] ss:$8 sps:$4 sm:$0xff]  }
0x144c   :  { %6168 = vmatpush1.bf16.msra.mxu0 %v10299_v37  ;;  %v11657_v16 = vpop.f32.mrb[48].mxu0  ;;  %v10334_v37 = vld [vmem:[#allocation3 + $0xeb4] ss:$8 sps:$4 sm:$0xff]  }
0x144d   :  { %6169 = vmatprep.subr.bf16.mxu0 %v10304_v40  ;;  %v5493_v47 = vpop.f32.mrb[49].mxu0  ;;  %v10332_v40 = vld [vmem:[#allocation3 + $0xeb0] ss:$8 sps:$4 sm:$0xff]  }
0x144e   :  { %v5495_v58 = vpop.f32.mrb[50].mxu0 }
0x144f   :  { %v5500_v63 = vpack.c.bf16 %v5495_v58, %v11657_v16  ;;  %v5497_v22 = vpop.f32.mrb[51].mxu0  ;;  %v10335_v16 = vld [vmem:[#allocation3 + $0xec0] ss:$8 sps:$4 sm:$0xff]   ;;  %v10343_v58 = vld [vmem:[#allocation3 + $0xee4] ss:$8 sps:$4 sm:$0xff]  }
0x1450   :  { %6170 = vmatpush1.bf16.msra.mxu0 %v10302_v43  ;;  %v5501_v44 = vpack.c.bf16 %v5497_v22, %v5493_v47  ;;  %v10337_v43 = vld [vmem:[#allocation3 + $0xec4] ss:$8 sps:$4 sm:$0xff]   ;;  %v10338_v47 = vld [vmem:[#allocation3 + $0xed0] ss:$8 sps:$4 sm:$0xff]   ;;  %v10341_v22 = vld [vmem:[#allocation3 + $0xee0] ss:$8 sps:$4 sm:$0xff]  }
0x1451   :  { %6171 = vmatprep.subr.bf16.mxu0 %v10307_v46  ;;  %v10340_v46 = vld [vmem:[#allocation3 + $0xed4] ss:$8 sps:$4 sm:$0xff]  }
0x1452   :  { %6199 = vmatprep.mubr.bf16.mxu0 %v5501_v44  ;;  %v10344_v44 = vld [vmem:[#allocation3 + $0xef0] ss:$8 sps:$4 sm:$0xff]  }
0x1454   :  { %6172 = vmatpush1.bf16.msra.mxu0 %v10305_v14  ;;  %v10346_v14 = vld [vmem:[#allocation3 + $0xef4] ss:$8 sps:$4 sm:$0xff]  }
0x1455   :  { %6173 = vmatprep.subr.bf16.mxu0 %v10310_v59 }
0x1458   :  { %6174 = vmatpush1.bf16.msra.mxu0 %v10308_v7 }
0x1459   :  { %6175 = vmatprep.subr.bf16.mxu0 %v10313_v31 }
0x145c   :  { %6176 = vmatpush1.bf16.msra.mxu0 %v10311_v36 }
0x145d   :  { %6177 = vmatprep.subr.bf16.mxu0 %v10316_v38 }
0x1460   :  { %6178 = vmatpush1.bf16.msra.mxu0 %v10314_v23 }
0x1461   :  { %6179 = vmatprep.subr.bf16.mxu0 %v10319_v21 }
0x1464   :  { %6180 = vmatpush1.bf16.msra.mxu0 %v10317_v25 }
0x1465   :  { %6181 = vmatprep.subr.bf16.mxu0 %v10322_v34 }
0x1468   :  { %6182 = vmatpush1.bf16.msra.mxu0 %v10320_v42 }
0x1469   :  { %6183 = vmatprep.subr.bf16.mxu0 %v10325_v28 }
0x146c   :  { %6184 = vmatpush1.bf16.msra.mxu0 %v10323_v17 }
0x146d   :  { %6185 = vmatprep.subr.bf16.mxu0 %v10328_v18 }
0x1470   :  { %6186 = vmatpush1.bf16.msra.mxu0 %v10326_v60 }
0x1471   :  { %6187 = vmatprep.subr.bf16.mxu0 %v10331_v0 }
0x1474   :  { %6188 = vmatpush1.bf16.msra.mxu0 %v10329_v24  ;;  %v6215_v24 = vld [vmem:[#allocation5 + $0x9] sm:$0x1] }
0x1475   :  { %6189 = vmatprep.subr.bf16.mxu0 %v10334_v37 }
0x1478   :  { %6190 = vmatpush1.bf16.msra.mxu0 %v10332_v40  ;;  %v10350_v40 = vld [vmem:[%s12006_s3 + $0x8] sm:$0xff]  }
0x1479   :  { %6191 = vmatprep.subr.bf16.mxu0 %v10337_v43  ;;  %v10352_v43 = vld [vmem:[%s12006_s3 + $0x10] sm:$0xff]  }
0x147c   :  { %6192 = vmatpush1.bf16.msra.mxu0 %v10335_v16  ;;  %v10353_v16 = vld [vmem:[%s12006_s3 + $0x58] sm:$0xff]  }
0x147d   :  { %6193 = vmatprep.subr.bf16.mxu0 %v10340_v46  ;;  %v10354_v46 = vld [vmem:[%s12006_s3 + $0x18] sm:$0xff]  }
0x1480   :  { %6194 = vmatpush1.bf16.msra.mxu0 %v10338_v47  ;;  %v10355_v47 = vld [vmem:[%s12006_s3 + $0x60] sm:$0xff]  }
0x1481   :  { %6195 = vmatprep.subr.bf16.mxu0 %v10343_v58  ;;  %v10356_v58 = vld [vmem:[%s12006_s3 + $0x20] sm:$0xff]  }
0x1484   :  { %6196 = vmatpush1.bf16.msra.mxu0 %v10341_v22  ;;  %v10357_v22 = vld [vmem:[%s12006_s3 + $0x68] sm:$0xff]  }
0x1485   :  { %6197 = vmatprep.subr.bf16.mxu0 %v10346_v14  ;;  %v10358_v14 = vld [vmem:[%s12006_s3 + $0x28] sm:$0xff]  }
0x1488   :  { %6198 = vmatpush1.bf16.msra.mxu0 %v10344_v44  ;;  %v10359_v44 = vld [vmem:[%s12006_s3 + $0x70] sm:$0xff]  }
0x148b   :  { %6200 = vmatmul.mubr.bf16.vlgmr.msra.gmra.mrb[52].mxu0 %v5500_v63 }
0x155e   :  { %v11660_v59 = vpop.f32.mrb[52].mxu0 }
0x155f   :  { %v11662_v7 = vpop.f32.mrb[53].mxu0  ;;  %v6216_v36 = vmul.f32 %v11660_v59, %v11660_v59 }
0x1560   :  { %v11664_v31 = vpop.f32.mrb[54].mxu0  ;;  %v6217_v63 = vmul.f32 %v11662_v7, %v11662_v7 }
0x1561   :  { %v6218_v38 = vmul.f32 %v11664_v31, %v11664_v31  ;;  %v9451_v23 = vpack.c.bf16 %v11664_v31, %v11660_v59  ;;  %v11672_v21 = vpop.f32.mrb[55].mxu0 }
0x1562   :  { %v6219_v25 = vmul.f32 %v11672_v21, %v11672_v21  ;;  %v9449_v34 = vpack.c.bf16 %v11672_v21, %v11662_v7 }
0x1563   :  { %v9455_v42 = vpack.c.bf16 %v6218_v38, %v6216_v36  ;;  %v10360_v36 = vld [vmem:[%s12006_s3 + $0x30] sm:$0xff]   ;;  %v10361_v38 = vld [vmem:[%s12006_s3 + $0x78] sm:$0xff]  }
0x1564   :  { %9450 = vmatprep.subr.bf16.mxu1 %v9449_v34  ;;  %v9453_v28 = vpack.c.bf16 %v6219_v25, %v6217_v63 }
0x1565   :  { %9452 = vmatpush1.bf16.msra.mxu1 %v9451_v23  ;;  %v10362_v23 = vld [vmem:[%s12006_s3 + $0x38] sm:$0xff]  }
0x1566   :  { %9454 = vmatprep.subr.bf16.mxu1 %v9453_v28 }
0x1568   :  { %8506 = vmatmul.mubr.msk.f32.vlgmr.msra.gmra.mrb[42].mxu1 %vm12182_vm9, %v10520_v53  ;;  %vm12183_vm9 = vnez %v12108_v55 }
0x1569   :  { %9456 = vmatpush1.bf16.msra.mxu1 %v9455_v42  ;;  %6355 = vmatprep.mubr.f32.mxu1 %v10519_v19 }
0x156a   :  { %9458 = vmatprep.subr.msk.bf16.mxu1 %vm10766_vm15, %v10521_v56 }
0x156c   :  { %8507 = vmatmul.mubr.msk.f32.vlgmr.msra.gmra.mrb[56].mxu1 %vm12181_vm1, %v10520_v53  ;;  %vm12184_vm1 = vnez %v12112_v6  ;;  %v6214_v6 = vld [vmem:[#allocation5 + $0x8] sm:$0x1] }
0x156d   :  { %9460 = vmatpush3.bf16.msk.msra.mxu1 %vm10782_vm4, %v10521_v56 }
0x156e   :  { %9462 = vmatprep.subr.msk.bf16.mxu1 %vm10796_vm7, %v10521_v56 }
0x1571   :  { %9464 = vmatpush3.bf16.msk.msra.mxu1 %vm10826_vm10, %v10521_v56 }
0x1572   :  { %9466 = vmatprep.subr.msk.bf16.mxu1 %vm10842_vm14, %v10521_v56 }
0x1575   :  { %9468 = vmatpush3.bf16.msk.msra.mxu1 %vm12119_vm2, %v10521_v56 }
0x1576   :  { %9470 = vmatprep.subr.msk.bf16.mxu1 %vm12136_vm13, %v10521_v56 }
0x1579   :  { %9472 = vmatpush3.bf16.msk.msra.mxu1 %vm12137_vm8, %v10521_v56 }
0x157a   :  { %9474 = vmatprep.subr.msk.bf16.mxu1 %vm12138_vm12, %v10521_v56 }
0x157d   :  { %9476 = vmatpush3.bf16.msk.msra.mxu1 %vm12139_vm5, %v10521_v56 }
0x157e   :  { %9478 = vmatprep.subr.msk.bf16.mxu1 %vm12183_vm9, %v10521_v56 }
0x1581   :  { %9480 = vmatpush3.bf16.msk.msra.mxu1 %vm12141_vm11, %v10521_v56 }
0x1582   :  { %9482 = vmatprep.subr.msk.bf16.mxu1 %vm12184_vm1, %v10521_v56 }
0x1585   :  { %9484 = vmatpush3.bf16.msk.msra.mxu1 %vm12185_vm6, %v10521_v56 }
0x1586   :  { %9486 = vmatprep.subr.msk.bf16.mxu1 %vm12186_vm0, %v10521_v56 }
0x1589   :  { %9488 = vmatpush3.bf16.msk.msra.mxu1 %vm12187_vm3, %v10521_v56 }
0x158a   :  { %9490 = vmatprep.subr.msk.bf16.mxu1 %vm10766_vm15, %v10521_v56  ;;  %vm12188_vm15 = vnez %v12125_v26  ;;  %v10347_v26 = vld [vmem:[%s12006_s3 + $0x40] sm:$0xff]  }
0x163b   :  { %v6286_v17 = vpop.f32.mrb[42].mxu1 }
0x163c   :  { %v6288_v18 = vpop.f32.mrb[43].mxu1 }
0x163d   :  { %6426 = vmatprep.mubr.f32.mxu1 %v6288_v18 }
0x163e   :  { %6427 = vmatmul.mubr.f32.vlgmr.msra.gmra.mrb[58].mxu1 %v6286_v17 }
0x163f   :  { %9492 = vmatpush3.bf16.msk.msra.mxu1 %vm10782_vm4, %v10521_v56  ;;  %v6357_v60 = vpop.f32.mrb[56].mxu1  ;;  %vm12189_vm4 = vnez %v12127_v29  ;;  %v10348_v29 = vld [vmem:[%s12006_s3] sm:$0xff]  }
0x1640   :  { %9494 = vmatprep.subr.msk.bf16.mxu1 %vm10796_vm7, %v10521_v56  ;;  %v6359_v0 = vpop.f32.mrb[57].mxu1  ;;  %vm12190_vm7 = vnez %v12129_v30  ;;  %v10349_v30 = vld [vmem:[%s12006_s3 + $0x48] sm:$0xff]  }
0x1641   :  { %6496 = vmatprep.mubr.f32.mxu1 %v6359_v0 }
0x1643   :  { %9496 = vmatpush3.bf16.msk.msra.mxu1 %vm10826_vm10, %v10521_v56  ;;  %vm12191_vm10 = vnez %v12131_v39  ;;  %v10351_v39 = vld [vmem:[%s12006_s3 + $0x50] sm:$0xff]   ;;  %s10524_s3 = smov 24  }
0x1644   :  { %9498 = vmatprep.subr.msk.bf16.mxu1 %vm10842_vm14, %v10521_v56  ;;  %vm12192_vm14 = vcmask 261120  }
0x1647   :  { %9500 = vmatpush3.bf16.msk.msra.mxu1 %vm12119_vm2, %v10521_v56  ;;  %vm12193_vm2 = vmmov %vm12192_vm14 }
0x1648   :  { %9502 = vmatprep.subr.msk.bf16.mxu1 %vm12136_vm13, %v10521_v56 }
0x164b   :  { %9504 = vmatpush3.bf16.msk.msra.mxu1 %vm12137_vm8, %v10521_v56 }
0x164c   :  { %9506 = vmatprep.subr.msk.bf16.mxu1 %vm12138_vm12, %v10521_v56 }
0x164f   :  { %9508 = vmatpush3.bf16.msk.msra.mxu1 %vm12139_vm5, %v10521_v56 }
0x1650   :  { %9510 = vmatprep.subr.msk.bf16.mxu1 %vm12183_vm9, %v10521_v56 }
0x1653   :  { %9512 = vmatpush3.bf16.msk.msra.mxu1 %vm12141_vm11, %v10521_v56  ;;  %vm12194_vm11 = vcmask 130048  }
0x1654   :  { %9514 = vmatprep.subr.msk.bf16.mxu1 %vm12184_vm1, %v10521_v56  ;;  %vm7105_vm1 = vcmask 23552  }
0x1657   :  { %9516 = vmatpush3.bf16.msk.msra.mxu1 %vm12185_vm6, %v10521_v56  ;;  %vm10523_vm6 = vmmov 0  }
0x1658   :  { %9518 = vmatprep.subr.msk.bf16.mxu1 %vm12186_vm0, %v10521_v56  ;;  %9094 = vmatprep.mubr.msk.f32.mxu0 %vm10523_vm6, %v10519_v19  ;;  %vm6875_vm0 = vcmask 195584  }
0x165b   :  { %9520 = vmatpush3.bf16.msk.msra.mxu1 %vm12187_vm3, %v10521_v56  ;;  %vm7109_vm3 = vcmask 1042432  }
0x165c   :  { %9522 = vmatprep.subr.msk.bf16.mxu1 %vm12188_vm15, %v10521_v56 }
0x165e   :  { %6497 = vmatmul.mubr.f32.vlgmr.msra.gmra.mrb[60].mxu1 %v6357_v60 }
0x165f   :  { %9524 = vmatpush1.bf16.msk.msra.mxu1 %vm12189_vm4, %v10521_v56  ;;  %6579 = vmatprep.mubr.f32.mxu1 %v10519_v19 }
0x1660   :  { %9526 = vmatprep.subr.msk.bf16.mxu1 %vm12190_vm7, %v10521_v56 }
0x1663   :  { %9528 = vmatpush1.bf16.msk.msra.mxu1 %vm12191_vm10, %v10521_v56 }
0x1664   :  { %9530 = vmatprep.subr.msk.bf16.mxu1 %vm12188_vm15, %v10521_v56  ;;  %vm7270_vm15 = vcmask 188416  }
0x1711   :  { %v8956_v50 = vpop.f32.mrb[58].mxu1 }
0x1712   :  { %v8957_v57 = vpop.f32.mrb[59].mxu1 }
0x1713   :  { %v8958_v62 = vadd.f32 %v8957_v57, %v8956_v50 }
0x1715   :  { %v6502_v11 = vmul.f32 0.0078125, %v8958_v62 }
0x1717   :  { %v6504_v41 = vmul.f32 %v6502_v11, %v6502_v11 }
0x1731   :  { %v8991_v15 = vpop.f32.mrb[60].mxu1 }
0x1732   :  { %v8992_v27 = vpop.f32.mrb[61].mxu1 }
0x1733   :  { %v8993_v33 = vadd.f32 %v8992_v27, %v8991_v15 }
0x1735   :  { %v6503_v45 = vmul.f32 0.0078125, %v8993_v33 }
0x1737   :  { %v6505_v54 = vsub.f32 %v6503_v45, %v6504_v41 }
0x1739   :  { %v6506_v55 = vmax.f32 %v6505_v54, 0.0 }
0x173b   :  { %v6507_v5 = vadd.f32 1e-05, %v6506_v55 }
0x173d   :  { %10383 = vrsqrt.f32 %v6507_v5 }
0x1747   :  { %v10384_v9 = vpop.eup %10383 }
0x1748   :  { %v6509_v10 = vmul.f32 %v10384_v9, %v6214_v6 }
0x174a   :  { %8580 = vmatmul.mubr.msk.f32.vlgmr.msra.gmra.mrb[62].mxu1 %vm12192_vm14, %v6509_v10  ;;  %v6510_v12 = vmul.f32 %v6509_v10, %v6502_v11  ;;  %vm7321_vm14 = vcmask 1041344  }
0x174b   :  { %9532 = vmatpush1.bf16.msk.msra.mxu1 %vm12189_vm4, %v10521_v56  ;;  %6665 = vmatprep.mubr.f32.mxu1 %v10519_v19  ;;  %vm7285_vm4 = vcmask 385216  }
0x174c   :  { %9534 = vmatprep.subr.msk.bf16.mxu1 %vm12190_vm7, %v10521_v56  ;;  %v6511_v37 = vsub.f32 %v6215_v24, %v6510_v12  ;;  %vm7291_vm7 = vcmask 582016  }
0x174f   :  { %9536 = vmatpush1.bf16.msk.msra.mxu1 %vm12191_vm10, %v10521_v56  ;;  %vm7298_vm10 = vcmask 778816  }
0x1750   :  { %8994 = vmatprep.subr.bf16.mxu1 %v10347_v26 }
0x1752   :  { %8589 = vmatmul.mubr.msk.f32.vlgmr.msra.gmra.mrb[64].mxu1 %vm12193_vm2, %v6511_v37  ;;  %vm7322_vm2 = vcmask 124930  }
0x1753   :  { %8995 = vmatpush3.bf16.msra.mxu1 %v10348_v29 }
0x1754   :  { %8996 = vmatprep.subr.bf16.mxu1 %v10349_v30 }
0x1757   :  { %8997 = vmatpush3.bf16.msra.mxu1 %v10350_v40  ;;  %v268_v40 = vshra.s32 %v10655_v2, 3 }
0x1758   :  { %8998 = vmatprep.subr.bf16.mxu1 %v10351_v39  ;;  %v269_v39 = vshra.s32 %v10660_v4, 3 }
0x1759   :  { %vm271_vm13 = vcmp.eq.s32.totalorder %v268_v40, %v10657_v3 }
0x175a   :  { %vm272_vm8 = vcmp.eq.s32.totalorder %v269_v39, %v10657_v3 }
0x175b   :  { %8999 = vmatpush3.bf16.msra.mxu1 %v10352_v43  ;;  %vm9541_vm12 = vmpackc.low %vm272_vm8, %vm271_vm13  ;;  %v270_v43 = vshra.s32 %v10747_v35, 3  ;;  %vm7329_vm13 = vcmask 319616   ;;  %vm7336_vm8 = vcmask 516416  }
0x175c   :  { %9000 = vmatprep.subr.bf16.mxu1 %v10353_v16 }
0x175d   :  { %vm273_vm5 = vcmp.eq.s32.totalorder %v270_v43, %v10657_v3  ;;  %v10372_v43 = vld [vmem:[#allocation8 + $0x48] sm:$0xff]  }
0x175f   :  { %9001 = vmatpush3.bf16.msra.mxu1 %v10354_v46  ;;  %v277_v46 = vshra.s32 %v10657_v3, 3  ;;  %v6863_v3 = vld [vmem:[#allocation7] sm:$0x1] }
0x1760   :  { %9002 = vmatprep.subr.bf16.mxu1 %v10355_v47 }
0x1761   :  { %vm278_vm9 = vcmp.eq.s32.totalorder %v277_v46, %v10655_v2 }
0x1763   :  { %9003 = vmatpush3.bf16.msra.mxu1 %v10356_v58 }
0x1764   :  { %9004 = vmatprep.subr.bf16.mxu1 %v10357_v22 }
0x1767   :  { %9005 = vmatpush3.bf16.msra.mxu1 %v10358_v14 }
0x1768   :  { %9006 = vmatprep.subr.bf16.mxu1 %v10359_v44 }
0x176b   :  { %9007 = vmatpush3.bf16.msra.mxu1 %v10360_v36 }
0x176c   :  { %9008 = vmatprep.subr.bf16.mxu1 %v10361_v38 }
0x176f   :  { %9009 = vmatpush3.bf16.msra.mxu1 %v10362_v23 }
0x181d   :  { %v6581_v63 = vpop.f32.mrb[62].mxu1 }
0x181e   :  { %v6589_v25 = vrot.slane %v6581_v63, %v11073_v61  ;;  %v6583_v34 = vpop.f32.mrb[63].mxu1 }
0x181f   :  { %v6593_v42 = vrot.slane %v6583_v34, %v11073_v61 }
0x1820   :  { %v6594_v28 = vmul.f32 %v6589_v25, %v11660_v59  ;;  %v6596_v17 = vmul.f32 %v6589_v25, %v11664_v31 }
0x1821   :  { %v6595_v18 = vmul.f32 %v6593_v42, %v11662_v7  ;;  %v6597_v60 = vmul.f32 %v6593_v42, %v11672_v21  ;;  %v6864_v42 = vld [vmem:[#allocation7 + $0x1] sm:$0x1] }
0x1825   :  { %v6667_v0 = vpop.f32.mrb[64].mxu1 }
0x1826   :  { %v6675_v50 = vrot.slane %v6667_v0, %v11073_v61  ;;  %v6669_v57 = vpop.f32.mrb[65].mxu1  ;;  %v10526_v0 = vmov 1983009808  }
0x1827   :  { %v6679_v62 = vrot.slane %v6669_v57, %v11073_v61 }
0x1828   :  { %v6680_v11 = vadd.f32 %v6675_v50, %v6594_v28  ;;  %v6682_v15 = vadd.f32 %v6675_v50, %v6596_v17  ;;  %v7274_v50 = vunpack.c.l.s4 %v10526_v0 }
0x1829   :  { %v6681_v27 = vadd.f32 %v6679_v62, %v6595_v18  ;;  %v6683_v33 = vadd.f32 %v6679_v62, %v6597_v60  ;;  %v10363_v18 = vld [vmem:[#allocation8] sm:$0xff]   ;;  %v10364_v60 = vld [vmem:[#allocation8 + $0x8] sm:$0xff]  }
0x182a   :  { %v6684_v41 = vadd.f32 %v6680_v11, %v4128_v8  ;;  %v6686_v59 = vadd.f32 %v6682_v15, %v4130_v48  ;;  %v10522_v8 = vmov 0.0|0.0   ;;  %v10365_v15 = vld [vmem:[#allocation8 + $0x10] sm:$0xff]  }
0x182b   :  { %v6685_v7 = vadd.f32 %v6681_v27, %v4129_v32  ;;  %v6687_v31 = vadd.f32 %v6683_v33, %v4131_v20  ;;  %9537 = vmatprep.subr.bf16.mxu1 %v10522_v8  ;;  %9546 = vmatprep.subr.bf16.mxu0 %v10522_v8  ;;  %v7275_v27 = vunpack.c.0.s8 %v7274_v50 }
0x182c   :  { %v6688_v21 = vmax.f32 %v6684_v41, 0.0  ;;  %v6690_v45 = vmax.f32 %v6686_v59, 0.0 }
0x182d   :  { %v6689_v54 = vmax.f32 %v6685_v7, 0.0  ;;  %v6691_v55 = vmax.f32 %v6687_v31, 0.0 }
0x182e   :  { %v6692_v5 = vpack.c.bf16 %v6690_v45, %v6688_v21  ;;  %v10366_v21 = vld [vmem:[#allocation8 + $0x18] sm:$0xff]  }
0x182f   :  { %v6693_v6 = vpack.c.bf16 %v6691_v55, %v6689_v54  ;;  %v7278_v55 = vsub.s32 %v7275_v27, %v10655_v2  ;;  %v10368_v2 = vld [vmem:[#allocation8 + $0x28] sm:$0xff]   ;;  %v7577_v27 = vld [vmem:[%s12010_s7 + $0x8] sm:$0xff] }
0x1831   :  { %6854 = vmatprep.mubr.bf16.mxu1 %v6693_v6 }
0x1832   :  { %6855 = vmatmul.mubr.bf16.vlgmr.msra.gmra.mrb[68].mxu1 %v6692_v5 }
0x1833   :  { %9045 = vmatprep.mubr.msk.f32.mxu1 %vm10523_vm6, %v10519_v19 }
0x1905   :  { %v9010_v9 = vpop.f32.mrb[68].mxu1 }
0x1906   :  { %v9011_v13 = vpop.f32.mrb[69].mxu1 }
0x1907   :  { %v11875_v49 = vadd.f32 %v9011_v13, %v9010_v9  ;;  %v9013_v51 = vpop.f32.mrb[70].mxu1  ;;  %v10367_v9 = vld [vmem:[#allocation8 + $0x20] sm:$0xff]  }
0x1908   :  { %v9014_v52 = vpop.f32.mrb[71].mxu1 }
0x1909   :  { %v11881_v48 = vadd.f32 %v9014_v52, %v9013_v51  ;;  %v6865_v32 = vmul.f32 %v11875_v49, %v11875_v49 }
0x190b   :  { %v6866_v20 = vmul.f32 %v11881_v48, %v11881_v48 }
0x190d   :  { %v9622_v10 = vpack.i.bf16 %v6866_v20, %v6865_v32 }
0x190f   :  { %9623 = vrot.lane.b32.xlu0 %v9622_v10, %s10524_s3  ;;  %v10369_v10 = vld [vmem:[#allocation8 + $0x30] sm:$0xff]  }
0x1981   :  { %v9624_v12 = vpop.permute.xlu0 %9623 }
0x1982   :  { %v9626_v26 = vunpack.i.h.bf16 %v9624_v12  ;;  %v9625_v24 = vunpack.i.l.bf16 %v9624_v12 }
0x1984   :  { %v6877_v29 = vsel %vm6875_vm0, %v11881_v48, %v9626_v26  ;;  %v6876_v37 = vsel %vm6875_vm0, %v11875_v49, %v9625_v24  ;;  %v10370_v24 = vld [vmem:[#allocation8 + $0x38] sm:$0xff]  }
0x1985   :  { %v9538_v30 = vpack.c.bf16 %v6877_v29, %v6876_v37 }
0x1987   :  { %9539 = vmatpush3.bf16.msra.mxu1 %v9538_v30  ;;  %v10371_v30 = vld [vmem:[#allocation8 + $0x40] sm:$0xff]  }
0x1988   :  { %9540 = vmatprep.subr.bf16.mxu1 %v10522_v8 }
0x198a   :  { %9046 = vmatmul.mubr.msk.f32.vlgmr.msra.gmra.mrb[66].mxu1 %vm12194_vm11, %v10520_v53  ;;  %vm11945_vm11 = vmor %vm7322_vm2, %vm7321_vm14 }
0x198b   :  { %9054 = vmatprep.mubr.msk.f32.mxu1 %vm10523_vm6, %v10519_v19  ;;  %9542 = vmatpush3.bf16.msk.msra.mxu1 %vm9541_vm12, %v10521_v56 }
0x198c   :  { %9052 = vmatprep.subr.mxu1 %v10519_v19 }
0x198f   :  { %9053 = vmatpush3.msk.msra.mxu1 %vm273_vm5, %v10520_v53 }
0x1990   :  { %9543 = vmatprep.subr.bf16.mxu1 %v10522_v8 }
0x1a5d   :  { %v6944_v16 = vpop.f32.mrb[66].mxu1 }
0x1a5e   :  { %7021 = vrot.lane.b32.xlu0 %v6944_v16, %s10525_s17  ;;  %v9047_v4 = vpop.f32.mrb[67].mxu1  ;;  %9055 = vmatmul.mubr.msk.f32.vlgmr.msra.gmra.mrb[72].mxu1 %vm6875_vm0, %v6944_v16 }
0x1a5f   :  { %9545 = vmatpush3.bf16.msk.msra.mxu1 %vm9541_vm12, %v10521_v56  ;;  %9063 = vmatprep.mubr.msk.f32.mxu1 %vm10523_vm6, %v10519_v19  ;;  %v279_v56 = vsel %vm278_vm9, 1.0, %v10519_v19  ;;  %vm7512_vm12 = vcmask 523264   ;;  %vm7585_vm9 = vcmask 531456  }
0x1a60   :  { %9061 = vmatprep.subr.mxu1 %v10519_v19 }
0x1a63   :  { %9062 = vmatpush3.msk.msra.mxu1 %vm273_vm5, %v10520_v53  ;;  %vm7589_vm5 = vcmask 1040384  }
0x1a64   :  { %9066 = vmatprep.subr.mxu1 %v10519_v19 }
0x1ad0   :  { %v7022_v35 = vpop.permute.xlu0 %7021 }
0x1ad1   :  { %9064 = vmatmul.mubr.msk.f32.vlgmr.msra.gmra.mrb[74].mxu1 %vm6875_vm0, %v7022_v35  ;;  %v10373_v35 = vld [vmem:[#allocation8 + $0x50] sm:$0xff]   ;;  %vm7318_vm0 = vcmask 982016  }
0x1ad2   :  { %9068 = vmatprep.mubr.msk.f32.mxu1 %vm10523_vm6, %v10519_v19  ;;  %9067 = vmatpush3.msk.msra.mxu1 %vm7109_vm3, %v279_v56 }
0x1ad3   :  { %9071 = vmatprep.subr.mxu1 %v10519_v19 }
0x1b31   :  { %v7017_v47 = vpop.f32.mrb[72].mxu1 }
0x1b32   :  { %v9056_v58 = vpop.f32.mrb[73].mxu1  ;;  %v7095_v53 = vmul.f32 0.0078125, %v7017_v47 }
0x1b34   :  { %v7097_v14 = vmul.f32 %v7095_v53, %v7095_v53 }
0x1ba4   :  { %v7091_v22 = vpop.f32.mrb[74].mxu1 }
0x1ba5   :  { %v7096_v44 = vmul.f32 0.0078125, %v7091_v22  ;;  %v9065_v36 = vpop.f32.mrb[75].mxu1 }
0x1ba7   :  { %v7098_v38 = vsub.f32 %v7096_v44, %v7097_v14 }
0x1ba9   :  { %v7099_v23 = vmax.f32 %v7098_v38, 0.0 }
0x1bab   :  { %v7100_v63 = vadd.f32 1e-05, %v7099_v23 }
0x1bad   :  { %10385 = vrsqrt.f32 %v7100_v63 }
0x1bb7   :  { %v10386_v25 = vpop.eup %10385 }
0x1bb8   :  { %v7102_v34 = vmul.f32 %v10386_v25, %v6863_v3 }
0x1bba   :  { %9069 = vmatmul.mubr.msk.f32.vlgmr.msra.gmra.mrb[76].mxu1 %vm7105_vm1, %v7102_v34  ;;  %v7103_v28 = vmul.f32 %v7102_v34, %v7095_v53 }
0x1bbb   :  { %9072 = vmatpush3.msk.msra.mxu1 %vm7109_vm3, %v279_v56  ;;  %9073 = vmatprep.mubr.msk.f32.mxu1 %vm10523_vm6, %v10519_v19  ;;  %v10374_v56 = vld [vmem:[#allocation8 + $0x58] sm:$0xff]   ;;  %vm7311_vm6 = vcmask 975616   ;;  %vm7556_vm3 = vcmask 517120  }
0x1bbc   :  { %v7104_v17 = vsub.f32 %v6864_v42, %v7103_v28  ;;  %7516 = vmatprep.subr.bf16.mxu1 %v10518_v1 }
0x1bbe   :  { %9074 = vmatmul.mubr.msk.f32.vlgmr.msra.gmra.mrb[78].mxu1 %vm7105_vm1, %v7104_v17 }
0x1bbf   :  { %7517 = vmatpush1.bf16.msra.mxu1 %v10363_v18 }
0x1bc0   :  { %7518 = vmatprep.subr.bf16.mxu1 %v10518_v1 }
0x1bc3   :  { %7519 = vmatpush1.bf16.msra.mxu1 %v10364_v60 }
0x1bc4   :  { %7520 = vmatprep.subr.bf16.mxu1 %v10518_v1 }
0x1bc7   :  { %7521 = vmatpush1.bf16.msra.mxu1 %v10365_v15  ;;  %v7576_v15 = vld [vmem:[%s12010_s7] sm:$0xff] }
0x1bc8   :  { %7522 = vmatprep.subr.bf16.mxu1 %v10518_v1 }
0x1bcb   :  { %7523 = vmatpush1.bf16.msra.mxu1 %v10366_v21  ;;  %v7581_v21 = vld [vmem:[%s12010_s7 + $0x28] sm:$0xff] }
0x1bcc   :  { %7524 = vmatprep.subr.bf16.mxu1 %v10518_v1 }
0x1bcf   :  { %7525 = vmatpush1.bf16.msra.mxu1 %v10367_v9  ;;  %v8628_v9 = vld [vmem:[#allocation10] ss:$0 sm:$0xff] }
0x1bd0   :  { %7526 = vmatprep.subr.bf16.mxu1 %v10518_v1 }
0x1bd3   :  { %7527 = vmatpush1.bf16.msra.mxu1 %v10368_v2 }
0x1bd4   :  { %7528 = vmatprep.subr.bf16.mxu1 %v10518_v1 }
0x1bd7   :  { %7529 = vmatpush1.bf16.msra.mxu1 %v10369_v10 }
0x1bd8   :  { %7530 = vmatprep.subr.bf16.mxu1 %v10518_v1 }
0x1bdb   :  { %7531 = vmatpush1.bf16.msra.mxu1 %v10370_v24 }
0x1bdc   :  { %7532 = vmatprep.subr.bf16.mxu1 %v10518_v1 }
0x1bdf   :  { %7533 = vmatpush1.bf16.msra.mxu1 %v10371_v30 }
0x1be0   :  { %7534 = vmatprep.subr.bf16.mxu1 %v10518_v1 }
0x1be3   :  { %7535 = vmatpush1.bf16.msra.mxu1 %v10372_v43 }
0x1be4   :  { %7536 = vmatprep.subr.bf16.mxu1 %v10518_v1 }
0x1be7   :  { %7537 = vmatpush1.bf16.msra.mxu1 %v10373_v35 }
0x1be8   :  { %7538 = vmatprep.subr.bf16.mxu1 %v10518_v1 }
0x1beb   :  { %7539 = vmatpush1.bf16.msra.mxu1 %v10374_v56 }
0x1c8d   :  { %v7179_v57 = vpop.f32.mrb[76].mxu1 }
0x1c8e   :  { %v7186_v62 = vrot.slane %v7179_v57, %v11073_v61  ;;  %v9070_v11 = vpop.f32.mrb[77].mxu1 }
0x1c90   :  { %v7187_v41 = vmul.f32 %v11875_v49, %v7186_v62  ;;  %v7188_v59 = vmul.f32 %v11881_v48, %v7186_v62 }
0x1c91   :  { %v7258_v33 = vpop.f32.mrb[78].mxu1 }
0x1c92   :  { %v7265_v7 = vrot.slane %v7258_v33, %v11073_v61  ;;  %v9075_v31 = vpop.f32.mrb[79].mxu1  ;;  %v7578_v33 = vld [vmem:[%s12010_s7 + $0x10] sm:$0xff] }
0x1c93   :  { %v7580_v31 = vld [vmem:[%s12010_s7 + $0x20] sm:$0xff] }
0x1c94   :  { %v7266_v45 = vadd.f32 %v7265_v7, %v7187_v41  ;;  %v7267_v54 = vadd.f32 %v7265_v7, %v7188_v59  ;;  %v9547_v41 = vpack.c.bf16 %v7577_v27, %v7576_v15  ;;  %v7579_v59 = vld [vmem:[%s12010_s7 + $0x18] sm:$0xff] }
0x1c95   :  { %v9550_v7 = vpack.c.bf16 %v7579_v59, %v7578_v33 }
0x1c96   :  { %v7268_v5 = vmax.f32 %v7266_v45, 0.0  ;;  %v7269_v6 = vmax.f32 %v7267_v54, 0.0  ;;  %9548 = vmatpush3.bf16.msra.mxu0 %v9547_v41  ;;  %v9553_v45 = vpack.c.bf16 %v7581_v21, %v7580_v31  ;;  %v7582_v54 = vld [vmem:[%s12010_s7 + $0x30] sm:$0xff] }
0x1c97   :  { %9549 = vmatprep.subr.bf16.mxu0 %v10522_v8 }
0x1c98   :  { %v7279_v13 = vrot.slane %v7268_v5, %v7278_v55  ;;  %7271 = vst.msk [vmem:[#allocation2] sm:$0x1] %vm7270_vm15, %v7268_v5  ;;  %7338 = vst.msk [vmem:[#allocation2 + $0x1] sm:$0x1] %vm7270_vm15, %v7269_v6  ;;  %v7346_v51 = vrot.slane %v7269_v6, %v7278_v55  ;;  %v7300_v32 = vcombine.high %v7268_v5, %v7268_v5 }
0x1c99   :  { %v7364_v20 = vcombine.high %v7269_v6, %v7269_v6  ;;  %v7584_v6 = vld [vmem:[%s12010_s7 + $0x40] sm:$0x1] }
0x1c9a   :  { %v7287_v61 = vcombine.high %v7279_v13, %v7279_v13  ;;  %v8619_v49 = vrot.slane %v7279_v13, 9  ;;  %v7353_v52 = vcombine.high %v7346_v51, %v7346_v51  ;;  %v8623_v48 = vrot.slane %v7346_v51, 9  ;;  %9551 = vmatpush3.bf16.msra.mxu0 %v9550_v7 }
0x1c9b   :  { %v7307_v12 = vrot.slane %v7300_v32, %v7278_v55  ;;  %v7371_v26 = vrot.slane %v7364_v20, %v7278_v55  ;;  %9552 = vmatprep.subr.bf16.mxu0 %v10522_v8  ;;  %v7583_v55 = vld [vmem:[%s12010_s7 + $0x38] sm:$0xff] }
0x1c9c   :  { %7288 = vrot.lane.b32.xlu0 %v7287_v61, %s10527_s18  ;;  %7282 = vrot.lane.b32.xlu1 %v8619_v49, %s10524_s3  ;;  %v8620_v29 = vrot.slane %v7287_v61, 9  ;;  %v8624_v4 = vrot.slane %v7353_v52, 9  ;;  %v9556_v5 = vpack.c.bf16 %v7583_v55, %v7582_v54 }
0x1c9d   :  { %v8621_v37 = vrot.slane %v7307_v12, 9  ;;  %v7325_v40 = vcombine.high %v7307_v12, %v7307_v12  ;;  %v8625_v39 = vrot.slane %v7371_v26, 9  ;;  %v7384_v46 = vcombine.high %v7371_v26, %v7371_v26 }
0x1c9e   :  { %9554 = vmatpush3.bf16.msra.mxu0 %v9553_v45 }
0x1c9f   :  { %v8622_v16 = vrot.slane %v7325_v40, 9  ;;  %v8626_v47 = vrot.slane %v7384_v46, 9  ;;  %9555 = vmatprep.subr.bf16.mxu0 %v10522_v8 }
0x1ca0   :  { %7354 = vrot.lane.b32.xlu0 %v7353_v52, %s10527_s18  ;;  %7349 = vrot.lane.b32.xlu1 %v8623_v48, %s10524_s3 }
0x1ca2   :  { %9557 = vmatpush3.bf16.msra.mxu0 %v9556_v5 }
0x1ca3   :  { %9092 = vmatprep.subr.mxu0 %v10519_v19 }
0x1ca4   :  { %7308 = vrot.lane.b32.xlu0 %v7307_v12, %s10528_s12  ;;  %7372 = vrot.lane.b32.xlu1 %v7371_v26, %s10528_s12 }
0x1ca6   :  { %9093 = vmatpush3.msk.msra.mxu0 %vm7589_vm5, %v7584_v6 }
0x1ca8   :  { %7295 = vrot.lane.b32.xlu0 %v8620_v29, %s10529_s13  ;;  %7315 = vrot.lane.b32.xlu1 %v8621_v37, %s10530_s15 }
0x1cac   :  { %7326 = vrot.lane.b32.xlu0 %v7325_v40, %s10531_s16  ;;  %7378 = vrot.lane.b32.xlu1 %v8625_v39, %s10530_s15 }
0x1cb0   :  { %7333 = vrot.lane.b32.xlu0 %v8622_v16, %s10532_s19  ;;  %7360 = vrot.lane.b32.xlu1 %v8624_v4, %s10529_s13 }
0x1cb4   :  { %7385 = vrot.lane.b32.xlu1 %v7384_v46, %s10531_s16 }
0x1cb8   :  { %7391 = vrot.lane.b32.xlu1 %v8626_v47, %s10532_s19 }
0x1d0e   :  { %v7289_v58 = vpop.permute.xlu0 %7288  ;;  %v7283_v53 = vpop.permute.xlu1 %7282 }
0x1d0f   :  { %7286 = vst.msk [vmem:[#allocation2] sm:$0x1] %vm7285_vm4, %v7283_v53 }
0x1d10   :  { %7292 = vst.msk [vmem:[#allocation2] sm:$0x1] %vm7291_vm7, %v7289_v58 }
0x1d12   :  { %v7355_v22 = vpop.permute.xlu0 %7354  ;;  %v7350_v14 = vpop.permute.xlu1 %7349 }
0x1d13   :  { %7352 = vst.msk [vmem:[#allocation2 + $0x1] sm:$0x1] %vm7285_vm4, %v7350_v14 }
0x1d14   :  { %7357 = vst.msk [vmem:[#allocation2 + $0x1] sm:$0x1] %vm7291_vm7, %v7355_v22 }
0x1d16   :  { %v7309_v44 = vpop.permute.xlu0 %7308  ;;  %v7373_v36 = vpop.permute.xlu1 %7372 }
0x1d1a   :  { %v7296_v1 = vpop.permute.xlu0 %7295  ;;  %v7316_v38 = vpop.permute.xlu1 %7315 }
0x1d1b   :  { %7299 = vst.msk [vmem:[#allocation2] sm:$0x1] %vm7298_vm10, %v7296_v1  ;;  %v7317_v63 = vrot.slane %v7316_v38, 6 }
0x1d1c   :  { %7312 = vst.msk [vmem:[#allocation2] sm:$0x1] %vm7311_vm6, %v7309_v44 }
0x1d1d   :  { %v7319_v3 = vsel %vm7318_vm0, %v7317_v63, %v7316_v38 }
0x1d1e   :  { %7324 = vst.msk [vmem:[#allocation2] sm:$0x5] %vm11945_vm11, %v7319_v3  ;;  %v7327_v25 = vpop.permute.xlu0 %7326  ;;  %v7379_v34 = vpop.permute.xlu1 %7378 }
0x1d1f   :  { %7330 = vst.msk [vmem:[#allocation2 + $0x2] sm:$0x1] %vm7329_vm13, %v7327_v25  ;;  %v7380_v42 = vrot.slane %v7379_v34, 6 }
0x1d21   :  { %v7381_v18 = vsel %vm7318_vm0, %v7380_v42, %v7379_v34 }
0x1d22   :  { %v7334_v28 = vpop.permute.xlu0 %7333  ;;  %v7361_v17 = vpop.permute.xlu1 %7360 }
0x1d23   :  { %7337 = vst.msk [vmem:[#allocation2 + $0x2] sm:$0x1] %vm7336_vm8, %v7334_v28 }
0x1d24   :  { %7363 = vst.msk [vmem:[#allocation2 + $0x1] sm:$0x1] %vm7298_vm10, %v7361_v17 }
0x1d25   :  { %7375 = vst.msk [vmem:[#allocation2 + $0x1] sm:$0x1] %vm7311_vm6, %v7373_v36 }
0x1d26   :  { %7383 = vst.msk [vmem:[#allocation2 + $0x1] sm:$0x5] %vm11945_vm11, %v7381_v18  ;;  %v7386_v60 = vpop.permute.xlu1 %7385 }
0x1d27   :  { %7388 = vst.msk [vmem:[#allocation2 + $0x3] sm:$0x1] %vm7329_vm13, %v7386_v60 }
0x1d2a   :  { %v7392_v0 = vpop.permute.xlu1 %7391 }
0x1d2b   :  { %7394 = vst.msk [vmem:[#allocation2 + $0x3] sm:$0x1] %vm7336_vm8, %v7392_v0 }
0x1d32   :  { %v8627_v50 = vld.sshfl [vmem:[#allocation2] sm:$0x33 pattern:$0x76325410] }
0x1d33   :  { %v7404_v57 = vcombine.high %v8627_v50, %v8627_v50  ;;  %v7407_v11 = vpack.c.bf16 %v8627_v50, %v8627_v50 }
0x1d35   :  { %v7408_v62 = vpack.c.bf16 %v7404_v57, %v7404_v57 }
0x1d37   :  { %8641 = vmatprep.mubr.msk.bf16.mxu1 %vm7512_vm12, %v7408_v62 }
0x1d38   :  { %7549 = vmatmul.mubr.bf16.vlgmr.msra.gmra.mrb[80].mxu1 %v7407_v11 }
0x1e0b   :  { %v7550_v13 = vpop.f32.mrb[80].mxu1 }
0x1e0c   :  { %v7551_v61 = vadd.f32 %v8628_v9, %v7550_v13  ;;  %v7552_v49 = vpop.f32.mrb[81].mxu1 }
0x1e0d   :  { %v7553_v51 = vpop.f32.mrb[82].mxu1 }
0x1e0e   :  { %v7554_v2 = vpop.f32.mrb[83].mxu1  ;;  %v7557_v52 = vsel %vm7556_vm3, %v7551_v61, -inf  ;;  %v7570_v48 = vmax.f32 %v7551_v61, 0.0 }
0x1e0f   :  { %7558 = vmax.xlane.f32.xlu1 %v7557_v52 }
0x1e10   :  { %7572 = vrot.lane.b32.xlu0 %v7570_v48, %s10513_s2 }
0x1e82   :  { %v7573_v19 = vpop.permute.xlu0 %7572 }
0x1e83   :  { %v7575_v8 = vsel %vm7512_vm12, %v7573_v19, 1.0 }
0x1e84   :  { %9095 = vmatmul.mubr.msk.f32.vlgmr.msra.gmra.mrb[42].mxu0 %vm7585_vm9, %v7575_v8 }
0x1e9c   :  { %v7559_v32 = vpop.xlane.xlu1 %7558 }
0x1e9d   :  { %v7560_v20 = vsub.f32 %v7551_v61, %v7559_v32 }
0x1e9f   :  { %v7561_v10 = vmul.f32 1.442695, %v7560_v20 }
0x1ea1   :  { %10387 = vpow2.f32 %v7561_v10 }
0x1eab   :  { %v10388_v12 = vpop.eup %10387 }
0x1eac   :  { %v7563_v26 = vsel %vm7556_vm3, %v10388_v12, 0.0 }
0x1ead   :  { %7564 = vadd.xlane.f32.xlu0 %v7563_v26 }
0x1f3a   :  { %v7565_v30 = vpop.xlane.xlu0 %7564 }
0x1f57   :  { %v7659_v24 = vpop.f32.mrb[42].mxu0 }
0x1f58   :  { %10389 = vtanh.f32 %v7659_v24  ;;  %v9096_v29 = vpop.f32.mrb[43].mxu0 }
0x1f59   :  { %10391 = vlog2.f32 %v7565_v30 }
0x1f62   :  { %v10390_v37 = vpop.eup %10389 }
0x1f63   :  { %7665 = vrot.lane.b32.xlu0 %v10390_v37, %s10513_s2  ;;  %v10392_v40 = vpop.eup %10391 }
0x1f64   :  { %v7567_v39 = vmul.f32 0.6931472, %v10392_v40 }
0x1f66   :  { %v7568_v43 = vadd.f32 %v7567_v39, %v7559_v32 }
0x1f68   :  { %v7569_v16 = vsub.f32 %v7551_v61, %v7568_v43 }
0x1fd5   :  { %v7666_v4 = vpop.permute.xlu0 %7665 }
0x1fd6   :  { %v7668_v35 = vsel %vm7512_vm12, %v7569_v16, %v7666_v4 }
0x1fd7   :  { %v7669_v46 = vsel %vm7585_vm9, %v7668_v35, 0.0 }
0x1fd8   :  { %7670 = vst [vmem:[%s12011_s8] sm:$0x3] %v7669_v46 }
0x1fd9   :  { %7675 = vsyncpa [#allocation4], 1 }
0x1fda   :  { %7676 = vsyncpa [#allocation6], 1 }
0x1fdb   :  { %7677 = vsyncpa [#allocation9], 1 }

</bundles_post_ra>
